<compile_context>
chip_gen: v5e
topology: v5e:2x2
jax: 0.10.0
libtpu: 0.0.40
codegen_flags: <defaults>
</compile_context>

<pallas_src>
import math
import numpy as np

import jax
import jax.numpy as jnp
from jax import lax
from jax.experimental import pallas as pl
from jax.experimental.pallas import tpu as pltpu

# ---------------- config (small, shape-consistent with the module) ----------------
HIDDEN = 128
NUM_HEADS = 4
NUM_KV_HEADS = 1                       # MQA (see TODO above)
HEAD_DIM = 32
Q_SIZE = NUM_HEADS * HEAD_DIM          # 128
KV_SIZE = NUM_KV_HEADS * HEAD_DIM      # 32
QKV_OUT = Q_SIZE + 2 * KV_SIZE         # 192
INTERMEDIATE = 256
SEQLEN = 8
CACHE_LEN = 16
ATTN_TYPES = ("local", "global")       # one LOCAL_SLIDING layer, one GLOBAL layer
SLIDING_WINDOW = 8
SOFTCAP = 50.0                         # attn_logit_softcapping
SCALING = HEAD_DIM ** -0.5
MASK_MIN = -1e9
RMS_EPS = 1e-30                        # NaN guard (negligible vs. sq_sum >= ~1)

# float16-rounded sqrt(hidden_size), exactly like
# torch.tensor(hidden_size ** 0.5, dtype=torch.float16).  Computed with numpy at
# module scope so it is a plain Python float at trace time.
NORMALIZER = float(np.float16(HIDDEN ** 0.5))


# ================================ in-kernel helpers ================================

def _rms_channel(x, w_row):
    # ANERMSNorm over the channel axis (num_expands=2, dim=-3 in NCHW == last dim of
    # our (S, C) slab), add_unit_offset=True.  Equivalent to the reference's
    # max-prescaled form: sqrt(C) * x / sqrt(sum(x^2)).
    r = lax.rsqrt(jnp.sum(x * x, axis=-1, keepdims=True) + RMS_EPS)
    return x * (r * (x.shape[-1] ** 0.5)) * (1.0 + w_row)


def _rms_rope(x, w_row, cos, sin, scale):
    # Per-head ANERMSNorm (num_expands=0, dim=-1) -> rotary embedding -> scaling.
    # x: (R, D) f32, w_row: (1, D), cos/sin: (R, D).
    d = x.shape[-1]
    r = lax.rsqrt(jnp.sum(x * x, axis=-1, keepdims=True) + RMS_EPS)
    x = x * (r * (d ** 0.5)) * (1.0 + w_row)
    half = d // 2
    xrot = jnp.concatenate([-x[:, half:], x[:, :half]], axis=-1)       # rotate_half
    return (x * cos + xrot * sin) * scale


# ================================ fused whole-model kernel ================================

def _model_kernel(widx_ref, h_ref, gmask_ref, lmask_ref,
                  kc_l_ref, vc_l_ref, kc_g_ref, vc_g_ref,
                  qkv_wt_ref, o_wt_ref, gu_wt_ref, dn_wt_ref,
                  ln_ref, qn_ref, kn_ref,
                  cos_l_ref, sin_l_ref, cos_g_ref, sin_g_ref,
                  h_out_ref, kc_l_out, vc_l_out, kc_g_out, vc_g_out):
    # Aliased cache outputs: copy whole caches once, then each layer overwrites only
    # its SEQLEN freshly-written rows via a dynamic-slice store.
    kc_l_out[...] = kc_l_ref[...]
    vc_l_out[...] = vc_l_ref[...]
    kc_g_out[...] = kc_g_ref[...]
    vc_g_out[...] = vc_g_ref[...]

    # NCHW slab arrives as (C, S); go lane-dense (S, C) with one in-kernel transpose.
    # First-layer normalizer (i == 0 in the reference driver) applied once up front.
    x = jnp.transpose(h_ref[...]) * NORMALIZER                          # (S, C) f32

    def decoder_layer(x, li, widx, mask, cos, sin, kc_out, vc_out, cache_idx):
        ln = ln_ref[li]                                                 # (4, C) f32
        residual = x

        # ---- input layernorm + fused QKV projection ----
        xn = _rms_channel(x, ln[0:1])
        qkv = jnp.dot(xn.astype(jnp.bfloat16), qkv_wt_ref[li],
                      preferred_element_type=jnp.float32)               # (S, 192) f32

        # ---- K / V (single KV head, MQA) ----
        xk = qkv[:, Q_SIZE:Q_SIZE + HEAD_DIM]                           # (S, D)
        xv = qkv[:, Q_SIZE + HEAD_DIM:Q_SIZE + 2 * HEAD_DIM]            # (S, D)
        xk = _rms_rope(xk, kn_ref[li], cos, sin, 1.0)

        # ---- KV-cache update: one dynamic-slice store of the S new rows ----
        start = widx if SEQLEN != CACHE_LEN else 0
        kc_out[cache_idx, 0, pl.ds(start, SEQLEN), :] = xk
        vc_out[cache_idx, 0, pl.ds(start, SEQLEN), :] = xv
        k_full = kc_out[cache_idx, 0]                                   # (L, D) f32
        v_full = vc_out[cache_idx, 0]                                   # (L, D) f32

        # ---- multi-head attention, all heads batched on the sublane axis ----
        # rows [h*S:(h+1)*S] of the stack belong to head h.
        q_stack = jnp.concatenate(
            [qkv[:, h * HEAD_DIM:(h + 1) * HEAD_DIM] for h in range(NUM_HEADS)],
            axis=0)                                                     # (H*S, D) = (32, 32)
        cos_st = jnp.concatenate([cos] * NUM_HEADS, axis=0)
        sin_st = jnp.concatenate([sin] * NUM_HEADS, axis=0)
        q_stack = _rms_rope(q_stack, qn_ref[li], cos_st, sin_st, SCALING)

        scores = lax.dot_general(q_stack, k_full, (((1,), (1,)), ((), ())),
                                 preferred_element_type=jnp.float32)    # (H*S, L) f32
        scores = jnp.tanh(scores * (1.0 / SOFTCAP)) * SOFTCAP           # logit softcapping
        scores = scores + jnp.concatenate([mask] * NUM_HEADS, axis=0)   # user-provided mask
        m = jnp.max(scores, axis=-1, keepdims=True)
        e = jnp.exp(scores - m)
        p = e / jnp.sum(e, axis=-1, keepdims=True)                      # exact softmax
        attn_stack = jnp.dot(p, v_full,
                             preferred_element_type=jnp.float32)        # (H*S, D) f32
        attn = jnp.concatenate(
            [attn_stack[h * SEQLEN:(h + 1) * SEQLEN, :] for h in range(NUM_HEADS)],
            axis=-1)                                                    # (S, H*D) = (8, 128)

        # ---- output projection + post-attn norm + residual ----
        attn = jnp.dot(attn.astype(jnp.bfloat16), o_wt_ref[li],
                       preferred_element_type=jnp.float32)              # (S, C)
        x = residual + _rms_channel(attn, ln[1:2])
        residual = x

        # ---- MLP: fused gate|up matmul, tanh-gelu, down projection ----
        xn = _rms_channel(x, ln[2:3])
        gu = jnp.dot(xn.astype(jnp.bfloat16), gu_wt_ref[li],
                     preferred_element_type=jnp.float32)                # (S, 2*I) = (8, 512)
        gate = jax.nn.gelu(gu[:, :INTERMEDIATE], approximate=True)
        ff = gate * gu[:, INTERMEDIATE:]
        x = jnp.dot(ff.astype(jnp.bfloat16), dn_wt_ref[li],
                    preferred_element_type=jnp.float32)                 # (S, C)
        return residual + _rms_channel(x, ln[3:4])

    # Unrolled (static) loop over the decoder layers — everything stays on-chip.
    local_i = 0
    global_i = 0
    for li, attn_type in enumerate(ATTN_TYPES):
        if attn_type == "local":
            x = decoder_layer(x, li, widx_ref[li], lmask_ref[...],
                              cos_l_ref[...], sin_l_ref[...],
                              kc_l_out, vc_l_out, local_i)
            local_i += 1
        else:
            x = decoder_layer(x, li, widx_ref[li], gmask_ref[...],
                              cos_g_ref[...], sin_g_ref[...],
                              kc_g_out, vc_g_out, global_i)
            global_i += 1

    h_out_ref[...] = jnp.transpose(x)                                   # back to (C, S)


# ================================ model wrapper (single fused call) ================================

def ane_gemma_model(hidden_states, params, rope_embs, global_write_indices,
                    local_write_indices, mask, local_mask, global_kv_cache, local_kv_cache):
    # hidden_states: (1, HIDDEN, 1, S) NCHW, like the PyTorch module.
    b, c, one, s = hidden_states.shape
    h2d = hidden_states.reshape(c, s)                   # free bitcast (b == one == 1)
    gmask = mask.reshape(SEQLEN, CACHE_LEN)             # (S, L)
    lmask = local_mask.reshape(SEQLEN, CACHE_LEN)

    cos_l, sin_l = rope_embs["local"]
    cos_g, sin_g = rope_embs["global"]
    gk, gv = global_kv_cache
    lk, lv = local_kv_cache

    # Per-layer KV write index (local layers use local index, global layers global).
    widx = jnp.stack([
        jnp.asarray(local_write_indices if t == "local" else global_write_indices,
                    dtype=jnp.int32).reshape(())
        for t in ATTN_TYPES])

    vmem = pl.BlockSpec(memory_space=pltpu.MemorySpace.VMEM)
    smem = pl.BlockSpec(memory_space=pltpu.MemorySpace.SMEM)

    # Advisory cost hint for XLA scheduling around the custom call.
    per_layer_flops = (2 * SEQLEN * HIDDEN * QKV_OUT
                       + 2 * SEQLEN * Q_SIZE * HIDDEN
                       + 2 * SEQLEN * HIDDEN * 2 * INTERMEDIATE
                       + 2 * SEQLEN * INTERMEDIATE * HIDDEN
                       + 2 * 2 * NUM_HEADS * SEQLEN * HEAD_DIM * CACHE_LEN)
    flops = per_layer_flops * len(ATTN_TYPES)
    transcendentals = len(ATTN_TYPES) * (
        2 * NUM_HEADS * SEQLEN * CACHE_LEN + SEQLEN * INTERMEDIATE + 128)
    param_bytes = sum(int(v.size) * v.dtype.itemsize for v in params.values())
    act_bytes = (2 * h2d.size + gmask.size + lmask.size + 4 * cos_l.size) * 4 \
        + 2 * (lk.size + lv.size + gk.size + gv.size) * 4
    cost = pl.CostEstimate(flops=flops, transcendentals=transcendentals,
                           bytes_accessed=param_bytes + act_bytes)

    out_shape = (
        jax.ShapeDtypeStruct((c, s), hidden_states.dtype),
        jax.ShapeDtypeStruct(lk.shape, lk.dtype),
        jax.ShapeDtypeStruct(lv.shape, lv.dtype),
        jax.ShapeDtypeStruct(gk.shape, gk.dtype),
        jax.ShapeDtypeStruct(gv.shape, gv.dtype),
    )

    h_out, lk2, lv2, gk2, gv2 = pl.pallas_call(
        _model_kernel,
        out_shape=out_shape,
        in_specs=[smem] + [vmem] * 18,
        out_specs=(vmem, vmem, vmem, vmem, vmem),
        # caches updated in place: inputs 4..7 -> outputs 1..4
        input_output_aliases={4: 1, 5: 2, 6: 3, 7: 4},
        cost_estimate=cost,
    )(widx, h2d, gmask, lmask, lk, lv, gk, gv,
      params["qkv_wt"], params["o_wt"], params["gu_wt"], params["dn_wt"],
      params["ln_w"], params["qn_w"], params["kn_w"],
      cos_l, sin_l, cos_g, sin_g)

    out = h_out.reshape(1, c, 1, s)                      # back to NCHW (free bitcast)
    return out, (gk2, gv2), (lk2, lv2)


ane_gemma_model_jit = jax.jit(ane_gemma_model)


# ================================ deterministic setup ================================

def init_params(key):
    # Torch-like parameter shapes: Linear weights are (out, in), norm weights 1-D.
    params = []
    for i in range(len(ATTN_TYPES)):
        ks = jax.random.split(jax.random.fold_in(key, i), 11)

        def w(k, shape, fan_in):
            return jax.random.normal(k, shape, jnp.float32) / math.sqrt(fan_in)

        params.append(dict(
            qkv_w=w(ks[0], (QKV_OUT, HIDDEN), HIDDEN),
            o_w=w(ks[1], (HIDDEN, Q_SIZE), Q_SIZE),
            gate_w=w(ks[2], (INTERMEDIATE, HIDDEN), HIDDEN),
            up_w=w(ks[3], (INTERMEDIATE, HIDDEN), HIDDEN),
            down_w=w(ks[4], (HIDDEN, INTERMEDIATE), INTERMEDIATE),
            input_ln=0.1 * jax.random.normal(ks[5], (HIDDEN,), jnp.float32),
            post_attn_ln=0.1 * jax.random.normal(ks[6], (HIDDEN,), jnp.float32),
            pre_ffw_ln=0.1 * jax.random.normal(ks[7], (HIDDEN,), jnp.float32),
            post_ffw_ln=0.1 * jax.random.normal(ks[8], (HIDDEN,), jnp.float32),
            query_norm=0.1 * jax.random.normal(ks[9], (HEAD_DIM,), jnp.float32),
            key_norm=0.1 * jax.random.normal(ks[10], (HEAD_DIM,), jnp.float32),
        ))
    return params


def prepare_params(raw_params):
    # Kernel layout: weights pre-transposed for x @ W^T, stored bf16, gate|up fused,
    # and ALL layers stacked along a leading axis so the whole model is one call.
    qkv_wt, o_wt, gu_wt, dn_wt, ln_w, qn_w, kn_w = [], [], [], [], [], [], []
    for p in raw_params:
        qkv_wt.append(jnp.transpose(p["qkv_w"]).astype(jnp.bfloat16))          # (C, 192)
        o_wt.append(jnp.transpose(p["o_w"]).astype(jnp.bfloat16))              # (128, C)
        gu_wt.append(jnp.transpose(
            jnp.concatenate([p["gate_w"], p["up_w"]], axis=0)).astype(jnp.bfloat16))  # (C, 2I)
        dn_wt.append(jnp.transpose(p["down_w"]).astype(jnp.bfloat16))          # (I, C)
        ln_w.append(jnp.stack([p["input_ln"], p["post_attn_ln"],
                               p["pre_ffw_ln"], p["post_ffw_ln"]]))            # (4, C)
        qn_w.append(p["query_norm"].reshape(1, HEAD_DIM))
        kn_w.append(p["key_norm"].reshape(1, HEAD_DIM))
    return dict(
        qkv_wt=jnp.stack(qkv_wt), o_wt=jnp.stack(o_wt),
        gu_wt=jnp.stack(gu_wt), dn_wt=jnp.stack(dn_wt),
        ln_w=jnp.stack(ln_w), qn_w=jnp.stack(qn_w), kn_w=jnp.stack(kn_w))


def rope_cos_sin(positions, head_dim, base):
    inv_freq = 1.0 / (base ** (jnp.arange(0, head_dim, 2, dtype=jnp.float32) / head_dim))
    freqs = positions[:, None].astype(jnp.float32) * inv_freq[None, :]          # (S, D/2)
    emb = jnp.concatenate([freqs, freqs], axis=-1)                              # (S, D)
    return jnp.cos(emb), jnp.sin(emb)


def build_masks(write_idx):
    # Decode-style causal and sliding-window mask biases, (1, 1, S, L) like the
    # PyTorch driver; these are consumed by the kernel.
    q_pos = write_idx + jnp.arange(SEQLEN)
    k_pos = jnp.arange(CACHE_LEN)
    causal = k_pos[None, :] <= q_pos[:, None]                                   # (S, L)
    mask = jnp.where(causal, 0.0, MASK_MIN).astype(jnp.float32)[None, None]
    local = causal & (k_pos[None, :] > q_pos[:, None] - SLIDING_WINDOW)
    local_mask = jnp.where(local, 0.0, MASK_MIN).astype(jnp.float32)[None, None]
    return mask, local_mask


if __name__ == "__main__":
    key = jax.random.PRNGKey(0)
    k_h, k_p = jax.random.split(key)

    hidden_states = jax.random.normal(k_h, (1, HIDDEN, 1, SEQLEN), jnp.float32)
    params = prepare_params(init_params(k_p))

    write_idx = 4
    positions = write_idx + jnp.arange(SEQLEN)
    rope_embs = {
        "local": rope_cos_sin(positions, HEAD_DIM, 10000.0),
        "global": rope_cos_sin(positions, HEAD_DIM, 1000000.0),
    }
    mask, local_mask = build_masks(write_idx)

    cache_shape = (1, NUM_KV_HEADS, CACHE_LEN, HEAD_DIM)
    global_kv_cache = (jnp.zeros(cache_shape, jnp.float32), jnp.zeros(cache_shape, jnp.float32))
    local_kv_cache = (jnp.zeros(cache_shape, jnp.float32), jnp.zeros(cache_shape, jnp.float32))

    out, (gk, gv), (lk, lv) = ane_gemma_model_jit(
        hidden_states, params, rope_embs, jnp.int32(write_idx), jnp.int32(write_idx),
        mask, local_mask, global_kv_cache, local_kv_cache)
    jax.block_until_ready((out, gk, gv, lk, lv))
    assert out.shape == (1, HIDDEN, 1, SEQLEN)
    assert gk.shape == cache_shape and lk.shape == cache_shape
    print("KERNEL_OK")
</pallas_src>

<mosaic_0001>
module attributes {stable_mosaic.version = 11 : i64} {
  func.func @_model_kernel(%arg0: memref<2xi32, #tpu.memory_space<smem>>, %arg1: memref<128x8xf32, #tpu.memory_space<vmem>>, %arg2: memref<8x16xf32, #tpu.memory_space<vmem>>, %arg3: memref<8x16xf32, #tpu.memory_space<vmem>>, %arg4: memref<1x1x16x32xf32, #tpu.memory_space<vmem>>, %arg5: memref<1x1x16x32xf32, #tpu.memory_space<vmem>>, %arg6: memref<1x1x16x32xf32, #tpu.memory_space<vmem>>, %arg7: memref<1x1x16x32xf32, #tpu.memory_space<vmem>>, %arg8: memref<2x128x192xbf16, #tpu.memory_space<vmem>>, %arg9: memref<2x128x128xbf16, #tpu.memory_space<vmem>>, %arg10: memref<2x128x512xbf16, #tpu.memory_space<vmem>>, %arg11: memref<2x256x128xbf16, #tpu.memory_space<vmem>>, %arg12: memref<2x4x128xf32, #tpu.memory_space<vmem>>, %arg13: memref<2x1x32xf32, #tpu.memory_space<vmem>>, %arg14: memref<2x1x32xf32, #tpu.memory_space<vmem>>, %arg15: memref<8x32xf32, #tpu.memory_space<vmem>>, %arg16: memref<8x32xf32, #tpu.memory_space<vmem>>, %arg17: memref<8x32xf32, #tpu.memory_space<vmem>>, %arg18: memref<8x32xf32, #tpu.memory_space<vmem>>, %arg19: memref<128x8xf32, #tpu.memory_space<vmem>>, %arg20: memref<1x1x16x32xf32, #tpu.memory_space<vmem>>, %arg21: memref<1x1x16x32xf32, #tpu.memory_space<vmem>>, %arg22: memref<1x1x16x32xf32, #tpu.memory_space<vmem>>, %arg23: memref<1x1x16x32xf32, #tpu.memory_space<vmem>>) attributes {dimension_semantics = [], scalar_prefetch = 0 : i64, scratch_operands = 0 : i64, tpu.core_type = #tpu.core_type<tc>} {
    %c0 = arith.constant 0 : index
    %c0_0 = arith.constant 0 : index
    %c0_1 = arith.constant 0 : index
    %c0_2 = arith.constant 0 : index
    %0 = vector.load %arg4[%c0, %c0_0, %c0_1, %c0_2] : memref<1x1x16x32xf32, #tpu.memory_space<vmem>>, vector<1x1x16x32xf32>
    %c0_3 = arith.constant 0 : index
    %c0_4 = arith.constant 0 : index
    %c0_5 = arith.constant 0 : index
    %c0_6 = arith.constant 0 : index
    %1 = vector.load %arg20[%c0_3, %c0_4, %c0_5, %c0_6] : memref<1x1x16x32xf32, #tpu.memory_space<vmem>>, vector<1x1x16x32xf32>
    tpu.vector_store %arg20[%c0_3, %c0_4, %c0_5, %c0_6], %0 {strides = array<i32>} : memref<1x1x16x32xf32, #tpu.memory_space<vmem>>, vector<1x1x16x32xf32>,
    %c0_7 = arith.constant 0 : index
    %c0_8 = arith.constant 0 : index
    %c0_9 = arith.constant 0 : index
    %c0_10 = arith.constant 0 : index
    %2 = vector.load %arg5[%c0_7, %c0_8, %c0_9, %c0_10] : memref<1x1x16x32xf32, #tpu.memory_space<vmem>>, vector<1x1x16x32xf32>
    %c0_11 = arith.constant 0 : index
    %c0_12 = arith.constant 0 : index
    %c0_13 = arith.constant 0 : index
    %c0_14 = arith.constant 0 : index
    %3 = vector.load %arg21[%c0_11, %c0_12, %c0_13, %c0_14] : memref<1x1x16x32xf32, #tpu.memory_space<vmem>>, vector<1x1x16x32xf32>
    tpu.vector_store %arg21[%c0_11, %c0_12, %c0_13, %c0_14], %2 {strides = array<i32>} : memref<1x1x16x32xf32, #tpu.memory_space<vmem>>, vector<1x1x16x32xf32>,
    %c0_15 = arith.constant 0 : index
    %c0_16 = arith.constant 0 : index
    %c0_17 = arith.constant 0 : index
    %c0_18 = arith.constant 0 : index
    %4 = vector.load %arg6[%c0_15, %c0_16, %c0_17, %c0_18] : memref<1x1x16x32xf32, #tpu.memory_space<vmem>>, vector<1x1x16x32xf32>
    %c0_19 = arith.constant 0 : index
    %c0_20 = arith.constant 0 : index
    %c0_21 = arith.constant 0 : index
    %c0_22 = arith.constant 0 : index
    %5 = vector.load %arg22[%c0_19, %c0_20, %c0_21, %c0_22] : memref<1x1x16x32xf32, #tpu.memory_space<vmem>>, vector<1x1x16x32xf32>
    tpu.vector_store %arg22[%c0_19, %c0_20, %c0_21, %c0_22], %4 {strides = array<i32>} : memref<1x1x16x32xf32, #tpu.memory_space<vmem>>, vector<1x1x16x32xf32>,
    %c0_23 = arith.constant 0 : index
    %c0_24 = arith.constant 0 : index
    %c0_25 = arith.constant 0 : index
    %c0_26 = arith.constant 0 : index
    %6 = vector.load %arg7[%c0_23, %c0_24, %c0_25, %c0_26] : memref<1x1x16x32xf32, #tpu.memory_space<vmem>>, vector<1x1x16x32xf32>
    %c0_27 = arith.constant 0 : index
    %c0_28 = arith.constant 0 : index
    %c0_29 = arith.constant 0 : index
    %c0_30 = arith.constant 0 : index
    %7 = vector.load %arg23[%c0_27, %c0_28, %c0_29, %c0_30] : memref<1x1x16x32xf32, #tpu.memory_space<vmem>>, vector<1x1x16x32xf32>
    tpu.vector_store %arg23[%c0_27, %c0_28, %c0_29, %c0_30], %6 {strides = array<i32>} : memref<1x1x16x32xf32, #tpu.memory_space<vmem>>, vector<1x1x16x32xf32>,
    %c0_31 = arith.constant 0 : index
    %c0_32 = arith.constant 0 : index
    %8 = vector.load %arg1[%c0_31, %c0_32] : memref<128x8xf32, #tpu.memory_space<vmem>>, vector<128x8xf32>
    %9 = tpu.transpose %8, [1, 0] : vector<128x8xf32> -> vector<8x128xf32>
    %cst = arith.constant 1.131250e+01 : f32
    %10 = vector.broadcast %cst : f32 to vector<8x128xf32>
    %11 = arith.mulf %9, %10 : vector<8x128xf32>
    %c0_33 = arith.constant 0 : index
    %12 = memref.load %arg0[%c0_33] : memref<2xi32, #tpu.memory_space<smem>>
    %c0_34 = arith.constant 0 : index
    %c0_35 = arith.constant 0 : index
    %13 = vector.load %arg3[%c0_34, %c0_35] : memref<8x16xf32, #tpu.memory_space<vmem>>, vector<8x16xf32>
    %c0_36 = arith.constant 0 : index
    %c0_37 = arith.constant 0 : index
    %14 = vector.load %arg15[%c0_36, %c0_37] : memref<8x32xf32, #tpu.memory_space<vmem>>, vector<8x32xf32>
    %c0_38 = arith.constant 0 : index
    %c0_39 = arith.constant 0 : index
    %15 = vector.load %arg16[%c0_38, %c0_39] : memref<8x32xf32, #tpu.memory_space<vmem>>, vector<8x32xf32>
    %c0_40 = arith.constant 0 : index
    %c0_41 = arith.constant 0 : index
    %c0_42 = arith.constant 0 : index
    %16 = vector.load %arg12[%c0_40, %c0_41, %c0_42] : memref<2x4x128xf32, #tpu.memory_space<vmem>>, vector<1x4x128xf32>
    %17 = vector.shape_cast %16 : vector<1x4x128xf32> to vector<4x128xf32>
    %18 = vector.extract_strided_slice %17 {offsets = [0, 0], sizes = [1, 128], strides = [1, 1]} : vector<4x128xf32> to vector<1x128xf32>
    %19 = arith.mulf %11, %11 : vector<8x128xf32>
    %cst_43 = arith.constant dense<0.000000e+00> : vector<8xf32>
    %20 = vector.multi_reduction <add>, %19, %cst_43 [1] : vector<8x128xf32> to vector<8xf32>
    %21 = vector.shape_cast %20 : vector<8xf32> to vector<8x1xf32>
    %cst_44 = arith.constant 1.000000e-30 : f32
    %22 = vector.broadcast %cst_44 : f32 to vector<8x1xf32>
    %23 = arith.addf %21, %22 : vector<8x1xf32>
    %24 = math.rsqrt %23 : vector<8x1xf32>
    %cst_45 = arith.constant 11.3137083 : f32
    %25 = vector.broadcast %cst_45 : f32 to vector<8x1xf32>
    %26 = arith.mulf %24, %25 : vector<8x1xf32>
    %27 = vector.broadcast %26 : vector<8x1xf32> to vector<8x128xf32>
    %28 = arith.mulf %11, %27 : vector<8x128xf32>
    %cst_46 = arith.constant 1.000000e+00 : f32
    %29 = vector.broadcast %cst_46 : f32 to vector<1x128xf32>
    %30 = arith.addf %29, %18 : vector<1x128xf32>
    %31 = vector.broadcast %30 : vector<1x128xf32> to vector<8x128xf32>
    %32 = arith.mulf %28, %31 : vector<8x128xf32>
    %33 = arith.truncf %32 : vector<8x128xf32> to vector<8x128xbf16>
    %c0_47 = arith.constant 0 : index
    %c0_48 = arith.constant 0 : index
    %c0_49 = arith.constant 0 : index
    %34 = vector.load %arg8[%c0_47, %c0_48, %c0_49] : memref<2x128x192xbf16, #tpu.memory_space<vmem>>, vector<1x128x192xbf16>
    %35 = vector.shape_cast %34 : vector<1x128x192xbf16> to vector<128x192xbf16>
    %cst_50 = arith.constant dense<0.000000e+00> : vector<8x192xf32>
    %36 = tpu.matmul %33, %35, %cst_50 {dimension_numbers = #tpu.dot_dimension_numbers<[1], [0], [0], [1], [0, 0, 1, 1], [], []>} : vector<8x128xbf16>, vector<128x192xbf16>, vector<8x192xf32> -> vector<8x192xf32>
    %37 = vector.extract_strided_slice %36 {offsets = [0, 128], sizes = [8, 32], strides = [1, 1]} : vector<8x192xf32> to vector<8x32xf32>
    %38 = vector.extract_strided_slice %36 {offsets = [0, 160], sizes = [8, 32], strides = [1, 1]} : vector<8x192xf32> to vector<8x32xf32>
    %c0_51 = arith.constant 0 : index
    %c0_52 = arith.constant 0 : index
    %c0_53 = arith.constant 0 : index
    %39 = vector.load %arg14[%c0_51, %c0_52, %c0_53] : memref<2x1x32xf32, #tpu.memory_space<vmem>>, vector<1x1x32xf32>
    %40 = vector.shape_cast %39 : vector<1x1x32xf32> to vector<1x32xf32>
    %41 = arith.mulf %37, %37 : vector<8x32xf32>
    %cst_54 = arith.constant dense<0.000000e+00> : vector<8xf32>
    %42 = vector.multi_reduction <add>, %41, %cst_54 [1] : vector<8x32xf32> to vector<8xf32>
    %43 = vector.shape_cast %42 : vector<8xf32> to vector<8x1xf32>
    %cst_55 = arith.constant 1.000000e-30 : f32
    %44 = vector.broadcast %cst_55 : f32 to vector<8x1xf32>
    %45 = arith.addf %43, %44 : vector<8x1xf32>
    %46 = math.rsqrt %45 : vector<8x1xf32>
    %cst_56 = arith.constant 5.65685415 : f32
    %47 = vector.broadcast %cst_56 : f32 to vector<8x1xf32>
    %48 = arith.mulf %46, %47 : vector<8x1xf32>
    %49 = vector.broadcast %48 : vector<8x1xf32> to vector<8x32xf32>
    %50 = arith.mulf %37, %49 : vector<8x32xf32>
    %cst_57 = arith.constant 1.000000e+00 : f32
    %51 = vector.broadcast %cst_57 : f32 to vector<1x32xf32>
    %52 = arith.addf %51, %40 : vector<1x32xf32>
    %53 = vector.broadcast %52 : vector<1x32xf32> to vector<8x32xf32>
    %54 = arith.mulf %50, %53 : vector<8x32xf32>
    %55 = vector.extract_strided_slice %54 {offsets = [0, 16], sizes = [8, 16], strides = [1, 1]} : vector<8x32xf32> to vector<8x16xf32>
    %cst_58 = arith.constant 0.000000e+00 : f32
    %56 = vector.broadcast %cst_58 : f32 to vector<8x16xf32>
    %57 = arith.subf %56, %55 : vector<8x16xf32>
    %58 = vector.extract_strided_slice %54 {offsets = [0, 0], sizes = [8, 16], strides = [1, 1]} : vector<8x32xf32> to vector<8x16xf32>
    %59 = tpu.concatenate %57, %58 in 1 : vector<8x16xf32>, vector<8x16xf32> -> vector<8x32xf32>
    %60 = arith.mulf %54, %14 : vector<8x32xf32>
    %61 = arith.mulf %59, %15 : vector<8x32xf32>
    %62 = arith.addf %60, %61 : vector<8x32xf32>
    %cst_59 = arith.constant 1.000000e+00 : f32
    %63 = vector.broadcast %cst_59 : f32 to vector<8x32xf32>
    %64 = arith.mulf %62, %63 : vector<8x32xf32>
    %c0_60 = arith.constant 0 : index
    %c0_61 = arith.constant 0 : index
    %65 = arith.index_cast %12 : i32 to index
    %c0_62 = arith.constant 0 : index
    %66 = vector.load %arg20[%c0_60, %c0_61, %65, %c0_62] : memref<1x1x16x32xf32, #tpu.memory_space<vmem>>, vector<1x1x8x32xf32>
    %67 = vector.shape_cast %66 : vector<1x1x8x32xf32> to vector<8x32xf32>
    %68 = vector.shape_cast %64 : vector<8x32xf32> to vector<1x1x8x32xf32>
    tpu.vector_store %arg20[%c0_60, %c0_61, %65, %c0_62], %68 {strides = array<i32>} : memref<1x1x16x32xf32, #tpu.memory_space<vmem>>, vector<1x1x8x32xf32>,
    %c0_63 = arith.constant 0 : index
    %c0_64 = arith.constant 0 : index
    %69 = arith.index_cast %12 : i32 to index
    %c0_65 = arith.constant 0 : index
    %70 = vector.load %arg21[%c0_63, %c0_64, %69, %c0_65] : memref<1x1x16x32xf32, #tpu.memory_space<vmem>>, vector<1x1x8x32xf32>
    %71 = vector.shape_cast %70 : vector<1x1x8x32xf32> to vector<8x32xf32>
    %72 = vector.shape_cast %38 : vector<8x32xf32> to vector<1x1x8x32xf32>
    tpu.vector_store %arg21[%c0_63, %c0_64, %69, %c0_65], %72 {strides = array<i32>} : memref<1x1x16x32xf32, #tpu.memory_space<vmem>>, vector<1x1x8x32xf32>,
    %c0_66 = arith.constant 0 : index
    %c0_67 = arith.constant 0 : index
    %c0_68 = arith.constant 0 : index
    %c0_69 = arith.constant 0 : index
    %73 = vector.load %arg20[%c0_66, %c0_67, %c0_68, %c0_69] : memref<1x1x16x32xf32, #tpu.memory_space<vmem>>, vector<1x1x16x32xf32>
    %74 = vector.shape_cast %73 : vector<1x1x16x32xf32> to vector<16x32xf32>
    %c0_70 = arith.constant 0 : index
    %c0_71 = arith.constant 0 : index
    %c0_72 = arith.constant 0 : index
    %c0_73 = arith.constant 0 : index
    %75 = vector.load %arg21[%c0_70, %c0_71, %c0_72, %c0_73] : memref<1x1x16x32xf32, #tpu.memory_space<vmem>>, vector<1x1x16x32xf32>
    %76 = vector.shape_cast %75 : vector<1x1x16x32xf32> to vector<16x32xf32>
    %77 = vector.extract_strided_slice %36 {offsets = [0, 0], sizes = [8, 32], strides = [1, 1]} : vector<8x192xf32> to vector<8x32xf32>
    %78 = vector.extract_strided_slice %36 {offsets = [0, 32], sizes = [8, 32], strides = [1, 1]} : vector<8x192xf32> to vector<8x32xf32>
    %79 = vector.extract_strided_slice %36 {offsets = [0, 64], sizes = [8, 32], strides = [1, 1]} : vector<8x192xf32> to vector<8x32xf32>
    %80 = vector.extract_strided_slice %36 {offsets = [0, 96], sizes = [8, 32], strides = [1, 1]} : vector<8x192xf32> to vector<8x32xf32>
    %81 = tpu.concatenate %77, %78, %79, %80 in 0 : vector<8x32xf32>, vector<8x32xf32>, vector<8x32xf32>, vector<8x32xf32> -> vector<32x32xf32>
    %82 = tpu.concatenate %14, %14, %14, %14 in 0 : vector<8x32xf32>, vector<8x32xf32>, vector<8x32xf32>, vector<8x32xf32> -> vector<32x32xf32>
    %83 = tpu.concatenate %15, %15, %15, %15 in 0 : vector<8x32xf32>, vector<8x32xf32>, vector<8x32xf32>, vector<8x32xf32> -> vector<32x32xf32>
    %c0_74 = arith.constant 0 : index
    %c0_75 = arith.constant 0 : index
    %c0_76 = arith.constant 0 : index
    %84 = vector.load %arg13[%c0_74, %c0_75, %c0_76] : memref<2x1x32xf32, #tpu.memory_space<vmem>>, vector<1x1x32xf32>
    %85 = vector.shape_cast %84 : vector<1x1x32xf32> to vector<1x32xf32>
    %86 = arith.mulf %81, %81 : vector<32x32xf32>
    %cst_77 = arith.constant dense<0.000000e+00> : vector<32xf32>
    %87 = vector.multi_reduction <add>, %86, %cst_77 [1] : vector<32x32xf32> to vector<32xf32>
    %88 = vector.shape_cast %87 : vector<32xf32> to vector<32x1xf32>
    %cst_78 = arith.constant 1.000000e-30 : f32
    %89 = vector.broadcast %cst_78 : f32 to vector<32x1xf32>
    %90 = arith.addf %88, %89 : vector<32x1xf32>
    %91 = math.rsqrt %90 : vector<32x1xf32>
    %cst_79 = arith.constant 5.65685415 : f32
    %92 = vector.broadcast %cst_79 : f32 to vector<32x1xf32>
    %93 = arith.mulf %91, %92 : vector<32x1xf32>
    %94 = vector.broadcast %93 : vector<32x1xf32> to vector<32x32xf32>
    %95 = arith.mulf %81, %94 : vector<32x32xf32>
    %cst_80 = arith.constant 1.000000e+00 : f32
    %96 = vector.broadcast %cst_80 : f32 to vector<1x32xf32>
    %97 = arith.addf %96, %85 : vector<1x32xf32>
    %98 = vector.broadcast %97 : vector<1x32xf32> to vector<32x32xf32>
    %99 = arith.mulf %95, %98 : vector<32x32xf32>
    %100 = vector.extract_strided_slice %99 {offsets = [0, 16], sizes = [32, 16], strides = [1, 1]} : vector<32x32xf32> to vector<32x16xf32>
    %cst_81 = arith.constant 0.000000e+00 : f32
    %101 = vector.broadcast %cst_81 : f32 to vector<32x16xf32>
    %102 = arith.subf %101, %100 : vector<32x16xf32>
    %103 = vector.extract_strided_slice %99 {offsets = [0, 0], sizes = [32, 16], strides = [1, 1]} : vector<32x32xf32> to vector<32x16xf32>
    %104 = tpu.concatenate %102, %103 in 1 : vector<32x16xf32>, vector<32x16xf32> -> vector<32x32xf32>
    %105 = arith.mulf %99, %82 : vector<32x32xf32>
    %106 = arith.mulf %104, %83 : vector<32x32xf32>
    %107 = arith.addf %105, %106 : vector<32x32xf32>
    %cst_82 = arith.constant 0.176776692 : f32
    %108 = vector.broadcast %cst_82 : f32 to vector<32x32xf32>
    %109 = arith.mulf %107, %108 : vector<32x32xf32>
    %cst_83 = arith.constant dense<0.000000e+00> : vector<32x16xf32>
    %110 = tpu.matmul %109, %74, %cst_83 {dimension_numbers = #tpu.dot_dimension_numbers<[1], [1], [0], [0], [0, 0, 1, 0], [], []>} : vector<32x32xf32>, vector<16x32xf32>, vector<32x16xf32> -> vector<32x16xf32>
    %cst_84 = arith.constant 2.000000e-02 : f32
    %111 = vector.broadcast %cst_84 : f32 to vector<32x16xf32>
    %112 = arith.mulf %110, %111 : vector<32x16xf32>
    %113 = math.tanh %112 : vector<32x16xf32>
    %cst_85 = arith.constant 5.000000e+01 : f32
    %114 = vector.broadcast %cst_85 : f32 to vector<32x16xf32>
    %115 = arith.mulf %113, %114 : vector<32x16xf32>
    %116 = tpu.concatenate %13, %13, %13, %13 in 0 : vector<8x16xf32>, vector<8x16xf32>, vector<8x16xf32>, vector<8x16xf32> -> vector<32x16xf32>
    %117 = arith.addf %115, %116 : vector<32x16xf32>
    %cst_86 = arith.constant dense<0xFF800000> : vector<32xf32>
    %118 = vector.multi_reduction <maximumf>, %117, %cst_86 [1] : vector<32x16xf32> to vector<32xf32>
    %119 = vector.shape_cast %118 : vector<32xf32> to vector<32x1xf32>
    %120 = vector.broadcast %119 : vector<32x1xf32> to vector<32x16xf32>
    %121 = arith.subf %117, %120 : vector<32x16xf32>
    %122 = math.exp %121 : vector<32x16xf32>
    %cst_87 = arith.constant dense<0.000000e+00> : vector<32xf32>
    %123 = vector.multi_reduction <add>, %122, %cst_87 [1] : vector<32x16xf32> to vector<32xf32>
    %124 = vector.shape_cast %123 : vector<32xf32> to vector<32x1xf32>
    %125 = vector.broadcast %124 : vector<32x1xf32> to vector<32x16xf32>
    %126 = arith.divf %122, %125 : vector<32x16xf32>
    %cst_88 = arith.constant dense<0.000000e+00> : vector<32x32xf32>
    %127 = tpu.matmul %126, %76, %cst_88 {dimension_numbers = #tpu.dot_dimension_numbers<[1], [0], [0], [1], [0, 0, 1, 1], [], []>} : vector<32x16xf32>, vector<16x32xf32>, vector<32x32xf32> -> vector<32x32xf32>
    %128 = vector.extract_strided_slice %127 {offsets = [0, 0], sizes = [8, 32], strides = [1, 1]} : vector<32x32xf32> to vector<8x32xf32>
    %129 = vector.extract_strided_slice %127 {offsets = [8, 0], sizes = [8, 32], strides = [1, 1]} : vector<32x32xf32> to vector<8x32xf32>
    %130 = vector.extract_strided_slice %127 {offsets = [16, 0], sizes = [8, 32], strides = [1, 1]} : vector<32x32xf32> to vector<8x32xf32>
    %131 = vector.extract_strided_slice %127 {offsets = [24, 0], sizes = [8, 32], strides = [1, 1]} : vector<32x32xf32> to vector<8x32xf32>
    %132 = tpu.concatenate %128, %129, %130, %131 in 1 : vector<8x32xf32>, vector<8x32xf32>, vector<8x32xf32>, vector<8x32xf32> -> vector<8x128xf32>
    %133 = arith.truncf %132 : vector<8x128xf32> to vector<8x128xbf16>
    %c0_89 = arith.constant 0 : index
    %c0_90 = arith.constant 0 : index
    %c0_91 = arith.constant 0 : index
    %134 = vector.load %arg9[%c0_89, %c0_90, %c0_91] : memref<2x128x128xbf16, #tpu.memory_space<vmem>>, vector<1x128x128xbf16>
    %135 = vector.shape_cast %134 : vector<1x128x128xbf16> to vector<128x128xbf16>
    %cst_92 = arith.constant dense<0.000000e+00> : vector<8x128xf32>
    %136 = tpu.matmul %133, %135, %cst_92 {dimension_numbers = #tpu.dot_dimension_numbers<[1], [0], [0], [1], [0, 0, 1, 1], [], []>} : vector<8x128xbf16>, vector<128x128xbf16>, vector<8x128xf32> -> vector<8x128xf32>
    %137 = vector.extract_strided_slice %17 {offsets = [1, 0], sizes = [1, 128], strides = [1, 1]} : vector<4x128xf32> to vector<1x128xf32>
    %138 = arith.mulf %136, %136 : vector<8x128xf32>
    %cst_93 = arith.constant dense<0.000000e+00> : vector<8xf32>
    %139 = vector.multi_reduction <add>, %138, %cst_93 [1] : vector<8x128xf32> to vector<8xf32>
    %140 = vector.shape_cast %139 : vector<8xf32> to vector<8x1xf32>
    %cst_94 = arith.constant 1.000000e-30 : f32
    %141 = vector.broadcast %cst_94 : f32 to vector<8x1xf32>
    %142 = arith.addf %140, %141 : vector<8x1xf32>
    %143 = math.rsqrt %142 : vector<8x1xf32>
    %cst_95 = arith.constant 11.3137083 : f32
    %144 = vector.broadcast %cst_95 : f32 to vector<8x1xf32>
    %145 = arith.mulf %143, %144 : vector<8x1xf32>
    %146 = vector.broadcast %145 : vector<8x1xf32> to vector<8x128xf32>
    %147 = arith.mulf %136, %146 : vector<8x128xf32>
    %cst_96 = arith.constant 1.000000e+00 : f32
    %148 = vector.broadcast %cst_96 : f32 to vector<1x128xf32>
    %149 = arith.addf %148, %137 : vector<1x128xf32>
    %150 = vector.broadcast %149 : vector<1x128xf32> to vector<8x128xf32>
    %151 = arith.mulf %147, %150 : vector<8x128xf32>
    %152 = arith.addf %11, %151 : vector<8x128xf32>
    %153 = vector.extract_strided_slice %17 {offsets = [2, 0], sizes = [1, 128], strides = [1, 1]} : vector<4x128xf32> to vector<1x128xf32>
    %154 = arith.mulf %152, %152 : vector<8x128xf32>
    %cst_97 = arith.constant dense<0.000000e+00> : vector<8xf32>
    %155 = vector.multi_reduction <add>, %154, %cst_97 [1] : vector<8x128xf32> to vector<8xf32>
    %156 = vector.shape_cast %155 : vector<8xf32> to vector<8x1xf32>
    %cst_98 = arith.constant 1.000000e-30 : f32
    %157 = vector.broadcast %cst_98 : f32 to vector<8x1xf32>
    %158 = arith.addf %156, %157 : vector<8x1xf32>
    %159 = math.rsqrt %158 : vector<8x1xf32>
    %cst_99 = arith.constant 11.3137083 : f32
    %160 = vector.broadcast %cst_99 : f32 to vector<8x1xf32>
    %161 = arith.mulf %159, %160 : vector<8x1xf32>
    %162 = vector.broadcast %161 : vector<8x1xf32> to vector<8x128xf32>
    %163 = arith.mulf %152, %162 : vector<8x128xf32>
    %cst_100 = arith.constant 1.000000e+00 : f32
    %164 = vector.broadcast %cst_100 : f32 to vector<1x128xf32>
    %165 = arith.addf %164, %153 : vector<1x128xf32>
    %166 = vector.broadcast %165 : vector<1x128xf32> to vector<8x128xf32>
    %167 = arith.mulf %163, %166 : vector<8x128xf32>
    %168 = arith.truncf %167 : vector<8x128xf32> to vector<8x128xbf16>
    %c0_101 = arith.constant 0 : index
    %c0_102 = arith.constant 0 : index
    %c0_103 = arith.constant 0 : index
    %169 = vector.load %arg10[%c0_101, %c0_102, %c0_103] : memref<2x128x512xbf16, #tpu.memory_space<vmem>>, vector<1x128x512xbf16>
    %170 = vector.shape_cast %169 : vector<1x128x512xbf16> to vector<128x512xbf16>
    %cst_104 = arith.constant dense<0.000000e+00> : vector<8x512xf32>
    %171 = tpu.matmul %168, %170, %cst_104 {dimension_numbers = #tpu.dot_dimension_numbers<[1], [0], [0], [1], [0, 0, 1, 1], [], []>} : vector<8x128xbf16>, vector<128x512xbf16>, vector<8x512xf32> -> vector<8x512xf32>
    %172 = vector.extract_strided_slice %171 {offsets = [0, 0], sizes = [8, 256], strides = [1, 1]} : vector<8x512xf32> to vector<8x256xf32>
    %173 = arith.mulf %172, %172 : vector<8x256xf32>
    %174 = arith.mulf %172, %173 : vector<8x256xf32>
    %cst_105 = arith.constant 4.471500e-02 : f32
    %175 = vector.broadcast %cst_105 : f32 to vector<8x256xf32>
    %176 = arith.mulf %175, %174 : vector<8x256xf32>
    %177 = arith.addf %172, %176 : vector<8x256xf32>
    %cst_106 = arith.constant 0.797884583 : f32
    %178 = vector.broadcast %cst_106 : f32 to vector<8x256xf32>
    %179 = arith.mulf %178, %177 : vector<8x256xf32>
    %180 = math.tanh %179 : vector<8x256xf32>
    %cst_107 = arith.constant 1.000000e+00 : f32
    %181 = vector.broadcast %cst_107 : f32 to vector<8x256xf32>
    %182 = arith.addf %181, %180 : vector<8x256xf32>
    %cst_108 = arith.constant 5.000000e-01 : f32
    %183 = vector.broadcast %cst_108 : f32 to vector<8x256xf32>
    %184 = arith.mulf %183, %182 : vector<8x256xf32>
    %185 = arith.mulf %172, %184 : vector<8x256xf32>
    %186 = vector.extract_strided_slice %171 {offsets = [0, 256], sizes = [8, 256], strides = [1, 1]} : vector<8x512xf32> to vector<8x256xf32>
    %187 = arith.mulf %185, %186 : vector<8x256xf32>
    %188 = arith.truncf %187 : vector<8x256xf32> to vector<8x256xbf16>
    %c0_109 = arith.constant 0 : index
    %c0_110 = arith.constant 0 : index
    %c0_111 = arith.constant 0 : index
    %189 = vector.load %arg11[%c0_109, %c0_110, %c0_111] : memref<2x256x128xbf16, #tpu.memory_space<vmem>>, vector<1x256x128xbf16>
    %190 = vector.shape_cast %189 : vector<1x256x128xbf16> to vector<256x128xbf16>
    %cst_112 = arith.constant dense<0.000000e+00> : vector<8x128xf32>
    %191 = tpu.matmul %188, %190, %cst_112 {dimension_numbers = #tpu.dot_dimension_numbers<[1], [0], [0], [1], [0, 0, 1, 1], [], []>} : vector<8x256xbf16>, vector<256x128xbf16>, vector<8x128xf32> -> vector<8x128xf32>
    %192 = vector.extract_strided_slice %17 {offsets = [3, 0], sizes = [1, 128], strides = [1, 1]} : vector<4x128xf32> to vector<1x128xf32>
    %193 = arith.mulf %191, %191 : vector<8x128xf32>
    %cst_113 = arith.constant dense<0.000000e+00> : vector<8xf32>
    %194 = vector.multi_reduction <add>, %193, %cst_113 [1] : vector<8x128xf32> to vector<8xf32>
    %195 = vector.shape_cast %194 : vector<8xf32> to vector<8x1xf32>
    %cst_114 = arith.constant 1.000000e-30 : f32
    %196 = vector.broadcast %cst_114 : f32 to vector<8x1xf32>
    %197 = arith.addf %195, %196 : vector<8x1xf32>
    %198 = math.rsqrt %197 : vector<8x1xf32>
    %cst_115 = arith.constant 11.3137083 : f32
    %199 = vector.broadcast %cst_115 : f32 to vector<8x1xf32>
    %200 = arith.mulf %198, %199 : vector<8x1xf32>
    %201 = vector.broadcast %200 : vector<8x1xf32> to vector<8x128xf32>
    %202 = arith.mulf %191, %201 : vector<8x128xf32>
    %cst_116 = arith.constant 1.000000e+00 : f32
    %203 = vector.broadcast %cst_116 : f32 to vector<1x128xf32>
    %204 = arith.addf %203, %192 : vector<1x128xf32>
    %205 = vector.broadcast %204 : vector<1x128xf32> to vector<8x128xf32>
    %206 = arith.mulf %202, %205 : vector<8x128xf32>
    %207 = arith.addf %152, %206 : vector<8x128xf32>
    %c1 = arith.constant 1 : index
    %208 = memref.load %arg0[%c1] : memref<2xi32, #tpu.memory_space<smem>>
    %c0_117 = arith.constant 0 : index
    %c0_118 = arith.constant 0 : index
    %209 = vector.load %arg2[%c0_117, %c0_118] : memref<8x16xf32, #tpu.memory_space<vmem>>, vector<8x16xf32>
    %c0_119 = arith.constant 0 : index
    %c0_120 = arith.constant 0 : index
    %210 = vector.load %arg17[%c0_119, %c0_120] : memref<8x32xf32, #tpu.memory_space<vmem>>, vector<8x32xf32>
    %c0_121 = arith.constant 0 : index
    %c0_122 = arith.constant 0 : index
    %211 = vector.load %arg18[%c0_121, %c0_122] : memref<8x32xf32, #tpu.memory_space<vmem>>, vector<8x32xf32>
    %c1_123 = arith.constant 1 : index
    %c0_124 = arith.constant 0 : index
    %c0_125 = arith.constant 0 : index
    %212 = vector.load %arg12[%c1_123, %c0_124, %c0_125] : memref<2x4x128xf32, #tpu.memory_space<vmem>>, vector<1x4x128xf32>
    %213 = vector.shape_cast %212 : vector<1x4x128xf32> to vector<4x128xf32>
    %214 = vector.extract_strided_slice %213 {offsets = [0, 0], sizes = [1, 128], strides = [1, 1]} : vector<4x128xf32> to vector<1x128xf32>
    %215 = arith.mulf %207, %207 : vector<8x128xf32>
    %cst_126 = arith.constant dense<0.000000e+00> : vector<8xf32>
    %216 = vector.multi_reduction <add>, %215, %cst_126 [1] : vector<8x128xf32> to vector<8xf32>
    %217 = vector.shape_cast %216 : vector<8xf32> to vector<8x1xf32>
    %cst_127 = arith.constant 1.000000e-30 : f32
    %218 = vector.broadcast %cst_127 : f32 to vector<8x1xf32>
    %219 = arith.addf %217, %218 : vector<8x1xf32>
    %220 = math.rsqrt %219 : vector<8x1xf32>
    %cst_128 = arith.constant 11.3137083 : f32
    %221 = vector.broadcast %cst_128 : f32 to vector<8x1xf32>
    %222 = arith.mulf %220, %221 : vector<8x1xf32>
    %223 = vector.broadcast %222 : vector<8x1xf32> to vector<8x128xf32>
    %224 = arith.mulf %207, %223 : vector<8x128xf32>
    %cst_129 = arith.constant 1.000000e+00 : f32
    %225 = vector.broadcast %cst_129 : f32 to vector<1x128xf32>
    %226 = arith.addf %225, %214 : vector<1x128xf32>
    %227 = vector.broadcast %226 : vector<1x128xf32> to vector<8x128xf32>
    %228 = arith.mulf %224, %227 : vector<8x128xf32>
    %229 = arith.truncf %228 : vector<8x128xf32> to vector<8x128xbf16>
    %c1_130 = arith.constant 1 : index
    %c0_131 = arith.constant 0 : index
    %c0_132 = arith.constant 0 : index
    %230 = vector.load %arg8[%c1_130, %c0_131, %c0_132] : memref<2x128x192xbf16, #tpu.memory_space<vmem>>, vector<1x128x192xbf16>
    %231 = vector.shape_cast %230 : vector<1x128x192xbf16> to vector<128x192xbf16>
    %cst_133 = arith.constant dense<0.000000e+00> : vector<8x192xf32>
    %232 = tpu.matmul %229, %231, %cst_133 {dimension_numbers = #tpu.dot_dimension_numbers<[1], [0], [0], [1], [0, 0, 1, 1], [], []>} : vector<8x128xbf16>, vector<128x192xbf16>, vector<8x192xf32> -> vector<8x192xf32>
    %233 = vector.extract_strided_slice %232 {offsets = [0, 128], sizes = [8, 32], strides = [1, 1]} : vector<8x192xf32> to vector<8x32xf32>
    %234 = vector.extract_strided_slice %232 {offsets = [0, 160], sizes = [8, 32], strides = [1, 1]} : vector<8x192xf32> to vector<8x32xf32>
    %c1_134 = arith.constant 1 : index
    %c0_135 = arith.constant 0 : index
    %c0_136 = arith.constant 0 : index
    %235 = vector.load %arg14[%c1_134, %c0_135, %c0_136] : memref<2x1x32xf32, #tpu.memory_space<vmem>>, vector<1x1x32xf32>
    %236 = vector.shape_cast %235 : vector<1x1x32xf32> to vector<1x32xf32>
    %237 = arith.mulf %233, %233 : vector<8x32xf32>
    %cst_137 = arith.constant dense<0.000000e+00> : vector<8xf32>
    %238 = vector.multi_reduction <add>, %237, %cst_137 [1] : vector<8x32xf32> to vector<8xf32>
    %239 = vector.shape_cast %238 : vector<8xf32> to vector<8x1xf32>
    %cst_138 = arith.constant 1.000000e-30 : f32
    %240 = vector.broadcast %cst_138 : f32 to vector<8x1xf32>
    %241 = arith.addf %239, %240 : vector<8x1xf32>
    %242 = math.rsqrt %241 : vector<8x1xf32>
    %cst_139 = arith.constant 5.65685415 : f32
    %243 = vector.broadcast %cst_139 : f32 to vector<8x1xf32>
    %244 = arith.mulf %242, %243 : vector<8x1xf32>
    %245 = vector.broadcast %244 : vector<8x1xf32> to vector<8x32xf32>
    %246 = arith.mulf %233, %245 : vector<8x32xf32>
    %cst_140 = arith.constant 1.000000e+00 : f32
    %247 = vector.broadcast %cst_140 : f32 to vector<1x32xf32>
    %248 = arith.addf %247, %236 : vector<1x32xf32>
    %249 = vector.broadcast %248 : vector<1x32xf32> to vector<8x32xf32>
    %250 = arith.mulf %246, %249 : vector<8x32xf32>
    %251 = vector.extract_strided_slice %250 {offsets = [0, 16], sizes = [8, 16], strides = [1, 1]} : vector<8x32xf32> to vector<8x16xf32>
    %cst_141 = arith.constant 0.000000e+00 : f32
    %252 = vector.broadcast %cst_141 : f32 to vector<8x16xf32>
    %253 = arith.subf %252, %251 : vector<8x16xf32>
    %254 = vector.extract_strided_slice %250 {offsets = [0, 0], sizes = [8, 16], strides = [1, 1]} : vector<8x32xf32> to vector<8x16xf32>
    %255 = tpu.concatenate %253, %254 in 1 : vector<8x16xf32>, vector<8x16xf32> -> vector<8x32xf32>
    %256 = arith.mulf %250, %210 : vector<8x32xf32>
    %257 = arith.mulf %255, %211 : vector<8x32xf32>
    %258 = arith.addf %256, %257 : vector<8x32xf32>
    %cst_142 = arith.constant 1.000000e+00 : f32
    %259 = vector.broadcast %cst_142 : f32 to vector<8x32xf32>
    %260 = arith.mulf %258, %259 : vector<8x32xf32>
    %c0_143 = arith.constant 0 : index
    %c0_144 = arith.constant 0 : index
    %261 = arith.index_cast %208 : i32 to index
    %c0_145 = arith.constant 0 : index
    %262 = vector.load %arg22[%c0_143, %c0_144, %261, %c0_145] : memref<1x1x16x32xf32, #tpu.memory_space<vmem>>, vector<1x1x8x32xf32>
    %263 = vector.shape_cast %262 : vector<1x1x8x32xf32> to vector<8x32xf32>
    %264 = vector.shape_cast %260 : vector<8x32xf32> to vector<1x1x8x32xf32>
    tpu.vector_store %arg22[%c0_143, %c0_144, %261, %c0_145], %264 {strides = array<i32>} : memref<1x1x16x32xf32, #tpu.memory_space<vmem>>, vector<1x1x8x32xf32>,
    %c0_146 = arith.constant 0 : index
    %c0_147 = arith.constant 0 : index
    %265 = arith.index_cast %208 : i32 to index
    %c0_148 = arith.constant 0 : index
    %266 = vector.load %arg23[%c0_146, %c0_147, %265, %c0_148] : memref<1x1x16x32xf32, #tpu.memory_space<vmem>>, vector<1x1x8x32xf32>
    %267 = vector.shape_cast %266 : vector<1x1x8x32xf32> to vector<8x32xf32>
    %268 = vector.shape_cast %234 : vector<8x32xf32> to vector<1x1x8x32xf32>
    tpu.vector_store %arg23[%c0_146, %c0_147, %265, %c0_148], %268 {strides = array<i32>} : memref<1x1x16x32xf32, #tpu.memory_space<vmem>>, vector<1x1x8x32xf32>,
    %c0_149 = arith.constant 0 : index
    %c0_150 = arith.constant 0 : index
    %c0_151 = arith.constant 0 : index
    %c0_152 = arith.constant 0 : index
    %269 = vector.load %arg22[%c0_149, %c0_150, %c0_151, %c0_152] : memref<1x1x16x32xf32, #tpu.memory_space<vmem>>, vector<1x1x16x32xf32>
    %270 = vector.shape_cast %269 : vector<1x1x16x32xf32> to vector<16x32xf32>
    %c0_153 = arith.constant 0 : index
    %c0_154 = arith.constant 0 : index
    %c0_155 = arith.constant 0 : index
    %c0_156 = arith.constant 0 : index
    %271 = vector.load %arg23[%c0_153, %c0_154, %c0_155, %c0_156] : memref<1x1x16x32xf32, #tpu.memory_space<vmem>>, vector<1x1x16x32xf32>
    %272 = vector.shape_cast %271 : vector<1x1x16x32xf32> to vector<16x32xf32>
    %273 = vector.extract_strided_slice %232 {offsets = [0, 0], sizes = [8, 32], strides = [1, 1]} : vector<8x192xf32> to vector<8x32xf32>
    %274 = vector.extract_strided_slice %232 {offsets = [0, 32], sizes = [8, 32], strides = [1, 1]} : vector<8x192xf32> to vector<8x32xf32>
    %275 = vector.extract_strided_slice %232 {offsets = [0, 64], sizes = [8, 32], strides = [1, 1]} : vector<8x192xf32> to vector<8x32xf32>
    %276 = vector.extract_strided_slice %232 {offsets = [0, 96], sizes = [8, 32], strides = [1, 1]} : vector<8x192xf32> to vector<8x32xf32>
    %277 = tpu.concatenate %273, %274, %275, %276 in 0 : vector<8x32xf32>, vector<8x32xf32>, vector<8x32xf32>, vector<8x32xf32> -> vector<32x32xf32>
    %278 = tpu.concatenate %210, %210, %210, %210 in 0 : vector<8x32xf32>, vector<8x32xf32>, vector<8x32xf32>, vector<8x32xf32> -> vector<32x32xf32>
    %279 = tpu.concatenate %211, %211, %211, %211 in 0 : vector<8x32xf32>, vector<8x32xf32>, vector<8x32xf32>, vector<8x32xf32> -> vector<32x32xf32>
    %c1_157 = arith.constant 1 : index
    %c0_158 = arith.constant 0 : index
    %c0_159 = arith.constant 0 : index
    %280 = vector.load %arg13[%c1_157, %c0_158, %c0_159] : memref<2x1x32xf32, #tpu.memory_space<vmem>>, vector<1x1x32xf32>
    %281 = vector.shape_cast %280 : vector<1x1x32xf32> to vector<1x32xf32>
    %282 = arith.mulf %277, %277 : vector<32x32xf32>
    %cst_160 = arith.constant dense<0.000000e+00> : vector<32xf32>
    %283 = vector.multi_reduction <add>, %282, %cst_160 [1] : vector<32x32xf32> to vector<32xf32>
    %284 = vector.shape_cast %283 : vector<32xf32> to vector<32x1xf32>
    %cst_161 = arith.constant 1.000000e-30 : f32
    %285 = vector.broadcast %cst_161 : f32 to vector<32x1xf32>
    %286 = arith.addf %284, %285 : vector<32x1xf32>
    %287 = math.rsqrt %286 : vector<32x1xf32>
    %cst_162 = arith.constant 5.65685415 : f32
    %288 = vector.broadcast %cst_162 : f32 to vector<32x1xf32>
    %289 = arith.mulf %287, %288 : vector<32x1xf32>
    %290 = vector.broadcast %289 : vector<32x1xf32> to vector<32x32xf32>
    %291 = arith.mulf %277, %290 : vector<32x32xf32>
    %cst_163 = arith.constant 1.000000e+00 : f32
    %292 = vector.broadcast %cst_163 : f32 to vector<1x32xf32>
    %293 = arith.addf %292, %281 : vector<1x32xf32>
    %294 = vector.broadcast %293 : vector<1x32xf32> to vector<32x32xf32>
    %295 = arith.mulf %291, %294 : vector<32x32xf32>
    %296 = vector.extract_strided_slice %295 {offsets = [0, 16], sizes = [32, 16], strides = [1, 1]} : vector<32x32xf32> to vector<32x16xf32>
    %cst_164 = arith.constant 0.000000e+00 : f32
    %297 = vector.broadcast %cst_164 : f32 to vector<32x16xf32>
    %298 = arith.subf %297, %296 : vector<32x16xf32>
    %299 = vector.extract_strided_slice %295 {offsets = [0, 0], sizes = [32, 16], strides = [1, 1]} : vector<32x32xf32> to vector<32x16xf32>
    %300 = tpu.concatenate %298, %299 in 1 : vector<32x16xf32>, vector<32x16xf32> -> vector<32x32xf32>
    %301 = arith.mulf %295, %278 : vector<32x32xf32>
    %302 = arith.mulf %300, %279 : vector<32x32xf32>
    %303 = arith.addf %301, %302 : vector<32x32xf32>
    %cst_165 = arith.constant 0.176776692 : f32
    %304 = vector.broadcast %cst_165 : f32 to vector<32x32xf32>
    %305 = arith.mulf %303, %304 : vector<32x32xf32>
    %cst_166 = arith.constant dense<0.000000e+00> : vector<32x16xf32>
    %306 = tpu.matmul %305, %270, %cst_166 {dimension_numbers = #tpu.dot_dimension_numbers<[1], [1], [0], [0], [0, 0, 1, 0], [], []>} : vector<32x32xf32>, vector<16x32xf32>, vector<32x16xf32> -> vector<32x16xf32>
    %cst_167 = arith.constant 2.000000e-02 : f32
    %307 = vector.broadcast %cst_167 : f32 to vector<32x16xf32>
    %308 = arith.mulf %306, %307 : vector<32x16xf32>
    %309 = math.tanh %308 : vector<32x16xf32>
    %cst_168 = arith.constant 5.000000e+01 : f32
    %310 = vector.broadcast %cst_168 : f32 to vector<32x16xf32>
    %311 = arith.mulf %309, %310 : vector<32x16xf32>
    %312 = tpu.concatenate %209, %209, %209, %209 in 0 : vector<8x16xf32>, vector<8x16xf32>, vector<8x16xf32>, vector<8x16xf32> -> vector<32x16xf32>
    %313 = arith.addf %311, %312 : vector<32x16xf32>
    %cst_169 = arith.constant dense<0xFF800000> : vector<32xf32>
    %314 = vector.multi_reduction <maximumf>, %313, %cst_169 [1] : vector<32x16xf32> to vector<32xf32>
    %315 = vector.shape_cast %314 : vector<32xf32> to vector<32x1xf32>
    %316 = vector.broadcast %315 : vector<32x1xf32> to vector<32x16xf32>
    %317 = arith.subf %313, %316 : vector<32x16xf32>
    %318 = math.exp %317 : vector<32x16xf32>
    %cst_170 = arith.constant dense<0.000000e+00> : vector<32xf32>
    %319 = vector.multi_reduction <add>, %318, %cst_170 [1] : vector<32x16xf32> to vector<32xf32>
    %320 = vector.shape_cast %319 : vector<32xf32> to vector<32x1xf32>
    %321 = vector.broadcast %320 : vector<32x1xf32> to vector<32x16xf32>
    %322 = arith.divf %318, %321 : vector<32x16xf32>
    %cst_171 = arith.constant dense<0.000000e+00> : vector<32x32xf32>
    %323 = tpu.matmul %322, %272, %cst_171 {dimension_numbers = #tpu.dot_dimension_numbers<[1], [0], [0], [1], [0, 0, 1, 1], [], []>} : vector<32x16xf32>, vector<16x32xf32>, vector<32x32xf32> -> vector<32x32xf32>
    %324 = vector.extract_strided_slice %323 {offsets = [0, 0], sizes = [8, 32], strides = [1, 1]} : vector<32x32xf32> to vector<8x32xf32>
    %325 = vector.extract_strided_slice %323 {offsets = [8, 0], sizes = [8, 32], strides = [1, 1]} : vector<32x32xf32> to vector<8x32xf32>
    %326 = vector.extract_strided_slice %323 {offsets = [16, 0], sizes = [8, 32], strides = [1, 1]} : vector<32x32xf32> to vector<8x32xf32>
    %327 = vector.extract_strided_slice %323 {offsets = [24, 0], sizes = [8, 32], strides = [1, 1]} : vector<32x32xf32> to vector<8x32xf32>
    %328 = tpu.concatenate %324, %325, %326, %327 in 1 : vector<8x32xf32>, vector<8x32xf32>, vector<8x32xf32>, vector<8x32xf32> -> vector<8x128xf32>
    %329 = arith.truncf %328 : vector<8x128xf32> to vector<8x128xbf16>
    %c1_172 = arith.constant 1 : index
    %c0_173 = arith.constant 0 : index
    %c0_174 = arith.constant 0 : index
    %330 = vector.load %arg9[%c1_172, %c0_173, %c0_174] : memref<2x128x128xbf16, #tpu.memory_space<vmem>>, vector<1x128x128xbf16>
    %331 = vector.shape_cast %330 : vector<1x128x128xbf16> to vector<128x128xbf16>
    %cst_175 = arith.constant dense<0.000000e+00> : vector<8x128xf32>
    %332 = tpu.matmul %329, %331, %cst_175 {dimension_numbers = #tpu.dot_dimension_numbers<[1], [0], [0], [1], [0, 0, 1, 1], [], []>} : vector<8x128xbf16>, vector<128x128xbf16>, vector<8x128xf32> -> vector<8x128xf32>
    %333 = vector.extract_strided_slice %213 {offsets = [1, 0], sizes = [1, 128], strides = [1, 1]} : vector<4x128xf32> to vector<1x128xf32>
    %334 = arith.mulf %332, %332 : vector<8x128xf32>
    %cst_176 = arith.constant dense<0.000000e+00> : vector<8xf32>
    %335 = vector.multi_reduction <add>, %334, %cst_176 [1] : vector<8x128xf32> to vector<8xf32>
    %336 = vector.shape_cast %335 : vector<8xf32> to vector<8x1xf32>
    %cst_177 = arith.constant 1.000000e-30 : f32
    %337 = vector.broadcast %cst_177 : f32 to vector<8x1xf32>
    %338 = arith.addf %336, %337 : vector<8x1xf32>
    %339 = math.rsqrt %338 : vector<8x1xf32>
    %cst_178 = arith.constant 11.3137083 : f32
    %340 = vector.broadcast %cst_178 : f32 to vector<8x1xf32>
    %341 = arith.mulf %339, %340 : vector<8x1xf32>
    %342 = vector.broadcast %341 : vector<8x1xf32> to vector<8x128xf32>
    %343 = arith.mulf %332, %342 : vector<8x128xf32>
    %cst_179 = arith.constant 1.000000e+00 : f32
    %344 = vector.broadcast %cst_179 : f32 to vector<1x128xf32>
    %345 = arith.addf %344, %333 : vector<1x128xf32>
    %346 = vector.broadcast %345 : vector<1x128xf32> to vector<8x128xf32>
    %347 = arith.mulf %343, %346 : vector<8x128xf32>
    %348 = arith.addf %207, %347 : vector<8x128xf32>
    %349 = vector.extract_strided_slice %213 {offsets = [2, 0], sizes = [1, 128], strides = [1, 1]} : vector<4x128xf32> to vector<1x128xf32>
    %350 = arith.mulf %348, %348 : vector<8x128xf32>
    %cst_180 = arith.constant dense<0.000000e+00> : vector<8xf32>
    %351 = vector.multi_reduction <add>, %350, %cst_180 [1] : vector<8x128xf32> to vector<8xf32>
    %352 = vector.shape_cast %351 : vector<8xf32> to vector<8x1xf32>
    %cst_181 = arith.constant 1.000000e-30 : f32
    %353 = vector.broadcast %cst_181 : f32 to vector<8x1xf32>
    %354 = arith.addf %352, %353 : vector<8x1xf32>
    %355 = math.rsqrt %354 : vector<8x1xf32>
    %cst_182 = arith.constant 11.3137083 : f32
    %356 = vector.broadcast %cst_182 : f32 to vector<8x1xf32>
    %357 = arith.mulf %355, %356 : vector<8x1xf32>
    %358 = vector.broadcast %357 : vector<8x1xf32> to vector<8x128xf32>
    %359 = arith.mulf %348, %358 : vector<8x128xf32>
    %cst_183 = arith.constant 1.000000e+00 : f32
    %360 = vector.broadcast %cst_183 : f32 to vector<1x128xf32>
    %361 = arith.addf %360, %349 : vector<1x128xf32>
    %362 = vector.broadcast %361 : vector<1x128xf32> to vector<8x128xf32>
    %363 = arith.mulf %359, %362 : vector<8x128xf32>
    %364 = arith.truncf %363 : vector<8x128xf32> to vector<8x128xbf16>
    %c1_184 = arith.constant 1 : index
    %c0_185 = arith.constant 0 : index
    %c0_186 = arith.constant 0 : index
    %365 = vector.load %arg10[%c1_184, %c0_185, %c0_186] : memref<2x128x512xbf16, #tpu.memory_space<vmem>>, vector<1x128x512xbf16>
    %366 = vector.shape_cast %365 : vector<1x128x512xbf16> to vector<128x512xbf16>
    %cst_187 = arith.constant dense<0.000000e+00> : vector<8x512xf32>
    %367 = tpu.matmul %364, %366, %cst_187 {dimension_numbers = #tpu.dot_dimension_numbers<[1], [0], [0], [1], [0, 0, 1, 1], [], []>} : vector<8x128xbf16>, vector<128x512xbf16>, vector<8x512xf32> -> vector<8x512xf32>
    %368 = vector.extract_strided_slice %367 {offsets = [0, 0], sizes = [8, 256], strides = [1, 1]} : vector<8x512xf32> to vector<8x256xf32>
    %369 = arith.mulf %368, %368 : vector<8x256xf32>
    %370 = arith.mulf %368, %369 : vector<8x256xf32>
    %cst_188 = arith.constant 4.471500e-02 : f32
    %371 = vector.broadcast %cst_188 : f32 to vector<8x256xf32>
    %372 = arith.mulf %371, %370 : vector<8x256xf32>
    %373 = arith.addf %368, %372 : vector<8x256xf32>
    %cst_189 = arith.constant 0.797884583 : f32
    %374 = vector.broadcast %cst_189 : f32 to vector<8x256xf32>
    %375 = arith.mulf %374, %373 : vector<8x256xf32>
    %376 = math.tanh %375 : vector<8x256xf32>
    %cst_190 = arith.constant 1.000000e+00 : f32
    %377 = vector.broadcast %cst_190 : f32 to vector<8x256xf32>
    %378 = arith.addf %377, %376 : vector<8x256xf32>
    %cst_191 = arith.constant 5.000000e-01 : f32
    %379 = vector.broadcast %cst_191 : f32 to vector<8x256xf32>
    %380 = arith.mulf %379, %378 : vector<8x256xf32>
    %381 = arith.mulf %368, %380 : vector<8x256xf32>
    %382 = vector.extract_strided_slice %367 {offsets = [0, 256], sizes = [8, 256], strides = [1, 1]} : vector<8x512xf32> to vector<8x256xf32>
    %383 = arith.mulf %381, %382 : vector<8x256xf32>
    %384 = arith.truncf %383 : vector<8x256xf32> to vector<8x256xbf16>
    %c1_192 = arith.constant 1 : index
    %c0_193 = arith.constant 0 : index
    %c0_194 = arith.constant 0 : index
    %385 = vector.load %arg11[%c1_192, %c0_193, %c0_194] : memref<2x256x128xbf16, #tpu.memory_space<vmem>>, vector<1x256x128xbf16>
    %386 = vector.shape_cast %385 : vector<1x256x128xbf16> to vector<256x128xbf16>
    %cst_195 = arith.constant dense<0.000000e+00> : vector<8x128xf32>
    %387 = tpu.matmul %384, %386, %cst_195 {dimension_numbers = #tpu.dot_dimension_numbers<[1], [0], [0], [1], [0, 0, 1, 1], [], []>} : vector<8x256xbf16>, vector<256x128xbf16>, vector<8x128xf32> -> vector<8x128xf32>
    %388 = vector.extract_strided_slice %213 {offsets = [3, 0], sizes = [1, 128], strides = [1, 1]} : vector<4x128xf32> to vector<1x128xf32>
    %389 = arith.mulf %387, %387 : vector<8x128xf32>
    %cst_196 = arith.constant dense<0.000000e+00> : vector<8xf32>
    %390 = vector.multi_reduction <add>, %389, %cst_196 [1] : vector<8x128xf32> to vector<8xf32>
    %391 = vector.shape_cast %390 : vector<8xf32> to vector<8x1xf32>
    %cst_197 = arith.constant 1.000000e-30 : f32
    %392 = vector.broadcast %cst_197 : f32 to vector<8x1xf32>
    %393 = arith.addf %391, %392 : vector<8x1xf32>
    %394 = math.rsqrt %393 : vector<8x1xf32>
    %cst_198 = arith.constant 11.3137083 : f32
    %395 = vector.broadcast %cst_198 : f32 to vector<8x1xf32>
    %396 = arith.mulf %394, %395 : vector<8x1xf32>
    %397 = vector.broadcast %396 : vector<8x1xf32> to vector<8x128xf32>
    %398 = arith.mulf %387, %397 : vector<8x128xf32>
    %cst_199 = arith.constant 1.000000e+00 : f32
    %399 = vector.broadcast %cst_199 : f32 to vector<1x128xf32>
    %400 = arith.addf %399, %388 : vector<1x128xf32>
    %401 = vector.broadcast %400 : vector<1x128xf32> to vector<8x128xf32>
    %402 = arith.mulf %398, %401 : vector<8x128xf32>
    %403 = arith.addf %348, %402 : vector<8x128xf32>
    %404 = tpu.transpose %403, [1, 0] : vector<8x128xf32> -> vector<128x8xf32>
    %c0_200 = arith.constant 0 : index
    %c0_201 = arith.constant 0 : index
    %405 = vector.load %arg19[%c0_200, %c0_201] : memref<128x8xf32, #tpu.memory_space<vmem>>, vector<128x8xf32>
    tpu.vector_store %arg19[%c0_200, %c0_201], %404 {strides = array<i32>} : memref<128x8xf32, #tpu.memory_space<vmem>>, vector<128x8xf32>,
    return
  }
}

</mosaic_0001>

<bundles_post_ra>
// kernel: ane_gemma_model.1
= control target key start
LH: loop header
LB: loop body
LE: loop exit
PB: predicated region body
PF: predicated region fallthrough
CT: control target
= control target key end

     0   :  { %s4825_s0 = inlined_call_operand.vmem [shape: s32[2], index: 0, kind: input, shape index: {}]   ;;  %s4826_s1 = inlined_call_operand.vmem [shape: f32[128,8], index: 1, kind: input, shape index: {}]   ;;  %s4827_s2 = inlined_call_operand.vmem [shape: f32[8,16], index: 2, kind: input, shape index: {}]   ;;  %s4828_s3 = inlined_call_operand.vmem [shape: f32[8,16], index: 3, kind: input, shape index: {}]   ;;  %s4829_s4 = inlined_call_operand.vmem [shape: f32[1,1,16,32], index: 4, kind: input, shape index: {}, may-alias: {4,20}]   ;;  %s4830_s5 = inlined_call_operand.vmem [shape: f32[1,1,16,32], index: 5, kind: input, shape index: {}, may-alias: {5,21}]   ;;  %s4831_s6 = inlined_call_operand.vmem [shape: f32[1,1,16,32], index: 6, kind: input, shape index: {}, may-alias: {6,22}]   ;;  %s4832_s7 = inlined_call_operand.vmem [shape: f32[1,1,16,32], index: 7, kind: input, shape index: {}, may-alias: {7,23}]   ;;  %s4833_s8 = inlined_call_operand.vmem [shape: bf16[2,128,192], index: 8, kind: input, shape index: {}]   ;;  %s4834_s9 = inlined_call_operand.vmem [shape: bf16[2,128,128], index: 9, kind: input, shape index: {}]   ;;  %s4835_s10 = inlined_call_operand.vmem [shape: bf16[2,128,512], index: 10, kind: input, shape index: {}]   ;;  %s4836_s11 = inlined_call_operand.hbm [shape: bf16[2,256,128], index: 11, kind: input, shape index: {}]   ;;  %s4837_s12 = inlined_call_operand.vmem [shape: f32[2,4,128], index: 12, kind: input, shape index: {}]   ;;  %s4838_s13 = inlined_call_operand.vmem [shape: f32[2,1,32], index: 13, kind: input, shape index: {}]   ;;  %s4839_s14 = inlined_call_operand.vmem [shape: f32[2,1,32], index: 14, kind: input, shape index: {}]   ;;  %s4840_s15 = inlined_call_operand.hbm [shape: f32[8,32], index: 15, kind: input, shape index: {}]   ;;  %s4841_s16 = inlined_call_operand.hbm [shape: f32[8,32], index: 16, kind: input, shape index: {}]   ;;  %s4842_s17 = inlined_call_operand.hbm [shape: f32[8,32], index: 17, kind: input, shape index: {}]   ;;  %s4843_s18 = inlined_call_operand.hbm [shape: f32[8,32], index: 18, kind: input, shape index: {}]   ;;  %s4844_s19 = inlined_call_operand.vmem [shape: f32[128,8], index: 19, kind: output, shape index: {0}]   ;;  %s4845_s20 = inlined_call_operand.vmem [shape: f32[1,1,16,32], index: 20, kind: output, shape index: {1}, may-alias: {4,20}]   ;;  %s4846_s21 = inlined_call_operand.vmem [shape: f32[1,1,16,32], index: 21, kind: output, shape index: {2}, may-alias: {5,21}]   ;;  %s4847_s22 = inlined_call_operand.vmem [shape: f32[1,1,16,32], index: 22, kind: output, shape index: {3}, may-alias: {6,22}]   ;;  %s4848_s23 = inlined_call_operand.vmem [shape: f32[1,1,16,32], index: 23, kind: output, shape index: {4}, may-alias: {7,23}]  }
   0x1   :  { %4854 = sst [smem:[#allocation16_spill]] %s4825_s0 }
   0x2   :  { %4855 = sst [smem:[#allocation17_spill]] %s4826_s1 }
   0x3   :  { %4856 = sst [smem:[#allocation18_spill]] %s4827_s2 }
   0x4   :  { %4857 = sst [smem:[#allocation19_spill]] %s4828_s3 }
   0x5   :  { %4858 = sst [smem:[#allocation20_spill]] %s4829_s4 }
   0x6   :  { %4859 = sst [smem:[#allocation21_spill]] %s4830_s5 }
   0x7   :  { %4860 = sst [smem:[#allocation22_spill]] %s4831_s6 }
   0x8   :  { %4861 = sst [smem:[#allocation23_spill]] %s4832_s7 }
   0x9   :  { %29 = vsyncpa [#allocation4], 0 }
   0xa   :  { %30 = vsyncpa [#allocation3], 0 }
   0xb   :  { %31 = vsyncpa [#allocation7], 0  ;;  %s86_s24 = sshll.u32 %s4840_s15, 4  ;;  %s87_s24 = int_to_ptr.hbm [resolvable:$true] %s86_s24 }
   0xc   :  { %32 = vsyncpa [#allocation10], 0  ;;  %s3572_s25 = smov [#allocation6]   ;;  %s108_s2 = sshll.u32 %s4842_s17, 4  ;;  %s109_s2 = int_to_ptr.hbm [resolvable:$true] %s108_s2 }
   0xd   :  { %s88_s5 = sshll.u32 %s3572_s25, 4  ;;  %s3573_s6 = smov [#allocation9]   ;;  %s89_s5 = int_to_ptr.vmem [resolvable:$true] %s88_s5 }
   0xe   :  { %91 = dma.hbm_to_vmem [thread:$0]  %s87_s24, 128, %s89_s5, [#allocation7]  }
   0xf   :  { %s110_s27 = sshll.u32 %s3573_s6, 4  ;;  %s4862_s29 = sld [smem:[#allocation16_spill]]  ;;  %s111_s27 = int_to_ptr.vmem [resolvable:$true] %s110_s27 }
  0x10   :  { %113 = dma.hbm_to_vmem [thread:$0]  %s109_s2, 128, %s111_s27, [#allocation10]  }
  0x11   :  { %s66_s4 = sshll.u32 %s4836_s11, 4  ;;  %s3574_s30 = smov [#allocation2]   ;;  %s67_s4 = int_to_ptr.hbm [resolvable:$true] %s66_s4 }
  0x12   :  { %s3575_s25 = smov [#allocation5]   ;;  %s3576_s24 = smov 64  }
  0x13   :  { %s68_s17 = sshll.u32 %s3575_s25, 4  ;;  %s3577_s5 = smov 4   ;;  %s69_s17 = int_to_ptr.vmem [resolvable:$true] %s68_s17 }
  0x14   :  { %74 = dma.hbm_to_vmem [thread:$0]  %s67_s4, 4096, %s69_s17, [#allocation3], %s3576_s24, %s3576_s24, %s3577_s5  }
  0x15   :  { %s38_s3 = sshll.u32 %s4862_s29, 4  ;;  %s97_s6 = sshll.u32 %s4841_s16, 4  ;;  %s39_s3 = int_to_ptr.vmem [resolvable:$true] %s38_s3  ;;  %s98_s6 = int_to_ptr.hbm [resolvable:$true] %s97_s6 }
  0x16   :  { %41 = dma.vmem_to_smem %s39_s3, 16, %s3574_s30, [#allocation4]  }
  0x17   :  { %s3578_s2 = smov [#allocation8]   ;;  %s119_s28 = sshll.u32 %s4843_s18, 4  ;;  %s120_s28 = int_to_ptr.hbm [resolvable:$true] %s119_s28 }
  0x18   :  { %s99_s27 = sshll.u32 %s3578_s2, 4  ;;  %s3579_s29 = smov [#allocation11]   ;;  %s100_s27 = int_to_ptr.vmem [resolvable:$true] %s99_s27 }
  0x19   :  { %102 = dma.hbm_to_vmem [thread:$0]  %s98_s6, 128, %s100_s27, [#allocation7]  }
  0x1a   :  { %s121_s3 = sshll.u32 %s3579_s29, 4  ;;  %s122_s3 = int_to_ptr.vmem [resolvable:$true] %s121_s3 }
  0x1b   :  { %124 = dma.hbm_to_vmem [thread:$0]  %s120_s28, 128, %s122_s3, [#allocation10]  }
  0x1c   :  { %3564 = dma.done.wait [#allocation4], 16  }
  0x1d   :  { %3565 = vsyncadd [#allocation4], 4294967280 }
  0x1e   :  { %3566 = dma.done.wait [#allocation3], 4096  }
  0x1f   :  { %3567 = vsyncadd [#allocation3], 4294963200 }
  0x20   :  { %3568 = dma.done.wait [#allocation7], 256  }
  0x21   :  { %3569 = vsyncadd [#allocation7], 4294967040 }
  0x22   :  { %3570 = dma.done.wait [#allocation10], 256  }
  0x23   :  { %3571 = vsyncadd [#allocation10], 4294967040 }
  0x24   :  { %149 = sfence }
  0x25   :  { %s4863_s0 = sld [smem:[#allocation17_spill]]  ;;  %v2577_v16 = vld [vmem:[%s4833_s8 + $0x70] sm:$0xf]  ;;  %v3198_v17 = vld [vmem:[%s4833_s8 + $0x74] sm:$0xf0]  ;;  %s3580_s30 = smov 96  }
  0x26   :  { %v3197_v18 = vld [vmem:[%s4833_s8 + $0x74] sm:$0xf]  ;;  %v2578_v19 = vor.u32 %v3198_v17, %v2577_v16  ;;  %v2579_v20 = vld [vmem:[%s4833_s8 + $0x78] sm:$0xf0]  ;;  %v2569_v25 = vld [vmem:[%s4833_s8 + $0x60] sm:$0xf] }
  0x27   :  { %v2582_v21 = vor.u32 %v3197_v18, %v2579_v20  ;;  %v3196_v26 = vld [vmem:[%s4833_s8 + $0x64] sm:$0xf0]  ;;  %v3195_v27 = vld [vmem:[%s4833_s8 + $0x64] sm:$0xf]  ;;  %v2571_v29 = vld [vmem:[%s4833_s8 + $0x68] sm:$0xf0] }
  0x28   :  { %337 = vmatpush.bf16.msra.mxu0 %v2578_v19  ;;  %v2570_v28 = vor.u32 %v3196_v26, %v2569_v25  ;;  %v2574_v30 = vor.u32 %v3195_v27, %v2571_v29  ;;  %v2561_v31 = vld [vmem:[%s4833_s8 + $0x50] sm:$0xf]  ;;  %v3194_v32 = vld [vmem:[%s4833_s8 + $0x54] sm:$0xf0]  ;;  %v3193_v33 = vld [vmem:[%s4833_s8 + $0x54] sm:$0xf] }
  0x29   :  { %350 = vmatpush.bf16.msra.mxu1 %v2582_v21  ;;  %v2562_v34 = vor.u32 %v3194_v32, %v2561_v31  ;;  %v2563_v35 = vld [vmem:[%s4833_s8 + $0x58] sm:$0xf0]  ;;  %v2553_v37 = vld [vmem:[%s4833_s8 + $0x40] sm:$0xf]  ;;  %v3192_v38 = vld [vmem:[%s4833_s8 + $0x44] sm:$0xf0] }
  0x2a   :  { %v2566_v36 = vor.u32 %v3193_v33, %v2563_v35  ;;  %v3191_v39 = vld [vmem:[%s4833_s8 + $0x44] sm:$0xf]  ;;  %v2554_v40 = vor.u32 %v3192_v38, %v2553_v37  ;;  %v2555_v41 = vld [vmem:[%s4833_s8 + $0x48] sm:$0xf0]  ;;  %v2545_v43 = vld [vmem:[%s4833_s8 + $0x30] sm:$0xf] }
  0x2b   :  { %v167_v0 = vld [vmem:[%s4863_s0] sm:$0xff]  ;;  %v168_v1 = vld [vmem:[%s4863_s0 + $0x8] sm:$0xff]  ;;  %v169_v2 = vld [vmem:[%s4863_s0 + $0x10] sm:$0xff]  ;;  %v2558_v42 = vor.u32 %v3191_v39, %v2555_v41  ;;  %s3581_s25 = smov 32   ;;  %vm152_vm3 = vcmask 261120   ;;  %s3582_s6 = smov 16  }
  0x2c   :  { %183 = vxpose.xlu0.b32.start [1/16] (narrow) %v167_v0, 8  ;;  %v170_v3 = vld [vmem:[%s4863_s0 + $0x18] sm:$0xff]  ;;  %v171_v4 = vld [vmem:[%s4863_s0 + $0x20] sm:$0xff]  ;;  %v172_v5 = vld [vmem:[%s4863_s0 + $0x28] sm:$0xff]  ;;  %338 = vmatpush.bf16.msra.mxu0 %v2570_v28  ;;  %s3583_s2 = smov 112   ;;  %s4864_s7 = sld [smem:[#allocation20_spill]] }
  0x2d   :  { %v173_v6 = vld [vmem:[%s4863_s0 + $0x30] sm:$0xff]  ;;  %v174_v7 = vld [vmem:[%s4863_s0 + $0x38] sm:$0xff]  ;;  %v175_v8 = vld [vmem:[%s4863_s0 + $0x40] sm:$0xff]  ;;  %351 = vmatpush.bf16.msra.mxu1 %v2574_v30  ;;  %s3953_s4 = sld [smem:[#allocation2]] }
  0x2e   :  { %v176_v9 = vld [vmem:[%s4863_s0 + $0x48] sm:$0xff]  ;;  %v177_v10 = vld [vmem:[%s4863_s0 + $0x50] sm:$0xff]  ;;  %v178_v11 = vld [vmem:[%s4863_s0 + $0x58] sm:$0xff]  ;;  %s4865_s28 = sld [smem:[#allocation19_spill]] }
  0x2f   :  { %v179_v12 = vld [vmem:[%s4863_s0 + $0x60] sm:$0xff]  ;;  %v180_v13 = vld [vmem:[%s4863_s0 + $0x68] sm:$0xff]  ;;  %v181_v14 = vld [vmem:[%s4863_s0 + $0x70] sm:$0xff]  ;;  %s4866_s16 = sld [smem:[#allocation21_spill]] }
  0x30   :  { %v182_v15 = vld [vmem:[%s4863_s0 + $0x78] sm:$0xff]  ;;  %339 = vmatpush.bf16.msra.mxu0 %v2562_v34  ;;  %v3189_v45 = vld [vmem:[%s4833_s8 + $0x34] sm:$0xf]  ;;  %v2537_v49 = vld [vmem:[%s4833_s8 + $0x20] sm:$0xf]  ;;  %s4868_s18 = sld [smem:[#allocation18_spill]] }
  0x31   :  { %352 = vmatpush.bf16.msra.mxu1 %v2566_v36  ;;  %v3190_v44 = vld [vmem:[%s4833_s8 + $0x34] sm:$0xf0]  ;;  %v2547_v47 = vld [vmem:[%s4833_s8 + $0x38] sm:$0xf0]  ;;  %v3188_v50 = vld [vmem:[%s4833_s8 + $0x24] sm:$0xf0] }
  0x32   :  { %v2546_v46 = vor.u32 %v3190_v44, %v2545_v43  ;;  %v2550_v48 = vor.u32 %v3189_v45, %v2547_v47  ;;  %v3187_v51 = vld [vmem:[%s4833_s8 + $0x24] sm:$0xf]  ;;  %v2538_v52 = vor.u32 %v3188_v50, %v2537_v49  ;;  %v2539_v53 = vld [vmem:[%s4833_s8 + $0x28] sm:$0xf0]  ;;  %v2529_v55 = vld [vmem:[%s4833_s8 + $0x10] sm:$0xf] }
  0x33   :  { %v2542_v54 = vor.u32 %v3187_v51, %v2539_v53  ;;  %v3186_v56 = vld [vmem:[%s4833_s8 + $0x14] sm:$0xf0]  ;;  %v3185_v57 = vld [vmem:[%s4833_s8 + $0x14] sm:$0xf]  ;;  %v2531_v59 = vld [vmem:[%s4833_s8 + $0x18] sm:$0xf0]  ;;  %s400_s5 = scalar_lea.vmem %s4845_s20, %s3953_s4  ;;  %s406_s11 = scalar_lea.vmem %s4846_s21, %s3953_s4 }
  0x34   :  { %184 = vxpose.xlu0.b32.cont [2/16] (narrow) %v168_v1, 8  ;;  %340 = vmatpush.bf16.msra.mxu0 %v2554_v40  ;;  %v2530_v58 = vor.u32 %v3186_v56, %v2529_v55  ;;  %v2521_v60 = vld [vmem:[%s4833_s8] sm:$0xf]  ;;  %v3184_v61 = vld [vmem:[%s4833_s8 + $0x4] sm:$0xf0]  ;;  %v2534_v62 = vor.u32 %v3185_v57, %v2531_v59  ;;  %s4448_s4 = sld [smem:[#allocation2 + $0x1]] }
  0x35   :  { %353 = vmatpush.bf16.msra.mxu1 %v2558_v42  ;;  %v3183_v63 = vld [vmem:[%s4833_s8 + $0x4] sm:$0xf]  ;;  %v2523_v0 = vld [vmem:[%s4833_s8 + $0x8] sm:$0xf0]  ;;  %v2522_v1 = vor.u32 %v3184_v61, %v2521_v60  ;;  %v363_v50 = vld [vmem:[%s4839_s14] sm:$0x1] }
  0x36   :  { %v381_v53 = vadd.f32 1.0, %v363_v50  ;;  %v422_v56 = vld [vmem:[%s4838_s13] sm:$0x1]  ;;  %v219_v50 = vld [vmem:[#allocation8] sm:$0xff]  ;;  %s4869_s0 = sld [smem:[#allocation23_spill]] }
  0x38   :  { %341 = vmatpush.bf16.msra.mxu0 %v2546_v46  ;;  %v383_v59 = vperm.slane %v381_v53, 0 }
  0x39   :  { %354 = vmatpush.bf16.msra.mxu1 %v2550_v48 }
  0x3c   :  { %185 = vxpose.xlu0.b32.cont [3/16] (narrow) %v169_v2, 8  ;;  %342 = vmatpush.bf16.msra.mxu0 %v2538_v52  ;;  %v2526_v2 = vor.u32 %v3183_v63, %v2523_v0 }
  0x3d   :  { %355 = vmatpush.bf16.msra.mxu1 %v2542_v54 }
  0x40   :  { %343 = vmatpush.bf16.msra.mxu0 %v2530_v58 }
  0x41   :  { %356 = vmatpush.bf16.msra.mxu1 %v2534_v62  ;;  %v491_v62 = vadd.f32 1.0, %v422_v56 }
  0x44   :  { %186 = vxpose.xlu0.b32.cont [4/16] (narrow) %v170_v3, 8  ;;  %344 = vmatpush.bf16.msra.mxu0 %v2522_v1 }
  0x45   :  { %357 = vmatpush.bf16.msra.mxu1 %v2526_v2  ;;  %v493_v2 = vperm.slane %v491_v62, 0 }
  0x4c   :  { %187 = vxpose.xlu0.b32.cont [5/16] (narrow) %v171_v4, 8 }
  0x54   :  { %188 = vxpose.xlu0.b32.cont [6/16] (narrow) %v172_v5, 8 }
  0x5c   :  { %189 = vxpose.xlu0.b32.cont [7/16] (narrow) %v173_v6, 8 }
  0x64   :  { %190 = vxpose.xlu0.b32.cont [8/16] (narrow) %v174_v7, 8 }
  0x6c   :  { %191 = vxpose.xlu0.b32.cont [9/16] (narrow) %v175_v8, 8 }
  0x74   :  { %192 = vxpose.xlu0.b32.cont [10/16] (narrow) %v176_v9, 8  ;;  %v220_v9 = vld [vmem:[%s4837_s12] sm:$0xf] }
  0x7c   :  { %193 = vxpose.xlu0.b32.cont [11/16] (narrow) %v177_v10, 8 }
  0x84   :  { %194 = vxpose.xlu0.b32.cont [12/16] (narrow) %v178_v11, 8  ;;  %v3875_v11 = vadd.f32 1.0, %v220_v9 }
  0x8c   :  { %195 = vxpose.xlu0.b32.cont [13/16] (narrow) %v179_v12, 8 }
  0x94   :  { %196 = vxpose.xlu0.b32.cont [14/16] (narrow) %v180_v13, 8 }
  0x9c   :  { %197 = vxpose.xlu0.b32.cont [15/16] (narrow) %v181_v14, 8 }
  0xa4   :  { %198 = vxpose.xlu0.b32.end [16/16] (narrow) %v182_v15, 8  ;;  %v238_v15 = vperm.slane %v3875_v11, 0 }
  0xd0   :  { %v199_v22 = vpop.trf.xlu0 }
  0xd1   :  { %v3784_v23 = vmul.f32 11.3125, %v199_v22 }
  0xd3   :  { %v221_v24 = vmul.f32 %v3784_v23, %v3784_v23 }
  0xd5   :  { %222 = vadd.xlane.f32.xlu1 %v221_v24 }
 0x148   :  { %v223_v3 = vpop.xlane.xlu1 %222 }
 0x149   :  { %v224_v4 = vadd.f32 1e-30, %v223_v3 }
 0x14b   :  { %3340 = vrsqrt.f32 %v224_v4  ;;  %vm231_vm1 = vweird.f32 %v224_v4 }
 0x151   :  { %v3341_v5 = vpop.eup %3340 }
 0x152   :  { %v226_v6 = vmul.f32 %v3341_v5, %v224_v4  ;;  %vm232_vm0 = vweird.f32 %v3341_v5 }
 0x153   :  { %vm233_vm2 = vmor %vm231_vm1, %vm232_vm0 }
 0x154   :  { %v227_v7 = vmul.f32 %v3341_v5, %v226_v6 }
 0x156   :  { %v228_v8 = vmul.f32 0.5, %v227_v7 }
 0x158   :  { %v229_v10 = vsub.f32 1.5, %v228_v8 }
 0x15a   :  { %v230_v12 = vmul.f32 %v3341_v5, %v229_v10 }
 0x15c   :  { %v234_v13 = vsel %vm233_vm2, %v3341_v5, %v230_v12 }
 0x15d   :  { %v235_v14 = vmul.f32 11.313708, %v234_v13 }
 0x15f   :  { %v236_v16 = vmul.f32 %v235_v14, %v3784_v23 }
 0x161   :  { %v239_v17 = vmul.f32 %v238_v15, %v236_v16 }
 0x163   :  { %v240_v18 = vpack.c.bf16 %v239_v17, %v239_v17 }
 0x165   :  { %345 = vmatmul.bf16.vlgmr.msra.gmra.mxu0 %v240_v18  ;;  %358 = vmatmul.bf16.vlgmr.msra.gmra.mxu1 %v240_v18 }
 0x1e2   :  { %v3879_v19 = vpop.f32.mrf.mxu0  ;;  %v3881_v20 = vpop.f32.mrf.mxu1 }
 0x1e3   :  { %416 = vrot.lane.b32.xlu2 %v3879_v19, %s3576_s24  ;;  %413 = vrot.lane.b32.xlu1 %v3879_v19, %s3580_s30  ;;  %v423_v24 = vmul.f32 %v3879_v19, %v3879_v19  ;;  %v364_v26 = vmul.f32 %v3881_v20, %v3881_v20 }
 0x1e5   :  { %v427_v25 = vsel %vm152_vm3, %v423_v24, 0.0  ;;  %v365_v27 = vsel %vm152_vm3, %v364_v26, 0.0 }
 0x1ea   :  { %v348_v21 = vpop.f32.mrf.mxu0  ;;  %v361_v22 = vpop.f32.mrf.mxu1 }
 0x1eb   :  { %419 = vrot.lane.b32.xlu2 %v3879_v19, %s3581_s25 }
 0x20d   :  { %428 = vadd.xlane.f32.xlu1 %v427_v25 }
 0x214   :  { %366 = vadd.xlane.f32.xlu2 %v365_v27 }
 0x23d   :  { %v3899_v30 = vpop.permute.xlu2 %416 }
 0x23e   :  { %v425_v32 = vmul.f32 %v3899_v30, %v3899_v30 }
 0x240   :  { %v433_v33 = vsel %vm152_vm3, %v425_v32, 0.0 }
 0x245   :  { %v3905_v34 = vpop.permute.xlu2 %419 }
 0x246   :  { %v426_v35 = vmul.f32 %v3905_v34, %v3905_v34 }
 0x248   :  { %v436_v36 = vsel %vm152_vm3, %v426_v35, 0.0 }
 0x255   :  { %v3895_v28 = vpop.permute.xlu1 %413 }
 0x256   :  { %v424_v29 = vmul.f32 %v3895_v28, %v3895_v28 }
 0x258   :  { %v430_v31 = vsel %vm152_vm3, %v424_v29, 0.0 }
 0x259   :  { %431 = vadd.xlane.f32.xlu2 %v430_v31 }
 0x261   :  { %434 = vadd.xlane.f32.xlu2 %v433_v33 }
 0x269   :  { %437 = vadd.xlane.f32.xlu2 %v436_v36 }
 0x280   :  { %v429_v37 = vpop.xlane.xlu1 %428 }
 0x281   :  { %v439_v38 = vadd.f32 1e-30, %v429_v37 }
 0x283   :  { %3342 = vrsqrt.f32 %v439_v38  ;;  %vm449_vm6 = vweird.f32 %v439_v38 }
 0x287   :  { %v367_v39 = vpop.xlane.xlu2 %366 }
 0x288   :  { %v368_v40 = vadd.f32 1e-30, %v367_v39 }
 0x289   :  { %v3343_v41 = vpop.eup %3342 }
 0x28a   :  { %v444_v42 = vmul.f32 %v3343_v41, %v439_v38  ;;  %3344 = vrsqrt.f32 %v368_v40  ;;  %vm450_vm4 = vweird.f32 %v3343_v41  ;;  %vm375_vm8 = vweird.f32 %v368_v40 }
 0x28b   :  { %vm451_vm7 = vmor %vm449_vm6, %vm450_vm4  ;;  %vm395_vm4 = vcmask 130048  }
 0x28c   :  { %v445_v43 = vmul.f32 %v3343_v41, %v444_v42 }
 0x28e   :  { %v446_v44 = vmul.f32 0.5, %v445_v43 }
 0x290   :  { %v3345_v45 = vpop.eup %3344  ;;  %v447_v47 = vsub.f32 1.5, %v446_v44 }
 0x291   :  { %v370_v46 = vmul.f32 %v3345_v45, %v368_v40  ;;  %vm376_vm5 = vweird.f32 %v3345_v45 }
 0x292   :  { %v448_v51 = vmul.f32 %v3343_v41, %v447_v47  ;;  %vm377_vm9 = vmor %vm375_vm8, %vm376_vm5 }
 0x293   :  { %v371_v48 = vmul.f32 %v3345_v45, %v370_v46 }
 0x294   :  { %v452_v57 = vsel %vm451_vm7, %v3343_v41, %v448_v51 }
 0x295   :  { %v372_v49 = vmul.f32 0.5, %v371_v48  ;;  %v483_v61 = vmul.f32 5.656854, %v452_v57  ;;  %v151_v48 = vld [vmem:[%s4864_s7 + $0x8] sm:$0xff] }
 0x297   :  { %v373_v52 = vsub.f32 1.5, %v372_v49  ;;  %v487_v1 = vmul.f32 %v483_v61, %v3879_v19 }
 0x299   :  { %v374_v54 = vmul.f32 %v3345_v45, %v373_v52  ;;  %v3924_v3 = vmul.f32 %v493_v2, %v487_v1  ;;  %v218_v52 = vld [vmem:[#allocation6] sm:$0xff] }
 0x29b   :  { %v378_v55 = vsel %vm377_vm9, %v3345_v45, %v374_v54  ;;  %v499_v4 = vsub.f32 0.0, %v3924_v3  ;;  %v539_v62 = vmul.f32 %v3924_v3, %v218_v52 }
 0x29c   :  { %v379_v58 = vmul.f32 5.656854, %v378_v55 }
 0x29e   :  { %v380_v60 = vmul.f32 %v379_v58, %v3881_v20 }
 0x2a0   :  { %v3917_v63 = vmul.f32 %v383_v59, %v380_v60 }
 0x2a2   :  { %392 = vrot.lane.b32.xlu2 %v3917_v63, %s3582_s6  ;;  %v386_v0 = vsub.f32 0.0, %v3917_v63  ;;  %v397_v54 = vmul.f32 %v3917_v63, %v218_v52 }
 0x2a4   :  { %388 = vrot.lane.b32.xlu1 %v386_v0, %s3583_s2 }
 0x2aa   :  { %523 = vrot.lane.b32.xlu2 %v3924_v3, %s3582_s6 }
 0x2ac   :  { %507 = vrot.lane.b32.xlu1 %v499_v4, %s3583_s2 }
 0x2cc   :  { %v432_v5 = vpop.xlane.xlu2 %431 }
 0x2cd   :  { %v440_v6 = vadd.f32 1e-30, %v432_v5 }
 0x2cf   :  { %3346 = vrsqrt.f32 %v440_v6  ;;  %vm459_vm11 = vweird.f32 %v440_v6 }
 0x2d4   :  { %v435_v7 = vpop.xlane.xlu2 %434 }
 0x2d5   :  { %v3347_v8 = vpop.eup %3346  ;;  %v441_v9 = vadd.f32 1e-30, %v435_v7 }
 0x2d6   :  { %v454_v10 = vmul.f32 %v3347_v8, %v440_v6  ;;  %vm460_vm10 = vweird.f32 %v3347_v8 }
 0x2d7   :  { %3348 = vrsqrt.f32 %v441_v9  ;;  %vm461_vm12 = vmor %vm459_vm11, %vm460_vm10  ;;  %vm469_vm14 = vweird.f32 %v441_v9 }
 0x2d8   :  { %v455_v12 = vmul.f32 %v3347_v8, %v454_v10 }
 0x2da   :  { %v456_v13 = vmul.f32 0.5, %v455_v12 }
 0x2dc   :  { %v457_v14 = vsub.f32 1.5, %v456_v13  ;;  %v438_v15 = vpop.xlane.xlu2 %437 }
 0x2dd   :  { %v3349_v16 = vpop.eup %3348  ;;  %v442_v17 = vadd.f32 1e-30, %v438_v15 }
 0x2de   :  { %v458_v18 = vmul.f32 %v3347_v8, %v457_v14  ;;  %v464_v19 = vmul.f32 %v3349_v16, %v441_v9  ;;  %vm470_vm13 = vweird.f32 %v3349_v16 }
 0x2df   :  { %3350 = vrsqrt.f32 %v442_v17  ;;  %vm471_vm15 = vmor %vm469_vm14, %vm470_vm13  ;;  %vm479_vm1 = vweird.f32 %v442_v17 }
 0x2e0   :  { %v465_v21 = vmul.f32 %v3349_v16, %v464_v19  ;;  %v462_v22 = vsel %vm461_vm12, %v3347_v8, %v458_v18 }
 0x2e1   :  { %v484_v24 = vmul.f32 5.656854, %v462_v22 }
 0x2e2   :  { %v466_v25 = vmul.f32 0.5, %v465_v21 }
 0x2e3   :  { %v488_v26 = vmul.f32 %v484_v24, %v3895_v28 }
 0x2e4   :  { %v467_v27 = vsub.f32 1.5, %v466_v25 }
 0x2e5   :  { %v3351_v29 = vpop.eup %3350  ;;  %v496_v31 = vmul.f32 %v493_v2, %v488_v26 }
 0x2e6   :  { %v468_v32 = vmul.f32 %v3349_v16, %v467_v27  ;;  %v474_v33 = vmul.f32 %v3351_v29, %v442_v17  ;;  %vm480_vm0 = vweird.f32 %v3351_v29 }
 0x2e7   :  { %525 = vrot.lane.b32.xlu2 %v496_v31, %s3582_s6  ;;  %v500_v35 = vsub.f32 0.0, %v496_v31  ;;  %vm481_vm2 = vmor %vm479_vm1, %vm480_vm0  ;;  %v540_v7 = vmul.f32 %v496_v31, %v218_v52  ;;  %v217_v31 = vld [vmem:[%s4865_s28] sm:$0xff] }
 0x2e8   :  { %v475_v36 = vmul.f32 %v3351_v29, %v474_v33  ;;  %v472_v37 = vsel %vm471_vm15, %v3349_v16, %v468_v32 }
 0x2e9   :  { %509 = vrot.lane.b32.xlu1 %v500_v35, %s3583_s2  ;;  %v485_v38 = vmul.f32 5.656854, %v472_v37 }
 0x2ea   :  { %v476_v39 = vmul.f32 0.5, %v475_v36 }
 0x2eb   :  { %v489_v40 = vmul.f32 %v485_v38, %v3899_v30  ;;  %v150_v30 = vld [vmem:[%s4864_s7] sm:$0xff] }
 0x2ec   :  { %v477_v28 = vsub.f32 1.5, %v476_v39  ;;  %153 = vst.msk [vmem:[%s4845_s20] sm:$0xff] %vm152_vm3, %v150_v30 }
 0x2ed   :  { %v497_v41 = vmul.f32 %v493_v2, %v489_v40  ;;  %154 = vst.msk [vmem:[%s4845_s20 + $0x8] sm:$0xff] %vm152_vm3, %v151_v48 }
 0x2ee   :  { %v478_v42 = vmul.f32 %v3351_v29, %v477_v28 }
 0x2ef   :  { %527 = vrot.lane.b32.xlu2 %v497_v41, %s3582_s6  ;;  %v501_v43 = vsub.f32 0.0, %v497_v41  ;;  %v541_v14 = vmul.f32 %v497_v41, %v218_v52 }
 0x2f0   :  { %v482_v44 = vsel %vm481_vm2, %v3351_v29, %v478_v42 }
 0x2f1   :  { %511 = vrot.lane.b32.xlu1 %v501_v43, %s3583_s2  ;;  %v486_v45 = vmul.f32 5.656854, %v482_v44 }
 0x2f3   :  { %v490_v46 = vmul.f32 %v486_v45, %v3905_v34 }
 0x2f5   :  { %v498_v47 = vmul.f32 %v493_v2, %v490_v46 }
 0x2f7   :  { %529 = vrot.lane.b32.xlu0 %v498_v47, %s3582_s6  ;;  %v502_v49 = vsub.f32 0.0, %v498_v47  ;;  %v542_v22 = vmul.f32 %v498_v47, %v218_v52 }
 0x2f9   :  { %513 = vrot.lane.b32.xlu1 %v502_v49, %s3583_s2 }
 0x2fc   :  { %v393_v34 = vpop.permute.xlu2 %392 }
 0x304   :  { %v524_v57 = vpop.permute.xlu2 %523 }
 0x316   :  { %v389_v51 = vpop.permute.xlu1 %388 }
 0x317   :  { %v396_v53 = vsel %vm395_vm4, %v389_v51, %v393_v34 }
 0x318   :  { %v398_v55 = vmul.f32 %v396_v53, %v219_v50 }
 0x31a   :  { %v399_v56 = vadd.f32 %v398_v55, %v397_v54 }
 0x31c   :  { %401 = vst.msk [vmem:[%s400_s5] sm:$0xff] %vm152_vm3, %v399_v56  ;;  %s4867_s5 = sld [smem:[#allocation22_spill]] }
 0x31e   :  { %v508_v58 = vpop.permute.xlu1 %507 }
 0x31f   :  { %v535_v59 = vsel %vm395_vm4, %v508_v58, %v524_v57 }
 0x320   :  { %v543_v60 = vmul.f32 %v535_v59, %v219_v50 }
 0x322   :  { %v547_v63 = vadd.f32 %v543_v60, %v539_v62 }
 0x323   :  { %v409_v61 = vld [vmem:[%s4845_s20 + $0x8] sm:$0xff]  ;;  %v408_v0 = vld [vmem:[%s4845_s20] sm:$0xff]  ;;  %s1519_s20 = scalar_lea.vmem %s4848_s23, %s4448_s4 }
 0x324   :  { %2583 = vmatpush.xpose.msk.msra.mxu2 %vm152_vm3, %v409_v61  ;;  %v551_v1 = vmul.f32 0.17677669, %v547_v63 }
 0x328   :  { %2584 = vmatpush.xpose.msk.msra.mxu2 %vm152_vm3, %v408_v0 }
 0x32b   :  { %2585 = vmatmul.msk.f32.vlgmr.msra.gmra.mxu2 %vm152_vm3, %v551_v1 }
 0x341   :  { %v526_v2 = vpop.permute.xlu2 %525 }
 0x349   :  { %v528_v9 = vpop.permute.xlu2 %527 }
 0x35b   :  { %v510_v4 = vpop.permute.xlu1 %509 }
 0x35c   :  { %v536_v5 = vsel %vm395_vm4, %v510_v4, %v526_v2 }
 0x35d   :  { %v544_v6 = vmul.f32 %v536_v5, %v219_v50 }
 0x35f   :  { %v548_v8 = vadd.f32 %v544_v6, %v540_v7  ;;  %v155_v7 = vld [vmem:[%s4866_s16] sm:$0xff] }
 0x361   :  { %v552_v3 = vmul.f32 0.17677669, %v548_v8  ;;  %v156_v8 = vld [vmem:[%s4866_s16 + $0x8] sm:$0xff] }
 0x362   :  { %157 = vst.msk [vmem:[%s4846_s21] sm:$0xff] %vm152_vm3, %v155_v7  ;;  %v3201_v7 = vld [vmem:[%s4834_s9 + $0x10] sm:$0xff] }
 0x363   :  { %v512_v10 = vpop.permute.xlu1 %511  ;;  %2586 = vmatmul.msk.f32.gmra.mxu2 %vm152_vm3, %v552_v3  ;;  %158 = vst.msk [vmem:[%s4846_s21 + $0x8] sm:$0xff] %vm152_vm3, %v156_v8  ;;  %v3200_v8 = vld [vmem:[%s4834_s9 + $0x8] sm:$0xff] }
 0x364   :  { %v537_v12 = vsel %vm395_vm4, %v512_v10, %v528_v9 }
 0x365   :  { %v545_v13 = vmul.f32 %v537_v12, %v219_v50 }
 0x367   :  { %v549_v15 = vadd.f32 %v545_v13, %v541_v14 }
 0x369   :  { %v553_v16 = vmul.f32 0.17677669, %v549_v15  ;;  %v530_v17 = vpop.permute.xlu0 %529 }
 0x36b   :  { %v514_v18 = vpop.permute.xlu1 %513  ;;  %2587 = vmatmul.msk.f32.gmra.mxu2 %vm152_vm3, %v553_v16 }
 0x36c   :  { %v538_v19 = vsel %vm395_vm4, %v514_v18, %v530_v17 }
 0x36d   :  { %v546_v21 = vmul.f32 %v538_v19, %v219_v50 }
 0x36f   :  { %v550_v24 = vadd.f32 %v546_v21, %v542_v22 }
 0x371   :  { %v554_v25 = vmul.f32 0.17677669, %v550_v24 }
 0x373   :  { %2588 = vmatmul.msk.f32.gmra.mxu2 %vm152_vm3, %v554_v25 }
 0x3ae   :  { %v590_v26 = vpop.f32.mrf.mxu2 }
 0x3af   :  { %v602_v27 = vmul.f32 0.02, %v590_v26 }
 0x3b1   :  { %3352 = vtanh.f32 %v602_v27 }
 0x3b7   :  { %v3353_v29 = vpop.eup %3352 }
 0x3b8   :  { %v610_v32 = vmul.f32 50.0, %v3353_v29 }
 0x3ba   :  { %v614_v33 = vadd.f32 %v610_v32, %v217_v31 }
 0x3bc   :  { %v618_v35 = vsel %vm395_vm4, %v614_v33, -inf }
 0x3bd   :  { %619 = vmax.xlane.f32.xlu2 %v618_v35 }
 0x3e6   :  { %v593_v36 = vpop.f32.mrf.mxu2 }
 0x3e7   :  { %v603_v37 = vmul.f32 0.02, %v593_v36 }
 0x3e9   :  { %3354 = vtanh.f32 %v603_v37 }
 0x3ee   :  { %v596_v38 = vpop.f32.mrf.mxu2 }
 0x3ef   :  { %v3355_v39 = vpop.eup %3354  ;;  %v604_v40 = vmul.f32 0.02, %v596_v38 }
 0x3f0   :  { %v611_v28 = vmul.f32 50.0, %v3355_v39 }
 0x3f1   :  { %3356 = vtanh.f32 %v604_v40 }
 0x3f2   :  { %v615_v41 = vadd.f32 %v611_v28, %v217_v31 }
 0x3f4   :  { %v621_v42 = vsel %vm395_vm4, %v615_v41, -inf }
 0x3f5   :  { %622 = vmax.xlane.f32.xlu1 %v621_v42 }
 0x3f6   :  { %v599_v43 = vpop.f32.mrf.mxu2 }
 0x3f7   :  { %v3357_v44 = vpop.eup %3356  ;;  %v605_v45 = vmul.f32 0.02, %v599_v43 }
 0x3f8   :  { %v612_v46 = vmul.f32 50.0, %v3357_v44 }
 0x3f9   :  { %3358 = vtanh.f32 %v605_v45 }
 0x3fa   :  { %v616_v47 = vadd.f32 %v612_v46, %v217_v31 }
 0x3fc   :  { %v624_v30 = vsel %vm395_vm4, %v616_v47, -inf }
 0x3fd   :  { %625 = vmax.xlane.f32.xlu2 %v624_v30 }
 0x3ff   :  { %v3359_v48 = vpop.eup %3358 }
 0x400   :  { %v613_v49 = vmul.f32 50.0, %v3359_v48 }
 0x402   :  { %v617_v34 = vadd.f32 %v613_v49, %v217_v31 }
 0x404   :  { %v627_v50 = vsel %vm395_vm4, %v617_v34, -inf }
 0x405   :  { %628 = vmax.xlane.f32.xlu1 %v627_v50 }
 0x430   :  { %v620_v51 = vpop.xlane.xlu2 %619 }
 0x431   :  { %v630_v52 = vsub.f32 %v614_v33, %v620_v51 }
 0x433   :  { %v634_v53 = vmul.f32 1.442695, %v630_v52 }
 0x435   :  { %3360 = vpow2.f32 %v634_v53 }
 0x43b   :  { %v3361_v54 = vpop.eup %3360 }
 0x43c   :  { %v642_v55 = vsel %vm395_vm4, %v3361_v54, 0.0 }
 0x43d   :  { %643 = vadd.xlane.f32.xlu2 %v642_v55 }
 0x455   :  { %403 = vrot.lane.b32.xlu2 %v3881_v20, %s3580_s30 }
 0x468   :  { %v623_v56 = vpop.xlane.xlu1 %622 }
 0x469   :  { %v631_v57 = vsub.f32 %v615_v41, %v623_v56 }
 0x46b   :  { %v636_v58 = vmul.f32 1.442695, %v631_v57 }
 0x46d   :  { %3362 = vpow2.f32 %v636_v58 }
 0x470   :  { %v626_v59 = vpop.xlane.xlu2 %625 }
 0x471   :  { %v632_v60 = vsub.f32 %v616_v47, %v626_v59 }
 0x473   :  { %v3989_v61 = vpop.eup %3362  ;;  %v638_v62 = vmul.f32 1.442695, %v632_v60 }
 0x474   :  { %v645_v63 = vsel %vm395_vm4, %v3989_v61, 0.0 }
 0x475   :  { %3364 = vpow2.f32 %v638_v62  ;;  %646 = vadd.xlane.f32.xlu1 %v645_v63  ;;  %v3206_v62 = vld [vmem:[%s4834_s9 + $0x38] sm:$0xff]  ;;  %v3205_v63 = vld [vmem:[%s4834_s9 + $0x30] sm:$0xff] }
 0x476   :  { %837 = vmatpush.bf16.msra.mxu3 %v3206_v62  ;;  %v3227_v62 = vld [vmem:[%s4835_s10 + $0xa4] sm:$0xf] }
 0x478   :  { %v629_v0 = vpop.xlane.xlu1 %628 }
 0x479   :  { %v633_v1 = vsub.f32 %v617_v34, %v629_v0  ;;  %v3204_v0 = vld [vmem:[%s4834_s9 + $0x28] sm:$0xff] }
 0x47a   :  { %838 = vmatpush.bf16.msra.mxu3 %v3205_v63 }
 0x47b   :  { %v3993_v2 = vpop.eup %3364  ;;  %v640_v20 = vmul.f32 1.442695, %v633_v1 }
 0x47c   :  { %v648_v4 = vsel %vm395_vm4, %v3993_v2, 0.0 }
 0x47d   :  { %3366 = vpow2.f32 %v640_v20  ;;  %649 = vadd.xlane.f32.xlu1 %v648_v4 }
 0x47e   :  { %839 = vmatpush.bf16.msra.mxu3 %v3204_v0  ;;  %v2709_v0 = vld [vmem:[%s4835_s10 + $0xb0] sm:$0xf0] }
 0x483   :  { %v3997_v5 = vpop.eup %3366 }
 0x484   :  { %v651_v6 = vsel %vm395_vm4, %v3997_v5, 0.0 }
 0x485   :  { %652 = vadd.xlane.f32.xlu1 %v651_v6  ;;  %v3202_v6 = vld [vmem:[%s4834_s9 + $0x18] sm:$0xff] }
 0x4b0   :  { %v644_v3 = vpop.xlane.xlu2 %643 }
 0x4b1   :  { %3368 = vrcp.f32 %v644_v3  ;;  %v665_v14 = vand.u32 2147483648, %v644_v3  ;;  %v663_v16 = vand.u32 2147483647, %v644_v3  ;;  %vm659_vm6 = vweird.f32 %v644_v3 }
 0x4b3   :  { %v666_v18 = vor.u32 1.1754944e-38, %v665_v14  ;;  %vm664_vm8 = vcmp.eq.f32.partialorder %v663_v16, 8.507059e+37 }
 0x4b7   :  { %v3369_v9 = vpop.eup %3368 }
 0x4b8   :  { %v655_v10 = vmul.f32 %v3369_v9, %v644_v3  ;;  %v404_v12 = vpop.permute.xlu2 %403  ;;  %vm660_vm5 = vweird.f32 %v3369_v9  ;;  %v3199_v3 = vld [vmem:[%s4834_s9] sm:$0xff] }
 0x4b9   :  { %407 = vst.msk [vmem:[%s406_s11] sm:$0xff] %vm152_vm3, %v404_v12  ;;  %vm661_vm7 = vmor %vm659_vm6, %vm660_vm5 }
 0x4ba   :  { %v656_v13 = vsub.f32 1.0, %v655_v10 }
 0x4bc   :  { %v657_v15 = vmul.f32 %v3369_v9, %v656_v13 }
 0x4be   :  { %v658_v17 = vadd.f32 %v3369_v9, %v657_v15 }
 0x4c0   :  { %v411_v19 = vld [vmem:[%s4846_s21 + $0x8] sm:$0xff]  ;;  %v662_v21 = vsel %vm661_vm7, %v3369_v9, %v658_v17  ;;  %v410_v24 = vld [vmem:[%s4846_s21] sm:$0xff]  ;;  %vm768_vm7 = vcmask 523264   ;;  %s1513_s21 = scalar_lea.vmem %s4847_s22, %s4448_s4 }
 0x4c1   :  { %740 = vmatpush.msrb.mxu0 %v411_v19  ;;  %v667_v22 = vsel %vm664_vm8, %v666_v18, %v662_v21  ;;  %vm770_vm8 = vcmask 785408   ;;  %v2739_v21 = vld [vmem:[%s4835_s10 + $0xe0] sm:$0xf] }
 0x4c2   :  { %v668_v25 = vmul.f32 %v3361_v54, %v667_v22  ;;  %v3237_v22 = vld [vmem:[%s4835_s10 + $0xec] sm:$0xf0] }
 0x4c3   :  { %741 = vmatpush.msrb.mxu0 %v410_v24  ;;  %v3235_v24 = vld [vmem:[%s4835_s10 + $0xe4] sm:$0xf] }
 0x4c4   :  { %2589 = vmatmul.msk.f32.vlgmr.msrb.gmra.mxu0 %vm395_vm4, %v668_v25 }
 0x4e8   :  { %v647_v26 = vpop.xlane.xlu1 %646 }
 0x4e9   :  { %3370 = vrcp.f32 %v647_v26  ;;  %v680_v33 = vand.u32 2147483648, %v647_v26  ;;  %v678_v36 = vand.u32 2147483647, %v647_v26  ;;  %vm674_vm10 = vweird.f32 %v647_v26 }
 0x4eb   :  { %v681_v39 = vor.u32 1.1754944e-38, %v680_v33  ;;  %vm679_vm12 = vcmp.eq.f32.partialorder %v678_v36, 8.507059e+37  ;;  %v3236_v36 = vld [vmem:[%s4835_s10 + $0xec] sm:$0xf] }
 0x4ef   :  { %v3371_v27 = vpop.eup %3370 }
 0x4f0   :  { %v670_v29 = vmul.f32 %v3371_v27, %v647_v26  ;;  %v650_v31 = vpop.xlane.xlu1 %649  ;;  %vm675_vm9 = vweird.f32 %v3371_v27  ;;  %v2740_v26 = vor.u32 %v3237_v22, %v2739_v21  ;;  %v2675_v21 = vld [vmem:[%s4835_s10 + $0x60] sm:$0xf]  ;;  %v3221_v22 = vld [vmem:[%s4835_s10 + $0x6c] sm:$0xf0] }
 0x4f1   :  { %3372 = vrcp.f32 %v650_v31  ;;  %vm676_vm11 = vmor %vm674_vm10, %vm675_vm9  ;;  %v695_v45 = vand.u32 2147483648, %v650_v31  ;;  %v693_v47 = vand.u32 2147483647, %v650_v31  ;;  %vm689_vm14 = vweird.f32 %v650_v31 }
 0x4f2   :  { %v671_v32 = vsub.f32 1.0, %v670_v29  ;;  %v2747_v29 = vld [vmem:[%s4835_s10 + $0xe8] sm:$0xf]  ;;  %1080 = vmatpush.bf16.msrb.mxu2 %v2740_v26  ;;  %v2677_v26 = vld [vmem:[%s4835_s10 + $0x70] sm:$0xf0] }
 0x4f3   :  { %v696_v49 = vor.u32 1.1754944e-38, %v695_v45  ;;  %vm694_vm0 = vcmp.eq.f32.partialorder %v693_v47, 8.507059e+37 }
 0x4f4   :  { %v672_v35 = vmul.f32 %v3371_v27, %v671_v32 }
 0x4f6   :  { %v673_v37 = vadd.f32 %v3371_v27, %v672_v35 }
 0x4f7   :  { %v3373_v38 = vpop.eup %3372 }
 0x4f8   :  { %v685_v40 = vmul.f32 %v3373_v38, %v650_v31  ;;  %v653_v28 = vpop.xlane.xlu1 %652  ;;  %v677_v41 = vsel %vm676_vm11, %v3371_v27, %v673_v37  ;;  %vm690_vm13 = vweird.f32 %v3373_v38  ;;  %v2741_v27 = vld [vmem:[%s4835_s10 + $0xf0] sm:$0xf0]  ;;  %v3238_v31 = vld [vmem:[%s4835_s10 + $0xf4] sm:$0xf0]  ;;  %v2749_v37 = vld [vmem:[%s4835_s10 + $0xf8] sm:$0xf0] }
 0x4f9   :  { %3374 = vrcp.f32 %v653_v28  ;;  %v682_v42 = vsel %vm679_vm12, %v681_v39, %v677_v41  ;;  %vm691_vm15 = vmor %vm689_vm14, %vm690_vm13  ;;  %v710_v54 = vand.u32 2147483648, %v653_v28  ;;  %v708_v56 = vand.u32 2147483647, %v653_v28 }
 0x4fa   :  { %v686_v43 = vsub.f32 1.0, %v685_v40  ;;  %v683_v44 = vmul.f32 %v3989_v61, %v682_v42  ;;  %vm704_vm2 = vweird.f32 %v653_v28  ;;  %v2744_v33 = vor.u32 %v3235_v24, %v2741_v27  ;;  %v3219_v24 = vld [vmem:[%s4835_s10 + $0x64] sm:$0xf]  ;;  %v2683_v27 = vld [vmem:[%s4835_s10 + $0x68] sm:$0xf] }
 0x4fb   :  { %v711_v58 = vor.u32 1.1754944e-38, %v710_v54  ;;  %vm709_vm6 = vcmp.eq.f32.partialorder %v708_v56, 8.507059e+37  ;;  %v2748_v35 = vor.u32 %v3238_v31, %v2747_v29  ;;  %v3234_v54 = vld [vmem:[%s4835_s10 + $0xd4] sm:$0xf0]  ;;  %v2680_v31 = vor.u32 %v3219_v24, %v2677_v26  ;;  %v3245_v26 = vld [vmem:[#allocation5 + $0x30] sm:$0xff] }
 0x4fc   :  { %v687_v46 = vmul.f32 %v3373_v38, %v686_v43  ;;  %2590 = vmatmul.msk.f32.gmra.mxu0 %vm395_vm4, %v683_v44  ;;  %v3222_v29 = vld [vmem:[%s4835_s10 + $0x74] sm:$0xf0] }
 0x4fd   :  { %1093 = vmatpush.bf16.msra.mxu0 %v2744_v33  ;;  %1106 = vmatpush.bf16.msrb.mxu1 %v2748_v35  ;;  %v3220_v33 = vld [vmem:[%s4835_s10 + $0x6c] sm:$0xf]  ;;  %v2685_v35 = vld [vmem:[%s4835_s10 + $0x78] sm:$0xf0] }
 0x4fe   :  { %v688_v30 = vadd.f32 %v3373_v38, %v687_v46  ;;  %v866_v46 = vperm.slane %v3875_v11, 1  ;;  %v3246_v24 = vld [vmem:[#allocation5 + $0x38] sm:$0xff] }
 0x4ff   :  { %v3375_v48 = vpop.eup %3374 }
 0x500   :  { %v700_v34 = vmul.f32 %v3375_v48, %v653_v28  ;;  %v692_v50 = vsel %vm691_vm15, %v3373_v38, %v688_v30  ;;  %vm705_vm1 = vweird.f32 %v3375_v48  ;;  %v2752_v38 = vor.u32 %v3236_v36, %v2749_v37  ;;  %v2659_v37 = vld [vmem:[%s4835_s10 + $0x40] sm:$0xf] }
 0x501   :  { %v697_v51 = vsel %vm694_vm0, %v696_v49, %v692_v50  ;;  %vm706_vm5 = vmor %vm704_vm2, %vm705_vm1  ;;  %v3233_v50 = vld [vmem:[%s4835_s10 + $0xcc] sm:$0xf0]  ;;  %v2688_v36 = vor.u32 %v3220_v33, %v2685_v35  ;;  %v3242_v35 = vld [vmem:[#allocation5 + $0x18] sm:$0xff] }
 0x502   :  { %v701_v52 = vsub.f32 1.0, %v700_v34  ;;  %v698_v53 = vmul.f32 %v3993_v2, %v697_v51  ;;  %v2723_v34 = vld [vmem:[%s4835_s10 + $0xc0] sm:$0xf]  ;;  %v3231_v51 = vld [vmem:[%s4835_s10 + $0xc4] sm:$0xf]  ;;  %v3249_v33 = vld [vmem:[#allocation5 + $0x50] sm:$0xff] }
 0x504   :  { %v702_v55 = vmul.f32 %v3375_v48, %v701_v52  ;;  %2591 = vmatmul.msk.f32.gmra.mxu0 %vm395_vm4, %v698_v53  ;;  %v2724_v52 = vor.u32 %v3233_v50, %v2723_v34  ;;  %v2731_v53 = vld [vmem:[%s4835_s10 + $0xc8] sm:$0xf]  ;;  %v3211_v34 = vld [vmem:[%s4835_s10 + $0x24] sm:$0xf] }
 0x505   :  { %v2732_v56 = vor.u32 %v3234_v54, %v2731_v53 }
 0x506   :  { %v703_v57 = vadd.f32 %v3375_v48, %v702_v55  ;;  %1081 = vmatpush.bf16.msrb.mxu2 %v2724_v52  ;;  %v2651_v52 = vld [vmem:[%s4835_s10 + $0x28] sm:$0xf] }
 0x507   :  { %1107 = vmatpush.bf16.msrb.mxu1 %v2732_v56  ;;  %v2653_v56 = vld [vmem:[%s4835_s10 + $0x38] sm:$0xf0] }
 0x508   :  { %v707_v59 = vsel %vm706_vm5, %v3375_v48, %v703_v57  ;;  %v3232_v57 = vld [vmem:[%s4835_s10 + $0xcc] sm:$0xf] }
 0x509   :  { %v712_v60 = vsel %vm709_vm6, %v711_v58, %v707_v59  ;;  %v2733_v58 = vld [vmem:[%s4835_s10 + $0xd8] sm:$0xf0] }
 0x50a   :  { %v713_v61 = vmul.f32 %v3997_v5, %v712_v60  ;;  %v3203_v5 = vld [vmem:[%s4834_s9 + $0x20] sm:$0xff]  ;;  %v2736_v59 = vor.u32 %v3232_v57, %v2733_v58 }
 0x50b   :  { %840 = vmatpush.bf16.msra.mxu3 %v3203_v5  ;;  %v2707_v60 = vld [vmem:[%s4835_s10 + $0xa0] sm:$0xf]  ;;  %v3228_v5 = vld [vmem:[%s4835_s10 + $0xac] sm:$0xf] }
 0x50c   :  { %2592 = vmatmul.msk.f32.gmra.mxu0 %vm395_vm4, %v713_v61  ;;  %v3229_v61 = vld [vmem:[%s4835_s10 + $0xac] sm:$0xf0]  ;;  %v2627_v57 = vld [vmem:[%s4835_s10] sm:$0xf] }
 0x50d   :  { %v2708_v63 = vor.u32 %v3229_v61, %v2707_v60  ;;  %v3207_v60 = vld [vmem:[%s4835_s10 + $0x4] sm:$0xf]  ;;  %v2629_v61 = vld [vmem:[%s4835_s10 + $0x10] sm:$0xf0] }
 0x50f   :  { %841 = vmatpush.bf16.msra.mxu3 %v3202_v6  ;;  %v2717_v6 = vld [vmem:[%s4835_s10 + $0xb8] sm:$0xf0]  ;;  %1082 = vmatpush.bf16.msrb.mxu2 %v2708_v63  ;;  %v2632_v63 = vor.u32 %v3207_v60, %v2629_v61 }
 0x513   :  { %842 = vmatpush.bf16.msra.mxu3 %v3201_v7  ;;  %v2720_v7 = vor.u32 %v3228_v5, %v2717_v6  ;;  %v3254_v6 = vld [vmem:[#allocation5 + $0x78] sm:$0xff] }
 0x517   :  { %843 = vmatpush.bf16.msra.mxu3 %v3200_v8  ;;  %v2691_v8 = vld [vmem:[%s4835_s10 + $0x80] sm:$0xf] }
 0x51b   :  { %844 = vmatpush.bf16.msra.mxu3 %v3199_v3  ;;  %v3225_v3 = vld [vmem:[%s4835_s10 + $0x8c] sm:$0xf0] }
 0x51f   :  { %1119 = vmatpush.bf16.msrb.mxu3 %v2752_v38  ;;  %v3217_v38 = vld [vmem:[%s4835_s10 + $0x4c] sm:$0xf0] }
 0x523   :  { %1120 = vmatpush.bf16.msrb.mxu3 %v2736_v59  ;;  %v3209_v59 = vld [vmem:[%s4835_s10 + $0xc] sm:$0xf0] }
 0x527   :  { %1121 = vmatpush.bf16.msrb.mxu3 %v2720_v7 }
 0x541   :  { %v743_v1 = vpop.f32.mrf.mxu0 }
 0x579   :  { %v746_v2 = vpop.f32.mrf.mxu0 }
 0x57a   :  { %756 = vrot.lane.b32.xlu1 %v746_v2, %s3581_s25  ;;  %v3230_v2 = vld [vmem:[%s4835_s10 + $0xb4] sm:$0xf0] }
 0x581   :  { %v749_v20 = vpop.f32.mrf.mxu0 }
 0x582   :  { %760 = vrot.lane.b32.xlu2 %v749_v20, %s3576_s24  ;;  %v2712_v20 = vor.u32 %v3227_v62, %v2709_v0  ;;  %v2628_v62 = vor.u32 %v3209_v59, %v2627_v57  ;;  %v2635_v0 = vld [vmem:[%s4835_s10 + $0x8] sm:$0xf] }
 0x589   :  { %v752_v4 = vpop.f32.mrf.mxu0 }
 0x58a   :  { %764 = vrot.lane.b32.xlu2 %v752_v4, %s3580_s30 }
 0x5dc   :  { %v761_v9 = vpop.permute.xlu2 %760 }
 0x5e4   :  { %v765_v13 = vpop.permute.xlu2 %764 }
 0x5ec   :  { %v757_v10 = vpop.permute.xlu1 %756 }
 0x5ed   :  { %v767_v12 = vsel %vm152_vm3, %v743_v1, %v757_v10  ;;  %v2715_v1 = vld [vmem:[%s4835_s10 + $0xa8] sm:$0xf]  ;;  %v2692_v10 = vor.u32 %v3225_v3, %v2691_v8 }
 0x5ee   :  { %v769_v14 = vsel %vm768_vm7, %v767_v12, %v761_v9  ;;  %v2716_v4 = vor.u32 %v3230_v2, %v2715_v1  ;;  %v3223_v9 = vld [vmem:[%s4835_s10 + $0x84] sm:$0xf]  ;;  %v2693_v12 = vld [vmem:[%s4835_s10 + $0x90] sm:$0xf0]  ;;  %v3210_v1 = vld [vmem:[%s4835_s10 + $0x14] sm:$0xf0] }
 0x5ef   :  { %v771_v15 = vsel %vm770_vm8, %v769_v14, %v765_v13  ;;  %v2699_v13 = vld [vmem:[%s4835_s10 + $0x88] sm:$0xf]  ;;  %v3226_v14 = vld [vmem:[%s4835_s10 + $0x94] sm:$0xf0]  ;;  %1083 = vmatpush.bf16.msrb.mxu2 %v2692_v10  ;;  %v3208_v2 = vld [vmem:[%s4835_s10 + $0xc] sm:$0xf] }
 0x5f0   :  { %v772_v16 = vpack.c.bf16 %v771_v15, %v771_v15  ;;  %1108 = vmatpush.bf16.msrb.mxu1 %v2716_v4  ;;  %v2696_v15 = vor.u32 %v3223_v9, %v2693_v12  ;;  %v2637_v4 = vld [vmem:[%s4835_s10 + $0x18] sm:$0xf0] }
 0x5f1   :  { %v2640_v5 = vor.u32 %v3208_v2, %v2637_v4 }
 0x5f2   :  { %845 = vmatmul.bf16.vlgmr.msra.gmra.mxu3 %v772_v16  ;;  %v2700_v16 = vor.u32 %v3226_v14, %v2699_v13 }
 0x5f4   :  { %1109 = vmatpush.bf16.msrb.mxu1 %v2700_v16 }
 0x675   :  { %v846_v17 = vpop.f32.mrf.mxu3 }
 0x676   :  { %v850_v18 = vmul.f32 %v846_v17, %v846_v17 }
 0x678   :  { %851 = vadd.xlane.f32.xlu2 %v850_v18  ;;  %v2701_v18 = vld [vmem:[%s4835_s10 + $0x98] sm:$0xf0] }
 0x67d   :  { %v848_v19 = vpop.f32.mrf.mxu3 }
 0x6eb   :  { %v852_v25 = vpop.xlane.xlu2 %851 }
 0x6ec   :  { %v853_v32 = vadd.f32 1e-30, %v852_v25  ;;  %v2676_v25 = vor.u32 %v3221_v22, %v2675_v21  ;;  %v3253_v22 = vld [vmem:[#allocation5 + $0x70] sm:$0xff] }
 0x6ee   :  { %3376 = vrsqrt.f32 %v853_v32  ;;  %vm860_vm10 = vweird.f32 %v853_v32  ;;  %1084 = vmatpush.bf16.msrb.mxu2 %v2676_v25  ;;  %v3252_v25 = vld [vmem:[#allocation5 + $0x68] sm:$0xff] }
 0x6f4   :  { %v3377_v39 = vpop.eup %3376 }
 0x6f5   :  { %v855_v40 = vmul.f32 %v3377_v39, %v853_v32  ;;  %vm861_vm9 = vweird.f32 %v3377_v39  ;;  %v2684_v32 = vor.u32 %v3222_v29, %v2683_v27  ;;  %v3251_v27 = vld [vmem:[#allocation5 + $0x60] sm:$0xff]  ;;  %v3244_v29 = vld [vmem:[#allocation5 + $0x28] sm:$0xff] }
 0x6f6   :  { %vm862_vm11 = vmor %vm860_vm10, %vm861_vm9 }
 0x6f7   :  { %v856_v28 = vmul.f32 %v3377_v39, %v855_v40  ;;  %1110 = vmatpush.bf16.msrb.mxu1 %v2684_v32  ;;  %v2660_v40 = vor.u32 %v3217_v38, %v2659_v37  ;;  %v3243_v32 = vld [vmem:[#allocation5 + $0x20] sm:$0xff]  ;;  %v3241_v37 = vld [vmem:[#allocation5 + $0x10] sm:$0xff] }
 0x6f8   :  { %v3247_v38 = vld [vmem:[#allocation5 + $0x40] sm:$0xff] }
 0x6f9   :  { %v857_v41 = vmul.f32 0.5, %v856_v28  ;;  %v2661_v28 = vld [vmem:[%s4835_s10 + $0x50] sm:$0xf0]  ;;  %1085 = vmatpush.bf16.msrb.mxu2 %v2660_v40  ;;  %v3239_v40 = vld [vmem:[#allocation5] sm:$0xff] }
 0x6fb   :  { %v858_v42 = vsub.f32 1.5, %v857_v41  ;;  %v2667_v41 = vld [vmem:[%s4835_s10 + $0x48] sm:$0xf] }
 0x6fd   :  { %v859_v43 = vmul.f32 %v3377_v39, %v858_v42  ;;  %v3218_v42 = vld [vmem:[%s4835_s10 + $0x54] sm:$0xf0] }
 0x6ff   :  { %v863_v44 = vsel %vm862_vm11, %v3377_v39, %v859_v43  ;;  %v3215_v39 = vld [vmem:[%s4835_s10 + $0x44] sm:$0xf] }
 0x700   :  { %v864_v45 = vmul.f32 11.313708, %v863_v44  ;;  %v2664_v43 = vor.u32 %v3215_v39, %v2661_v28  ;;  %v2668_v44 = vor.u32 %v3218_v42, %v2667_v41  ;;  %v3240_v39 = vld [vmem:[#allocation5 + $0x8] sm:$0xff] }
 0x702   :  { %v865_v47 = vmul.f32 %v864_v45, %v846_v17  ;;  %v3224_v17 = vld [vmem:[%s4835_s10 + $0x8c] sm:$0xf]  ;;  %1111 = vmatpush.bf16.msrb.mxu1 %v2668_v44 }
 0x703   :  { %v2704_v19 = vor.u32 %v3224_v17, %v2701_v18  ;;  %v3216_v45 = vld [vmem:[%s4835_s10 + $0x4c] sm:$0xf]  ;;  %v885_v17 = vperm.slane %v3875_v11, 2 }
 0x704   :  { %v867_v30 = vmul.f32 %v866_v46, %v865_v47  ;;  %v2669_v46 = vld [vmem:[%s4835_s10 + $0x58] sm:$0xf0] }
 0x705   :  { %1122 = vmatpush.bf16.msrb.mxu3 %v2704_v19  ;;  %v2672_v47 = vor.u32 %v3216_v45, %v2669_v46 }
 0x706   :  { %v4089_v48 = vadd.f32 %v867_v30, %v3784_v23  ;;  %v2725_v23 = vld [vmem:[%s4835_s10 + $0xd0] sm:$0xf0]  ;;  %v2643_v30 = vld [vmem:[%s4835_s10 + $0x20] sm:$0xf] }
 0x707   :  { %v2728_v55 = vor.u32 %v3231_v51, %v2725_v23  ;;  %v2645_v51 = vld [vmem:[%s4835_s10 + $0x30] sm:$0xf0]  ;;  %v3214_v23 = vld [vmem:[%s4835_s10 + $0x34] sm:$0xf0] }
 0x708   :  { %v869_v49 = vmul.f32 %v4089_v48, %v4089_v48  ;;  %v2648_v53 = vor.u32 %v3211_v34, %v2645_v51  ;;  %v2652_v54 = vor.u32 %v3214_v23, %v2651_v52 }
 0x709   :  { %1094 = vmatpush.bf16.msra.mxu0 %v2728_v55  ;;  %1123 = vmatpush.bf16.msrb.mxu3 %v2688_v36  ;;  %v3212_v55 = vld [vmem:[%s4835_s10 + $0x2c] sm:$0xf] }
 0x70a   :  { %870 = vadd.xlane.f32.xlu1 %v869_v49  ;;  %v3213_v49 = vld [vmem:[%s4835_s10 + $0x2c] sm:$0xf0]  ;;  %v2656_v58 = vor.u32 %v3212_v55, %v2653_v56  ;;  %1112 = vmatpush.bf16.msrb.mxu1 %v2652_v54  ;;  %v3248_v36 = vld [vmem:[#allocation5 + $0x48] sm:$0xff] }
 0x70b   :  { %v2644_v50 = vor.u32 %v3213_v49, %v2643_v30 }
 0x70d   :  { %1095 = vmatpush.bf16.msra.mxu0 %v2712_v20  ;;  %1124 = vmatpush.bf16.msrb.mxu3 %v2672_v47  ;;  %v2636_v20 = vor.u32 %v3210_v1, %v2635_v0 }
 0x70e   :  { %1086 = vmatpush.bf16.msrb.mxu2 %v2644_v50 }
 0x70f   :  { %1113 = vmatpush.bf16.msrb.mxu1 %v2636_v20 }
 0x711   :  { %1096 = vmatpush.bf16.msra.mxu0 %v2696_v15  ;;  %1125 = vmatpush.bf16.msrb.mxu3 %v2656_v58 }
 0x712   :  { %1087 = vmatpush.bf16.msrb.mxu2 %v2628_v62 }
 0x715   :  { %1097 = vmatpush.bf16.msra.mxu0 %v2680_v31  ;;  %1126 = vmatpush.bf16.msrb.mxu3 %v2640_v5  ;;  %v3250_v31 = vld [vmem:[#allocation5 + $0x58] sm:$0xff] }
 0x716   :  { %1282 = vmatpush.bf16.msra.mxu2 %v3246_v24 }
 0x719   :  { %1098 = vmatpush.bf16.msra.mxu0 %v2664_v43 }
 0x71a   :  { %1283 = vmatpush.bf16.msra.mxu2 %v3245_v26 }
 0x71d   :  { %1099 = vmatpush.bf16.msra.mxu0 %v2648_v53 }
 0x71e   :  { %1284 = vmatpush.bf16.msra.mxu2 %v3244_v29  ;;  %v1324_v29 = vperm.slane %v3875_v11, 3  ;;  %v3267_v11 = vld [vmem:[%s4833_s8 + $0xe4] sm:$0xf] }
 0x721   :  { %1100 = vmatpush.bf16.msra.mxu0 %v2632_v63 }
 0x722   :  { %1285 = vmatpush.bf16.msra.mxu2 %v3243_v32 }
 0x725   :  { %1295 = vmatpush.bf16.msrb.mxu0 %v3254_v6 }
 0x726   :  { %1286 = vmatpush.bf16.msra.mxu2 %v3242_v35 }
 0x729   :  { %1296 = vmatpush.bf16.msrb.mxu0 %v3253_v22 }
 0x72a   :  { %1287 = vmatpush.bf16.msra.mxu2 %v3241_v37  ;;  %v3268_v37 = vld [vmem:[%s4833_s8 + $0xe4] sm:$0xf0] }
 0x72d   :  { %1297 = vmatpush.bf16.msrb.mxu0 %v3252_v25 }
 0x72e   :  { %1288 = vmatpush.bf16.msra.mxu2 %v3240_v39 }
 0x731   :  { %1298 = vmatpush.bf16.msrb.mxu0 %v3251_v27 }
 0x732   :  { %1289 = vmatpush.bf16.msra.mxu2 %v3239_v40  ;;  %v2877_v40 = vld [vmem:[%s4833_s8 + $0xd0] sm:$0xf] }
 0x735   :  { %1299 = vmatpush.bf16.msrb.mxu0 %v3250_v31 }
 0x739   :  { %1300 = vmatpush.bf16.msrb.mxu0 %v3249_v33 }
 0x73d   :  { %1301 = vmatpush.bf16.msrb.mxu0 %v3248_v36  ;;  %v2885_v36 = vld [vmem:[%s4833_s8 + $0xe0] sm:$0xf] }
 0x741   :  { %1302 = vmatpush.bf16.msrb.mxu0 %v3247_v38  ;;  %v2886_v38 = vor.u32 %v3268_v37, %v2885_v36 }
 0x77d   :  { %v871_v7 = vpop.xlane.xlu1 %870 }
 0x77e   :  { %v872_v8 = vadd.f32 1e-30, %v871_v7 }
 0x780   :  { %3378 = vrsqrt.f32 %v872_v8  ;;  %vm879_vm13 = vweird.f32 %v872_v8 }
 0x786   :  { %v3379_v3 = vpop.eup %3378 }
 0x787   :  { %v874_v9 = vmul.f32 %v3379_v3, %v872_v8  ;;  %vm880_vm12 = vweird.f32 %v3379_v3 }
 0x788   :  { %vm881_vm14 = vmor %vm879_vm13, %vm880_vm12 }
 0x789   :  { %v875_v10 = vmul.f32 %v3379_v3, %v874_v9  ;;  %v2893_v9 = vld [vmem:[%s4833_s8 + $0xf0] sm:$0xf] }
 0x78b   :  { %v876_v12 = vmul.f32 0.5, %v875_v10  ;;  %v3270_v10 = vld [vmem:[%s4833_s8 + $0xf4] sm:$0xf0] }
 0x78d   :  { %v877_v13 = vsub.f32 1.5, %v876_v12  ;;  %v3269_v12 = vld [vmem:[%s4833_s8 + $0xf4] sm:$0xf] }
 0x78f   :  { %v878_v14 = vmul.f32 %v3379_v3, %v877_v13 }
 0x791   :  { %v882_v15 = vsel %vm881_vm14, %v3379_v3, %v878_v14  ;;  %v2894_v14 = vor.u32 %v3270_v10, %v2893_v9 }
 0x792   :  { %v883_v16 = vmul.f32 11.313708, %v882_v15  ;;  %v2895_v15 = vld [vmem:[%s4833_s8 + $0xf8] sm:$0xf0] }
 0x793   :  { %1450 = vmatpush.bf16.msra.mxu1 %v2894_v14 }
 0x794   :  { %v884_v18 = vmul.f32 %v883_v16, %v4089_v48 }
 0x796   :  { %v886_v19 = vmul.f32 %v885_v17, %v884_v18  ;;  %v2898_v17 = vor.u32 %v3269_v12, %v2895_v15  ;;  %v2818_v15 = vld [vmem:[%s4837_s12 + $0x4] sm:$0xf] }
 0x797   :  { %1451 = vmatpush.bf16.msra.mxu1 %v2886_v38 }
 0x798   :  { %v887_v21 = vpack.c.bf16 %v886_v19, %v886_v19  ;;  %1463 = vmatpush.bf16.msra.mxu3 %v2898_v17  ;;  %v4368_v17 = vadd.f32 1.0, %v2818_v15 }
 0x79a   :  { %1088 = vmatmul.bf16.vlgmr.msrb.gmra.mxu2 %v887_v21  ;;  %1101 = vmatmul.bf16.vlgmr.msra.gmra.mxu0 %v887_v21 }
 0x79b   :  { %1114 = vmatmul.bf16.vlgmr.msrb.gmra.mxu1 %v887_v21  ;;  %1127 = vmatmul.bf16.vlgmr.msrb.gmra.mxu3 %v887_v21 }
 0x817   :  { %v1102_v28 = vpop.f32.mrf.mxu0 }
 0x818   :  { %v1133_v41 = vmul.f32 %v1102_v28, %v1102_v28  ;;  %v1115_v42 = vpop.f32.mrf.mxu1 }
 0x81a   :  { %v1135_v43 = vmul.f32 %v1133_v41, %v1102_v28  ;;  %v3265_v41 = vld [vmem:[%s4833_s8 + $0xd4] sm:$0xf] }
 0x81c   :  { %v1137_v44 = vmul.f32 0.044715, %v1135_v43  ;;  %v2879_v43 = vld [vmem:[%s4833_s8 + $0xd8] sm:$0xf0] }
 0x81d   :  { %v1089_v45 = vpop.f32.mrf.mxu2 }
 0x81e   :  { %v1139_v46 = vadd.f32 %v1137_v44, %v1102_v28  ;;  %v1132_v47 = vmul.f32 %v1089_v45, %v1089_v45  ;;  %v1128_v30 = vpop.f32.mrf.mxu3  ;;  %v2882_v44 = vor.u32 %v3265_v41, %v2879_v43 }
 0x81f   :  { %v1104_v49 = vpop.f32.mrf.mxu0 }
 0x820   :  { %v1141_v34 = vmul.f32 0.7978846, %v1139_v46  ;;  %v1134_v50 = vmul.f32 %v1132_v47, %v1089_v45  ;;  %v1117_v51 = vpop.f32.mrf.mxu1  ;;  %v3264_v46 = vld [vmem:[%s4833_s8 + $0xc4] sm:$0xf0]  ;;  %v3263_v47 = vld [vmem:[%s4833_s8 + $0xc4] sm:$0xf] }
 0x821   :  { %v2871_v49 = vld [vmem:[%s4833_s8 + $0xc8] sm:$0xf0]  ;;  %v3262_v51 = vld [vmem:[%s4833_s8 + $0xb4] sm:$0xf0] }
 0x822   :  { %v1136_v52 = vmul.f32 0.044715, %v1134_v50  ;;  %3380 = vtanh.f32 %v1141_v34  ;;  %v2874_v34 = vor.u32 %v3263_v47, %v2871_v49  ;;  %v2861_v50 = vld [vmem:[%s4833_s8 + $0xb0] sm:$0xf] }
 0x824   :  { %v1138_v23 = vadd.f32 %v1136_v52, %v1089_v45  ;;  %v3261_v52 = vld [vmem:[%s4833_s8 + $0xb4] sm:$0xf] }
 0x825   :  { %v1091_v53 = vpop.f32.mrf.mxu2 }
 0x826   :  { %v1140_v54 = vmul.f32 0.7978846, %v1138_v23  ;;  %v1130_v55 = vpop.f32.mrf.mxu3  ;;  %v2862_v23 = vor.u32 %v3262_v51, %v2861_v50  ;;  %v2863_v53 = vld [vmem:[%s4833_s8 + $0xb8] sm:$0xf0] }
 0x827   :  { %v2853_v55 = vld [vmem:[%s4833_s8 + $0xa0] sm:$0xf] }
 0x828   :  { %v3381_v56 = vpop.eup %3380  ;;  %3382 = vtanh.f32 %v1140_v54  ;;  %v2866_v54 = vor.u32 %v3261_v52, %v2863_v53 }
 0x829   :  { %v1145_v57 = vadd.f32 1.0, %v3381_v56  ;;  %v3260_v56 = vld [vmem:[%s4833_s8 + $0xa4] sm:$0xf0] }
 0x82b   :  { %v1147_v58 = vmul.f32 0.5, %v1145_v57  ;;  %v3259_v57 = vld [vmem:[%s4833_s8 + $0xa4] sm:$0xf] }
 0x82d   :  { %v1149_v59 = vmul.f32 %v1147_v58, %v1102_v28  ;;  %v3266_v28 = vld [vmem:[%s4833_s8 + $0xd4] sm:$0xf0]  ;;  %v2854_v58 = vor.u32 %v3260_v56, %v2853_v55 }
 0x82e   :  { %v3383_v60 = vpop.eup %3382 }
 0x82f   :  { %v1144_v61 = vadd.f32 1.0, %v3383_v60  ;;  %v1151_v62 = vmul.f32 %v1149_v59, %v1128_v30  ;;  %v2855_v59 = vld [vmem:[%s4833_s8 + $0xa8] sm:$0xf0] }
 0x830   :  { %v2858_v60 = vor.u32 %v3259_v57, %v2855_v59  ;;  %v2899_v57 = vld [vmem:[%s4839_s14 + $0x1] sm:$0x1] }
 0x831   :  { %v1146_v63 = vmul.f32 0.5, %v1144_v61  ;;  %v1153_v0 = vpack.c.bf16 %v1151_v62, %v1151_v62  ;;  %v2845_v61 = vld [vmem:[%s4833_s8 + $0x90] sm:$0xf]  ;;  %v3258_v62 = vld [vmem:[%s4833_s8 + $0x94] sm:$0xf0] }
 0x833   :  { %v1148_v1 = vmul.f32 %v1146_v63, %v1089_v45  ;;  %1303 = vmatmul.bf16.vlgmr.msrb.gmra.mxu0 %v1153_v0  ;;  %v2869_v45 = vld [vmem:[%s4833_s8 + $0xc0] sm:$0xf]  ;;  %v3257_v63 = vld [vmem:[%s4833_s8 + $0x94] sm:$0xf]  ;;  %v2846_v0 = vor.u32 %v3258_v62, %v2845_v61  ;;  %v1495_v61 = vadd.f32 1.0, %v2899_v57 }
 0x834   :  { %v2870_v30 = vor.u32 %v3264_v46, %v2869_v45 }
 0x835   :  { %v1150_v2 = vmul.f32 %v1148_v1, %v1115_v42  ;;  %v2878_v42 = vor.u32 %v3266_v28, %v2877_v40  ;;  %v2847_v1 = vld [vmem:[%s4833_s8 + $0x98] sm:$0xf0] }
 0x837   :  { %v1152_v20 = vpack.c.bf16 %v1150_v2, %v1150_v2  ;;  %1452 = vmatpush.bf16.msra.mxu1 %v2878_v42  ;;  %v2837_v2 = vld [vmem:[%s4833_s8 + $0x80] sm:$0xf] }
 0x839   :  { %1290 = vmatmul.bf16.vlgmr.msra.gmra.mxu2 %v1152_v20  ;;  %v3256_v20 = vld [vmem:[%s4833_s8 + $0x84] sm:$0xf0] }
 0x83b   :  { %1453 = vmatpush.bf16.msra.mxu1 %v2870_v30 }
 0x83f   :  { %1454 = vmatpush.bf16.msra.mxu1 %v2862_v23 }
 0x843   :  { %1455 = vmatpush.bf16.msra.mxu1 %v2854_v58 }
 0x847   :  { %1456 = vmatpush.bf16.msra.mxu1 %v2846_v0 }
 0x8b0   :  { %v1304_v4 = vpop.f32.mrf.mxu0 }
 0x8b8   :  { %v1306_v5 = vpop.f32.mrf.mxu0 }
 0x8b9   :  { %v3255_v5 = vld [vmem:[%s4833_s8 + $0x84] sm:$0xf] }
 0x8bc   :  { %v1291_v6 = vpop.f32.mrf.mxu2 }
 0x8bd   :  { %v1305_v7 = vadd.f32 %v1304_v4, %v1291_v6  ;;  %v2850_v4 = vor.u32 %v3257_v63, %v2847_v1  ;;  %v2839_v6 = vld [vmem:[%s4833_s8 + $0x88] sm:$0xf0] }
 0x8bf   :  { %v1308_v8 = vmul.f32 %v1305_v7, %v1305_v7 }
 0x8c1   :  { %1309 = vadd.xlane.f32.xlu0 %v1308_v8  ;;  %v2842_v8 = vor.u32 %v3255_v5, %v2839_v6 }
 0x8c4   :  { %v1293_v3 = vpop.f32.mrf.mxu2 }
 0x934   :  { %v1310_v13 = vpop.xlane.xlu0 %1309 }
 0x935   :  { %v1311_v16 = vadd.f32 1e-30, %v1310_v13 }
 0x937   :  { %3384 = vrsqrt.f32 %v1311_v16  ;;  %vm1318_vm0 = vweird.f32 %v1311_v16 }
 0x93d   :  { %v3385_v18 = vpop.eup %3384 }
 0x93e   :  { %v1313_v19 = vmul.f32 %v3385_v18, %v1311_v16  ;;  %vm1319_vm15 = vweird.f32 %v3385_v18 }
 0x93f   :  { %vm1320_vm1 = vmor %vm1318_vm0, %vm1319_vm15 }
 0x940   :  { %v1314_v21 = vmul.f32 %v3385_v18, %v1313_v19 }
 0x942   :  { %v1315_v22 = vmul.f32 0.5, %v1314_v21 }
 0x944   :  { %v1316_v24 = vsub.f32 1.5, %v1315_v22  ;;  %v1350_v22 = vperm.slane %v4368_v17, 0 }
 0x946   :  { %v1317_v25 = vmul.f32 %v3385_v18, %v1316_v24 }
 0x948   :  { %v1321_v26 = vsel %vm1320_vm1, %v3385_v18, %v1317_v25 }
 0x949   :  { %v1322_v27 = vmul.f32 11.313708, %v1321_v26 }
 0x94b   :  { %v1323_v31 = vmul.f32 %v1322_v27, %v1305_v7  ;;  %v2838_v7 = vor.u32 %v3256_v20, %v2837_v2 }
 0x94d   :  { %v1325_v32 = vmul.f32 %v1324_v29, %v1323_v31  ;;  %1457 = vmatpush.bf16.msra.mxu1 %v2838_v7 }
 0x94f   :  { %v4277_v33 = vadd.f32 %v1325_v32, %v4089_v48  ;;  %v2887_v48 = vld [vmem:[%s4833_s8 + $0xe8] sm:$0xf0] }
 0x950   :  { %v2890_v39 = vor.u32 %v3267_v11, %v2887_v48 }
 0x951   :  { %v1333_v35 = vmul.f32 %v4277_v33, %v4277_v33 }
 0x952   :  { %1464 = vmatpush.bf16.msra.mxu3 %v2890_v39 }
 0x953   :  { %1334 = vadd.xlane.f32.xlu2 %v1333_v35 }
 0x956   :  { %1465 = vmatpush.bf16.msra.mxu3 %v2882_v44 }
 0x95a   :  { %1466 = vmatpush.bf16.msra.mxu3 %v2874_v34 }
 0x95e   :  { %1467 = vmatpush.bf16.msra.mxu3 %v2866_v54  ;;  %v2900_v54 = vld [vmem:[%s4838_s13 + $0x1] sm:$0x1] }
 0x95f   :  { %v1605_v58 = vadd.f32 1.0, %v2900_v54 }
 0x961   :  { %v4402_v1 = vperm.slane %v1605_v58, 0 }
 0x962   :  { %1468 = vmatpush.bf16.msra.mxu3 %v2858_v60 }
 0x966   :  { %1469 = vmatpush.bf16.msra.mxu3 %v2850_v4  ;;  %v1497_v4 = vperm.slane %v1495_v61, 0 }
 0x96a   :  { %1470 = vmatpush.bf16.msra.mxu3 %v2842_v8 }
 0x9c6   :  { %v1335_v3 = vpop.xlane.xlu2 %1334 }
 0x9c7   :  { %v1336_v9 = vadd.f32 1e-30, %v1335_v3 }
 0x9c9   :  { %3386 = vrsqrt.f32 %v1336_v9  ;;  %vm1343_vm5 = vweird.f32 %v1336_v9 }
 0x9cf   :  { %v3387_v10 = vpop.eup %3386 }
 0x9d0   :  { %v1338_v12 = vmul.f32 %v3387_v10, %v1336_v9  ;;  %vm1344_vm2 = vweird.f32 %v3387_v10 }
 0x9d1   :  { %vm1345_vm6 = vmor %vm1343_vm5, %vm1344_vm2 }
 0x9d2   :  { %v1339_v13 = vmul.f32 %v3387_v10, %v1338_v12 }
 0x9d4   :  { %v1340_v14 = vmul.f32 0.5, %v1339_v13 }
 0x9d6   :  { %v1341_v16 = vsub.f32 1.5, %v1340_v14 }
 0x9d8   :  { %v1342_v18 = vmul.f32 %v3387_v10, %v1341_v16 }
 0x9da   :  { %v1346_v19 = vsel %vm1345_vm6, %v3387_v10, %v1342_v18 }
 0x9db   :  { %v1347_v21 = vmul.f32 11.313708, %v1346_v19 }
 0x9dd   :  { %v1348_v24 = vmul.f32 %v1347_v21, %v4277_v33 }
 0x9df   :  { %v1351_v25 = vmul.f32 %v1350_v22, %v1348_v24 }
 0x9e1   :  { %v1352_v26 = vpack.c.bf16 %v1351_v25, %v1351_v25 }
 0x9e3   :  { %1458 = vmatmul.bf16.vlgmr.msra.gmra.mxu1 %v1352_v26  ;;  %1471 = vmatmul.bf16.vlgmr.msra.gmra.mxu3 %v1352_v26 }
 0xa60   :  { %v1459_v27 = vpop.f32.mrf.mxu1 }
 0xa61   :  { %1532 = vrot.lane.b32.xlu0 %v1459_v27, %s3581_s25  ;;  %1529 = vrot.lane.b32.xlu2 %v1459_v27, %s3576_s24  ;;  %v1537_v35 = vmul.f32 %v1459_v27, %v1459_v27 }
 0xa62   :  { %1526 = vrot.lane.b32.xlu1 %v1459_v27, %s3580_s30 }
 0xa63   :  { %v1541_v37 = vsel %vm152_vm3, %v1537_v35, 0.0 }
 0xa66   :  { %v4375_v29 = vpop.f32.mrf.mxu3 }
 0xa67   :  { %v1478_v36 = vmul.f32 %v4375_v29, %v4375_v29 }
 0xa68   :  { %v1461_v31 = vpop.f32.mrf.mxu1 }
 0xa69   :  { %v1479_v11 = vsel %vm152_vm3, %v1478_v36, 0.0 }
 0xa6e   :  { %v1474_v32 = vpop.f32.mrf.mxu3 }
 0xa8a   :  { %1542 = vadd.xlane.f32.xlu2 %v1541_v37 }
 0xa8c   :  { %1480 = vadd.xlane.f32.xlu1 %v1479_v11 }
 0xabb   :  { %v4381_v38 = vpop.permute.xlu2 %1529 }
 0xabc   :  { %v1539_v48 = vmul.f32 %v4381_v38, %v4381_v38 }
 0xabe   :  { %v1547_v39 = vsel %vm152_vm3, %v1539_v48, 0.0 }
 0xabf   :  { %1548 = vadd.xlane.f32.xlu1 %v1547_v39 }
 0xad3   :  { %v4386_v40 = vpop.permute.xlu0 %1532 }
 0xad4   :  { %v1540_v28 = vmul.f32 %v4386_v40, %v4386_v40  ;;  %v4390_v41 = vpop.permute.xlu1 %1526 }
 0xad5   :  { %v1538_v42 = vmul.f32 %v4390_v41, %v4390_v41 }
 0xad6   :  { %v1550_v43 = vsel %vm152_vm3, %v1540_v28, 0.0 }
 0xad7   :  { %v1544_v44 = vsel %vm152_vm3, %v1538_v42, 0.0  ;;  %1551 = vadd.xlane.f32.xlu2 %v1550_v43 }
 0xad8   :  { %1545 = vadd.xlane.f32.xlu0 %v1544_v44 }
 0xafd   :  { %v1543_v45 = vpop.xlane.xlu2 %1542 }
 0xafe   :  { %v1553_v46 = vadd.f32 1e-30, %v1543_v45 }
 0xaff   :  { %v1481_v47 = vpop.xlane.xlu1 %1480 }
 0xb00   :  { %3388 = vrsqrt.f32 %v1553_v46  ;;  %v1482_v30 = vadd.f32 1e-30, %v1481_v47  ;;  %vm1563_vm10 = vweird.f32 %v1553_v46 }
 0xb02   :  { %3390 = vrsqrt.f32 %v1482_v30  ;;  %vm1489_vm13 = vweird.f32 %v1482_v30 }
 0xb06   :  { %v3389_v49 = vpop.eup %3388 }
 0xb07   :  { %v1558_v34 = vmul.f32 %v3389_v49, %v1553_v46  ;;  %vm1564_vm9 = vweird.f32 %v3389_v49 }
 0xb08   :  { %v3391_v50 = vpop.eup %3390  ;;  %vm1565_vm12 = vmor %vm1563_vm10, %vm1564_vm9 }
 0xb09   :  { %v1559_v51 = vmul.f32 %v3389_v49, %v1558_v34  ;;  %v1484_v52 = vmul.f32 %v3391_v50, %v1482_v30  ;;  %vm1490_vm11 = vweird.f32 %v3391_v50 }
 0xb0a   :  { %vm1491_vm14 = vmor %vm1489_vm13, %vm1490_vm11 }
 0xb0b   :  { %v1560_v23 = vmul.f32 0.5, %v1559_v51  ;;  %v1485_v53 = vmul.f32 %v3391_v50, %v1484_v52 }
 0xb0d   :  { %v1561_v55 = vsub.f32 1.5, %v1560_v23  ;;  %v1486_v56 = vmul.f32 0.5, %v1485_v53 }
 0xb0f   :  { %v1562_v59 = vmul.f32 %v3389_v49, %v1561_v55  ;;  %v1487_v60 = vsub.f32 1.5, %v1486_v56  ;;  %v159_v55 = vld [vmem:[%s4867_s5] sm:$0xff]  ;;  %v1330_v56 = vld [vmem:[#allocation11] sm:$0xff] }
 0xb11   :  { %v1566_v62 = vsel %vm1565_vm12, %v3389_v49, %v1562_v59  ;;  %v1488_v63 = vmul.f32 %v3391_v50, %v1487_v60 }
 0xb12   :  { %v1597_v0 = vmul.f32 5.656854, %v1566_v62 }
 0xb13   :  { %v1492_v2 = vsel %vm1491_vm14, %v3391_v50, %v1488_v63 }
 0xb14   :  { %v1493_v20 = vmul.f32 5.656854, %v1492_v2  ;;  %v1601_v5 = vmul.f32 %v1597_v0, %v1459_v27 }
 0xb16   :  { %v1494_v6 = vmul.f32 %v1493_v20, %v4375_v29  ;;  %v4406_v7 = vmul.f32 %v4402_v1, %v1601_v5 }
 0xb18   :  { %v4408_v8 = vmul.f32 %v1497_v4, %v1494_v6  ;;  %v1613_v3 = vsub.f32 0.0, %v4406_v7 }
 0xb1a   :  { %1506 = vrot.lane.b32.xlu1 %v4408_v8, %s3582_s6  ;;  %1621 = vrot.lane.b32.xlu2 %v1613_v3, %s3583_s2  ;;  %v1500_v9 = vsub.f32 0.0, %v4408_v8 }
 0xb1c   :  { %1502 = vrot.lane.b32.xlu0 %v1500_v9, %s3583_s2 }
 0xb24   :  { %1637 = vrot.lane.b32.xlu0 %v4406_v7, %s3582_s6 }
 0xb32   :  { %v1549_v10 = vpop.xlane.xlu1 %1548 }
 0xb33   :  { %v1555_v12 = vadd.f32 1e-30, %v1549_v10 }
 0xb35   :  { %3392 = vrsqrt.f32 %v1555_v12  ;;  %vm1583_vm0 = vweird.f32 %v1555_v12 }
 0xb3b   :  { %v3393_v13 = vpop.eup %3392 }
 0xb3c   :  { %v1578_v14 = vmul.f32 %v3393_v13, %v1555_v12  ;;  %vm1584_vm15 = vweird.f32 %v3393_v13 }
 0xb3d   :  { %vm1585_vm1 = vmor %vm1583_vm0, %vm1584_vm15 }
 0xb3e   :  { %v1579_v15 = vmul.f32 %v3393_v13, %v1578_v14 }
 0xb40   :  { %v1580_v16 = vmul.f32 0.5, %v1579_v15 }
 0xb42   :  { %v1581_v18 = vsub.f32 1.5, %v1580_v16 }
 0xb44   :  { %v1582_v19 = vmul.f32 %v3393_v13, %v1581_v18 }
 0xb46   :  { %v1586_v21 = vsel %vm1585_vm1, %v3393_v13, %v1582_v19 }
 0xb47   :  { %v1599_v22 = vmul.f32 5.656854, %v1586_v21 }
 0xb49   :  { %v1603_v24 = vmul.f32 %v1599_v22, %v4381_v38 }
 0xb4a   :  { %v1552_v25 = vpop.xlane.xlu2 %1551 }
 0xb4b   :  { %v1546_v26 = vpop.xlane.xlu0 %1545  ;;  %v1556_v27 = vadd.f32 1e-30, %v1552_v25  ;;  %v4420_v31 = vmul.f32 %v4402_v1, %v1603_v24 }
 0xb4c   :  { %v1554_v32 = vadd.f32 1e-30, %v1546_v26 }
 0xb4d   :  { %3394 = vrsqrt.f32 %v1556_v27  ;;  %v1615_v35 = vsub.f32 0.0, %v4420_v31  ;;  %vm1593_vm6 = vweird.f32 %v1556_v27 }
 0xb4e   :  { %3396 = vrsqrt.f32 %v1554_v32  ;;  %vm1573_vm9 = vweird.f32 %v1554_v32 }
 0xb4f   :  { %1625 = vrot.lane.b32.xlu1 %v1615_v35, %s3583_s2 }
 0xb53   :  { %v3395_v36 = vpop.eup %3394 }
 0xb54   :  { %v3397_v37 = vpop.eup %3396  ;;  %v1588_v11 = vmul.f32 %v3395_v36, %v1556_v27  ;;  %vm1594_vm2 = vweird.f32 %v3395_v36 }
 0xb55   :  { %v1568_v48 = vmul.f32 %v3397_v37, %v1554_v32  ;;  %vm1574_vm5 = vweird.f32 %v3397_v37  ;;  %vm1595_vm10 = vmor %vm1593_vm6, %vm1594_vm2 }
 0xb56   :  { %v1589_v39 = vmul.f32 %v3395_v36, %v1588_v11  ;;  %vm1575_vm11 = vmor %vm1573_vm9, %vm1574_vm5 }
 0xb57   :  { %v1569_v28 = vmul.f32 %v3397_v37, %v1568_v48 }
 0xb58   :  { %v1590_v38 = vmul.f32 0.5, %v1589_v39 }
 0xb59   :  { %v1570_v42 = vmul.f32 0.5, %v1569_v28 }
 0xb5a   :  { %v1591_v43 = vsub.f32 1.5, %v1590_v38 }
 0xb5b   :  { %v1571_v44 = vsub.f32 1.5, %v1570_v42 }
 0xb5c   :  { %v1592_v45 = vmul.f32 %v3395_v36, %v1591_v43 }
 0xb5d   :  { %v1572_v46 = vmul.f32 %v3397_v37, %v1571_v44 }
 0xb5e   :  { %v1596_v47 = vsel %vm1595_vm10, %v3395_v36, %v1592_v45 }
 0xb5f   :  { %v1576_v30 = vsel %vm1575_vm11, %v3397_v37, %v1572_v46  ;;  %v1600_v49 = vmul.f32 5.656854, %v1596_v47 }
 0xb60   :  { %v1598_v34 = vmul.f32 5.656854, %v1576_v30 }
 0xb61   :  { %v1604_v50 = vmul.f32 %v1600_v49, %v4386_v40  ;;  %v160_v40 = vld [vmem:[%s4867_s5 + $0x8] sm:$0xff] }
 0xb62   :  { %v1602_v51 = vmul.f32 %v1598_v34, %v4390_v41  ;;  %161 = vst.msk [vmem:[%s4847_s22] sm:$0xff] %vm152_vm3, %v159_v55  ;;  %v1329_v41 = vld [vmem:[#allocation9] sm:$0xff] }
 0xb63   :  { %v1612_v52 = vmul.f32 %v4402_v1, %v1604_v50  ;;  %162 = vst.msk [vmem:[%s4847_s22 + $0x8] sm:$0xff] %vm152_vm3, %v160_v40  ;;  %v1510_v60 = vmul.f32 %v4408_v8, %v1329_v41  ;;  %v1653_v20 = vmul.f32 %v4406_v7, %v1329_v41  ;;  %v1655_v24 = vmul.f32 %v4420_v31, %v1329_v41 }
 0xb64   :  { %v1610_v23 = vmul.f32 %v4402_v1, %v1602_v51 }
 0xb65   :  { %1643 = vrot.lane.b32.xlu1 %v1612_v52, %s3582_s6  ;;  %v1616_v54 = vsub.f32 0.0, %v1612_v52  ;;  %v1656_v35 = vmul.f32 %v1612_v52, %v1329_v41 }
 0xb66   :  { %1639 = vrot.lane.b32.xlu2 %v1610_v23, %s3582_s6  ;;  %v1614_v53 = vsub.f32 0.0, %v1610_v23  ;;  %v1654_v13 = vmul.f32 %v1610_v23, %v1329_v41 }
 0xb68   :  { %1623 = vrot.lane.b32.xlu0 %v1614_v53, %s3583_s2 }
 0xb6e   :  { %1627 = vrot.lane.b32.xlu2 %v1616_v54, %s3583_s2 }
 0xb70   :  { %1641 = vrot.lane.b32.xlu0 %v4420_v31, %s3582_s6  ;;  %v1328_v31 = vld [vmem:[%s4868_s18] sm:$0xff] }
 0xb74   :  { %v1622_v63 = vpop.permute.xlu2 %1621 }
 0xb8c   :  { %v1507_v57 = vpop.permute.xlu1 %1506 }
 0xb8e   :  { %v1503_v58 = vpop.permute.xlu0 %1502 }
 0xb8f   :  { %v1509_v59 = vsel %vm395_vm4, %v1503_v58, %v1507_v57 }
 0xb90   :  { %v1511_v61 = vmul.f32 %v1509_v59, %v1330_v56 }
 0xb92   :  { %v1512_v62 = vadd.f32 %v1511_v61, %v1510_v60 }
 0xb94   :  { %1514 = vst.msk [vmem:[%s1513_s21] sm:$0xff] %vm152_vm3, %v1512_v62  ;;  %v163_v62 = vld [vmem:[%s4869_s0] sm:$0xff] }
 0xb96   :  { %v1638_v0 = vpop.permute.xlu0 %1637 }
 0xb97   :  { %v1649_v1 = vsel %vm395_vm4, %v1622_v63, %v1638_v0  ;;  %v164_v63 = vld [vmem:[%s4869_s0 + $0x8] sm:$0xff] }
 0xb98   :  { %v1657_v2 = vmul.f32 %v1649_v1, %v1330_v56  ;;  %165 = vst.msk [vmem:[%s4848_s23] sm:$0xff] %vm152_vm3, %v163_v62 }
 0xb99   :  { %166 = vst.msk [vmem:[%s4848_s23 + $0x8] sm:$0xff] %vm152_vm3, %v164_v63 }
 0xb9a   :  { %v1661_v5 = vadd.f32 %v1657_v2, %v1653_v20 }
 0xb9b   :  { %v1522_v4 = vld [vmem:[%s4847_s22 + $0x8] sm:$0xff]  ;;  %v1521_v6 = vld [vmem:[%s4847_s22] sm:$0xff] }
 0xb9c   :  { %2901 = vmatpush.xpose.msk.msrb.mxu2 %vm152_vm3, %v1522_v4  ;;  %v1665_v8 = vmul.f32 0.17677669, %v1661_v5 }
 0xba0   :  { %2902 = vmatpush.xpose.msk.msrb.mxu2 %vm152_vm3, %v1521_v6 }
 0xba3   :  { %2903 = vmatmul.msk.f32.vlgmr.msrb.gmra.mxu2 %vm152_vm3, %v1665_v8 }
 0xbc0   :  { %v1640_v3 = vpop.permute.xlu2 %1639 }
 0xbc1   :  { %v1626_v9 = vpop.permute.xlu1 %1625 }
 0xbc8   :  { %v1628_v21 = vpop.permute.xlu2 %1627 }
 0xbd7   :  { %v1644_v16 = vpop.permute.xlu1 %1643 }
 0xbd8   :  { %v1652_v25 = vsel %vm395_vm4, %v1628_v21, %v1644_v16 }
 0xbd9   :  { %v1660_v27 = vmul.f32 %v1652_v25, %v1330_v56 }
 0xbda   :  { %v1624_v10 = vpop.permute.xlu0 %1623 }
 0xbdb   :  { %v1650_v7 = vsel %vm395_vm4, %v1624_v10, %v1640_v3  ;;  %v1664_v36 = vadd.f32 %v1660_v27, %v1656_v35 }
 0xbdc   :  { %v1658_v12 = vmul.f32 %v1650_v7, %v1330_v56 }
 0xbdd   :  { %v1668_v37 = vmul.f32 0.17677669, %v1664_v36 }
 0xbde   :  { %v1662_v14 = vadd.f32 %v1658_v12, %v1654_v13 }
 0xbe0   :  { %v1666_v15 = vmul.f32 0.17677669, %v1662_v14 }
 0xbe2   :  { %v1642_v18 = vpop.permute.xlu0 %1641  ;;  %2904 = vmatmul.msk.f32.gmra.mxu2 %vm152_vm3, %v1666_v15 }
 0xbe3   :  { %v1651_v19 = vsel %vm395_vm4, %v1626_v9, %v1642_v18 }
 0xbe4   :  { %v1659_v22 = vmul.f32 %v1651_v19, %v1330_v56 }
 0xbe6   :  { %v1663_v26 = vadd.f32 %v1659_v22, %v1655_v24 }
 0xbe8   :  { %v1667_v32 = vmul.f32 0.17677669, %v1663_v26 }
 0xbea   :  { %2905 = vmatmul.msk.f32.gmra.mxu2 %vm152_vm3, %v1667_v32 }
 0xbf2   :  { %2906 = vmatmul.msk.f32.gmra.mxu2 %vm152_vm3, %v1668_v37 }
 0xc26   :  { %v1704_v11 = vpop.f32.mrf.mxu2 }
 0xc27   :  { %v1716_v48 = vmul.f32 0.02, %v1704_v11 }
 0xc29   :  { %3398 = vtanh.f32 %v1716_v48 }
 0xc2f   :  { %v3399_v39 = vpop.eup %3398 }
 0xc30   :  { %v1724_v28 = vmul.f32 50.0, %v3399_v39 }
 0xc32   :  { %v1728_v38 = vadd.f32 %v1724_v28, %v1328_v31 }
 0xc34   :  { %v1732_v42 = vsel %vm395_vm4, %v1728_v38, -inf }
 0xc35   :  { %1733 = vmax.xlane.f32.xlu0 %v1732_v42 }
 0xc65   :  { %v1707_v43 = vpop.f32.mrf.mxu2 }
 0xc66   :  { %v1717_v44 = vmul.f32 0.02, %v1707_v43 }
 0xc68   :  { %3400 = vtanh.f32 %v1717_v44 }
 0xc6d   :  { %v1710_v45 = vpop.f32.mrf.mxu2 }
 0xc6e   :  { %v3401_v46 = vpop.eup %3400  ;;  %v1718_v47 = vmul.f32 0.02, %v1710_v45 }
 0xc6f   :  { %v1725_v30 = vmul.f32 50.0, %v3401_v46 }
 0xc70   :  { %3402 = vtanh.f32 %v1718_v47 }
 0xc71   :  { %v1729_v49 = vadd.f32 %v1725_v30, %v1328_v31 }
 0xc73   :  { %v1735_v34 = vsel %vm395_vm4, %v1729_v49, -inf }
 0xc74   :  { %1736 = vmax.xlane.f32.xlu2 %v1735_v34 }
 0xc75   :  { %v1713_v50 = vpop.f32.mrf.mxu2 }
 0xc76   :  { %v3403_v51 = vpop.eup %3402  ;;  %v1719_v52 = vmul.f32 0.02, %v1713_v50 }
 0xc77   :  { %v1726_v23 = vmul.f32 50.0, %v3403_v51 }
 0xc78   :  { %3404 = vtanh.f32 %v1719_v52 }
 0xc79   :  { %v1730_v53 = vadd.f32 %v1726_v23, %v1328_v31 }
 0xc7b   :  { %v1738_v54 = vsel %vm395_vm4, %v1730_v53, -inf }
 0xc7c   :  { %1739 = vmax.xlane.f32.xlu1 %v1738_v54 }
 0xc7e   :  { %v3405_v55 = vpop.eup %3404 }
 0xc7f   :  { %v1727_v40 = vmul.f32 50.0, %v3405_v55 }
 0xc81   :  { %v1731_v41 = vadd.f32 %v1727_v40, %v1328_v31 }
 0xc83   :  { %v1741_v56 = vsel %vm395_vm4, %v1731_v41, -inf }
 0xc84   :  { %1742 = vmax.xlane.f32.xlu0 %v1741_v56 }
 0xc98   :  { %1516 = vrot.lane.b32.xlu0 %v4375_v29, %s3580_s30 }
 0xca8   :  { %v1734_v57 = vpop.xlane.xlu0 %1733 }
 0xca9   :  { %v1744_v58 = vsub.f32 %v1728_v38, %v1734_v57 }
 0xcab   :  { %v1748_v59 = vmul.f32 1.442695, %v1744_v58 }
 0xcad   :  { %3406 = vpow2.f32 %v1748_v59 }
 0xcb3   :  { %v3407_v60 = vpop.eup %3406 }
 0xcb4   :  { %v1756_v61 = vsel %vm395_vm4, %v3407_v60, 0.0 }
 0xcb5   :  { %1757 = vadd.xlane.f32.xlu2 %v1756_v61 }
 0xce7   :  { %v1737_v29 = vpop.xlane.xlu2 %1736 }
 0xce8   :  { %v1745_v0 = vsub.f32 %v1729_v49, %v1737_v29 }
 0xcea   :  { %v1750_v1 = vmul.f32 1.442695, %v1745_v0 }
 0xcec   :  { %3408 = vpow2.f32 %v1750_v1 }
 0xcef   :  { %v1740_v2 = vpop.xlane.xlu1 %1739 }
 0xcf0   :  { %v1746_v20 = vsub.f32 %v1730_v53, %v1740_v2 }
 0xcf2   :  { %v4499_v4 = vpop.eup %3408  ;;  %v1752_v5 = vmul.f32 1.442695, %v1746_v20 }
 0xcf3   :  { %v1759_v6 = vsel %vm395_vm4, %v4499_v4, 0.0 }
 0xcf4   :  { %3410 = vpow2.f32 %v1752_v5  ;;  %1760 = vadd.xlane.f32.xlu1 %v1759_v6 }
 0xcf7   :  { %v1743_v8 = vpop.xlane.xlu0 %1742 }
 0xcf8   :  { %v1747_v3 = vsub.f32 %v1731_v41, %v1743_v8  ;;  %v3278_v8 = vld [vmem:[%s4834_s9 + $0x78] sm:$0xff] }
 0xcf9   :  { %1950 = vmatpush.bf16.msra.mxu2 %v3278_v8  ;;  %v3302_v8 = vld [vmem:[%s4835_s10 + $0x1b4] sm:$0xf0] }
 0xcfa   :  { %v4503_v9 = vpop.eup %3410  ;;  %v1754_v10 = vmul.f32 1.442695, %v1747_v3  ;;  %v3277_v3 = vld [vmem:[%s4834_s9 + $0x70] sm:$0xff] }
 0xcfb   :  { %v1762_v7 = vsel %vm395_vm4, %v4503_v9, 0.0 }
 0xcfc   :  { %3412 = vpow2.f32 %v1754_v10  ;;  %1763 = vadd.xlane.f32.xlu2 %v1762_v7  ;;  %v3275_v10 = vld [vmem:[%s4834_s9 + $0x60] sm:$0xff]  ;;  %v3274_v7 = vld [vmem:[%s4834_s9 + $0x58] sm:$0xff] }
 0xcfd   :  { %1951 = vmatpush.bf16.msra.mxu2 %v3277_v3 }
 0xd02   :  { %v4507_v12 = vpop.eup %3412 }
 0xd03   :  { %v1765_v13 = vsel %vm395_vm4, %v4507_v12, 0.0 }
 0xd04   :  { %1766 = vadd.xlane.f32.xlu1 %v1765_v13  ;;  %v3272_v13 = vld [vmem:[%s4834_s9 + $0x48] sm:$0xff] }
 0xd0a   :  { %v1517_v14 = vpop.permute.xlu0 %1516 }
 0xd0b   :  { %1520 = vst.msk [vmem:[%s1519_s20] sm:$0xff] %vm152_vm3, %v1517_v14  ;;  %v3271_v14 = vld [vmem:[%s4834_s9 + $0x40] sm:$0xff] }
 0xd12   :  { %v1524_v15 = vld [vmem:[%s4848_s23 + $0x8] sm:$0xff]  ;;  %v1523_v16 = vld [vmem:[%s4848_s23] sm:$0xff] }
 0xd13   :  { %1854 = vmatpush.msra.mxu0 %v1524_v15 }
 0xd15   :  { %1855 = vmatpush.msra.mxu0 %v1523_v16 }
 0xd28   :  { %v1758_v18 = vpop.xlane.xlu2 %1757 }
 0xd29   :  { %3414 = vrcp.f32 %v1758_v18  ;;  %v1779_v24 = vand.u32 2147483648, %v1758_v18  ;;  %v1777_v26 = vand.u32 2147483647, %v1758_v18  ;;  %vm1773_vm13 = vweird.f32 %v1758_v18 }
 0xd2b   :  { %v1780_v32 = vor.u32 1.1754944e-38, %v1779_v24  ;;  %vm1778_vm15 = vcmp.eq.f32.partialorder %v1777_v26, 8.507059e+37 }
 0xd2f   :  { %v3415_v19 = vpop.eup %3414 }
 0xd30   :  { %v1769_v21 = vmul.f32 %v3415_v19, %v1758_v18  ;;  %vm1774_vm12 = vweird.f32 %v3415_v19 }
 0xd31   :  { %vm1775_vm14 = vmor %vm1773_vm13, %vm1774_vm12 }
 0xd32   :  { %v1770_v22 = vsub.f32 1.0, %v1769_v21 }
 0xd34   :  { %v1771_v25 = vmul.f32 %v3415_v19, %v1770_v22 }
 0xd36   :  { %v1772_v27 = vadd.f32 %v3415_v19, %v1771_v25 }
 0xd38   :  { %v1776_v35 = vsel %vm1775_vm14, %v3415_v19, %v1772_v27 }
 0xd39   :  { %v1781_v36 = vsel %vm1778_vm15, %v1780_v32, %v1776_v35  ;;  %v3105_v32 = vld [vmem:[%s4835_s10 + $0x1e0] sm:$0xf]  ;;  %v3309_v35 = vld [vmem:[%s4835_s10 + $0x1ec] sm:$0xf0] }
 0xd3a   :  { %v1782_v37 = vmul.f32 %v3407_v60, %v1781_v36  ;;  %v3307_v36 = vld [vmem:[%s4835_s10 + $0x1e4] sm:$0xf] }
 0xd3c   :  { %2907 = vmatmul.msk.f32.vlgmr.msra.gmra.mxu0 %vm395_vm4, %v1782_v37 }
 0xd67   :  { %v1761_v11 = vpop.xlane.xlu1 %1760 }
 0xd68   :  { %3416 = vrcp.f32 %v1761_v11  ;;  %v1794_v38 = vand.u32 2147483648, %v1761_v11  ;;  %v1792_v43 = vand.u32 2147483647, %v1761_v11  ;;  %vm1788_vm1 = vweird.f32 %v1761_v11 }
 0xd6a   :  { %v1795_v46 = vor.u32 1.1754944e-38, %v1794_v38  ;;  %vm1793_vm5 = vcmp.eq.f32.partialorder %v1792_v43, 8.507059e+37  ;;  %v3308_v43 = vld [vmem:[%s4835_s10 + $0x1ec] sm:$0xf] }
 0xd6e   :  { %v3417_v48 = vpop.eup %3416 }
 0xd6f   :  { %v1784_v39 = vmul.f32 %v3417_v48, %v1761_v11  ;;  %v1764_v31 = vpop.xlane.xlu2 %1763  ;;  %vm1789_vm0 = vweird.f32 %v3417_v48  ;;  %v3106_v11 = vor.u32 %v3309_v35, %v3105_v32  ;;  %v3041_v32 = vld [vmem:[%s4835_s10 + $0x160] sm:$0xf]  ;;  %v3293_v35 = vld [vmem:[%s4835_s10 + $0x16c] sm:$0xf0] }
 0xd70   :  { %3418 = vrcp.f32 %v1764_v31  ;;  %vm1790_vm2 = vmor %vm1788_vm1, %vm1789_vm0  ;;  %v1809_v52 = vand.u32 2147483648, %v1764_v31  ;;  %v1807_v53 = vand.u32 2147483647, %v1764_v31  ;;  %vm1803_vm9 = vweird.f32 %v1764_v31 }
 0xd71   :  { %v1785_v28 = vsub.f32 1.0, %v1784_v39  ;;  %v3113_v39 = vld [vmem:[%s4835_s10 + $0x1e8] sm:$0xf]  ;;  %2194 = vmatpush.bf16.msrb.mxu1 %v3106_v11  ;;  %v3043_v11 = vld [vmem:[%s4835_s10 + $0x170] sm:$0xf0] }
 0xd72   :  { %v1810_v40 = vor.u32 1.1754944e-38, %v1809_v52  ;;  %vm1808_vm11 = vcmp.eq.f32.partialorder %v1807_v53, 8.507059e+37 }
 0xd73   :  { %v1786_v42 = vmul.f32 %v3417_v48, %v1785_v28 }
 0xd75   :  { %v1787_v44 = vadd.f32 %v3417_v48, %v1786_v42 }
 0xd76   :  { %v3419_v45 = vpop.eup %3418 }
 0xd77   :  { %v1799_v47 = vmul.f32 %v3419_v45, %v1764_v31  ;;  %v1767_v30 = vpop.xlane.xlu1 %1766  ;;  %v1791_v49 = vsel %vm1790_vm2, %v3417_v48, %v1787_v44  ;;  %vm1804_vm6 = vweird.f32 %v3419_v45  ;;  %v3107_v48 = vld [vmem:[%s4835_s10 + $0x1f0] sm:$0xf0]  ;;  %v3310_v31 = vld [vmem:[%s4835_s10 + $0x1f4] sm:$0xf0]  ;;  %v3115_v44 = vld [vmem:[%s4835_s10 + $0x1f8] sm:$0xf0] }
 0xd78   :  { %3420 = vrcp.f32 %v1767_v30  ;;  %v1796_v34 = vsel %vm1793_vm5, %v1795_v46, %v1791_v49  ;;  %vm1805_vm10 = vmor %vm1803_vm9, %vm1804_vm6  ;;  %v1824_v60 = vand.u32 2147483648, %v1767_v30  ;;  %v1822_v62 = vand.u32 2147483647, %v1767_v30 }
 0xd79   :  { %v1800_v50 = vsub.f32 1.0, %v1799_v47  ;;  %v1797_v51 = vmul.f32 %v4499_v4, %v1796_v34  ;;  %vm1818_vm13 = vweird.f32 %v1767_v30  ;;  %v3110_v38 = vor.u32 %v3307_v36, %v3107_v48  ;;  %v3291_v36 = vld [vmem:[%s4835_s10 + $0x164] sm:$0xf]  ;;  %v3049_v48 = vld [vmem:[%s4835_s10 + $0x168] sm:$0xf] }
 0xd7a   :  { %v1825_v29 = vor.u32 1.1754944e-38, %v1824_v60  ;;  %vm1823_vm15 = vcmp.eq.f32.partialorder %v1822_v62, 8.507059e+37  ;;  %v3114_v42 = vor.u32 %v3310_v31, %v3113_v39  ;;  %v3306_v60 = vld [vmem:[%s4835_s10 + $0x1d4] sm:$0xf0]  ;;  %v3046_v31 = vor.u32 %v3291_v36, %v3043_v11  ;;  %v3325_v11 = vld [vmem:[#allocation5 + $0xf0] sm:$0xff] }
 0xd7b   :  { %v1801_v23 = vmul.f32 %v3419_v45, %v1800_v50  ;;  %2908 = vmatmul.msk.f32.gmra.mxu0 %vm395_vm4, %v1797_v51  ;;  %2207 = vmatpush.bf16.msrb.mxu3 %v3110_v38  ;;  %v3294_v39 = vld [vmem:[%s4835_s10 + $0x174] sm:$0xf0]  ;;  %v3292_v38 = vld [vmem:[%s4835_s10 + $0x16c] sm:$0xf]  ;;  %vm2474_vm9 = vcmask 64512  }
 0xd7c   :  { %2220 = vmatpush.bf16.msrb.mxu0 %v3114_v42  ;;  %v3051_v42 = vld [vmem:[%s4835_s10 + $0x178] sm:$0xf0] }
 0xd7d   :  { %v1802_v54 = vadd.f32 %v3419_v45, %v1801_v23  ;;  %v1979_v23 = vperm.slane %v4368_v17, 1  ;;  %v3326_v36 = vld [vmem:[#allocation5 + $0xf8] sm:$0xff] }
 0xd7e   :  { %v3421_v55 = vpop.eup %3420 }
 0xd7f   :  { %v1814_v41 = vmul.f32 %v3421_v55, %v1767_v30  ;;  %v1806_v56 = vsel %vm1805_vm10, %v3419_v45, %v1802_v54  ;;  %vm1819_vm12 = vweird.f32 %v3421_v55  ;;  %v3118_v45 = vor.u32 %v3308_v43, %v3115_v44  ;;  %v3025_v44 = vld [vmem:[%s4835_s10 + $0x140] sm:$0xf] }
 0xd80   :  { %v1811_v57 = vsel %vm1808_vm11, %v1810_v40, %v1806_v56  ;;  %vm1820_vm14 = vmor %vm1818_vm13, %vm1819_vm12  ;;  %v3305_v56 = vld [vmem:[%s4835_s10 + $0x1cc] sm:$0xf0]  ;;  %v3054_v43 = vor.u32 %v3292_v38, %v3051_v42  ;;  %v3322_v42 = vld [vmem:[#allocation5 + $0xd8] sm:$0xff] }
 0xd81   :  { %v1815_v58 = vsub.f32 1.0, %v1814_v41  ;;  %v1812_v59 = vmul.f32 %v4503_v9, %v1811_v57  ;;  %v3276_v9 = vld [vmem:[%s4834_s9 + $0x68] sm:$0xff]  ;;  %v3089_v41 = vld [vmem:[%s4835_s10 + $0x1c0] sm:$0xf]  ;;  %v3303_v57 = vld [vmem:[%s4835_s10 + $0x1c4] sm:$0xf] }
 0xd82   :  { %1952 = vmatpush.bf16.msra.mxu2 %v3276_v9  ;;  %v3313_v38 = vld [vmem:[#allocation5 + $0x90] sm:$0xff] }
 0xd83   :  { %v1816_v61 = vmul.f32 %v3421_v55, %v1815_v58  ;;  %2909 = vmatmul.msk.f32.gmra.mxu0 %vm395_vm4, %v1812_v59  ;;  %v3090_v58 = vor.u32 %v3305_v56, %v3089_v41  ;;  %v3097_v59 = vld [vmem:[%s4835_s10 + $0x1c8] sm:$0xf]  ;;  %v3283_v41 = vld [vmem:[%s4835_s10 + $0x124] sm:$0xf] }
 0xd84   :  { %v3098_v62 = vor.u32 %v3306_v60, %v3097_v59 }
 0xd85   :  { %v1817_v63 = vadd.f32 %v3421_v55, %v1816_v61  ;;  %2195 = vmatpush.bf16.msrb.mxu1 %v3090_v58  ;;  %v3017_v58 = vld [vmem:[%s4835_s10 + $0x128] sm:$0xf] }
 0xd86   :  { %1953 = vmatpush.bf16.msra.mxu2 %v3275_v10  ;;  %2221 = vmatpush.bf16.msrb.mxu0 %v3098_v62  ;;  %v3300_v10 = vld [vmem:[%s4835_s10 + $0x1ac] sm:$0xf]  ;;  %v3019_v62 = vld [vmem:[%s4835_s10 + $0x138] sm:$0xf0] }
 0xd87   :  { %v1821_v0 = vsel %vm1820_vm14, %v3421_v55, %v1817_v63  ;;  %v3304_v63 = vld [vmem:[%s4835_s10 + $0x1cc] sm:$0xf] }
 0xd88   :  { %v1826_v1 = vsel %vm1823_vm15, %v1825_v29, %v1821_v0  ;;  %v3099_v29 = vld [vmem:[%s4835_s10 + $0x1d8] sm:$0xf0] }
 0xd89   :  { %v1827_v2 = vmul.f32 %v4507_v12, %v1826_v1  ;;  %v3273_v12 = vld [vmem:[%s4834_s9 + $0x50] sm:$0xff]  ;;  %v3102_v0 = vor.u32 %v3304_v63, %v3099_v29  ;;  %v3073_v1 = vld [vmem:[%s4835_s10 + $0x1a0] sm:$0xf] }
 0xd8a   :  { %1954 = vmatpush.bf16.msra.mxu2 %v3274_v7  ;;  %v3083_v7 = vld [vmem:[%s4835_s10 + $0x1b8] sm:$0xf0]  ;;  %v2993_v29 = vld [vmem:[%s4835_s10 + $0x100] sm:$0xf] }
 0xd8b   :  { %2910 = vmatmul.msk.f32.gmra.mxu0 %vm395_vm4, %v1827_v2  ;;  %v3301_v2 = vld [vmem:[%s4835_s10 + $0x1ac] sm:$0xf0] }
 0xd8e   :  { %1955 = vmatpush.bf16.msra.mxu2 %v3273_v12  ;;  %v3086_v12 = vor.u32 %v3300_v10, %v3083_v7  ;;  %v3318_v7 = vld [vmem:[#allocation5 + $0xb8] sm:$0xff] }
 0xd92   :  { %1956 = vmatpush.bf16.msra.mxu2 %v3272_v13  ;;  %v3057_v13 = vld [vmem:[%s4835_s10 + $0x180] sm:$0xf] }
 0xd96   :  { %1957 = vmatpush.bf16.msra.mxu2 %v3271_v14  ;;  %v3297_v14 = vld [vmem:[%s4835_s10 + $0x18c] sm:$0xf0] }
 0xd9a   :  { %2233 = vmatpush.bf16.msrb.mxu2 %v3118_v45  ;;  %v3289_v45 = vld [vmem:[%s4835_s10 + $0x14c] sm:$0xf0] }
 0xd9e   :  { %2234 = vmatpush.bf16.msrb.mxu2 %v3102_v0  ;;  %v3281_v0 = vld [vmem:[%s4835_s10 + $0x10c] sm:$0xf0] }
 0xda2   :  { %2235 = vmatpush.bf16.msrb.mxu2 %v3086_v12 }
 0xdb9   :  { %v1857_v20 = vpop.f32.mrf.mxu0 }
 0xdf8   :  { %v1860_v4 = vpop.f32.mrf.mxu0 }
 0xdf9   :  { %1870 = vrot.lane.b32.xlu2 %v1860_v4, %s3581_s25  ;;  %v3074_v4 = vor.u32 %v3301_v2, %v3073_v1  ;;  %v3279_v1 = vld [vmem:[%s4835_s10 + $0x104] sm:$0xf]  ;;  %v2994_v2 = vor.u32 %v3281_v0, %v2993_v29 }
 0xdfb   :  { %2196 = vmatpush.bf16.msrb.mxu1 %v3074_v4  ;;  %v3001_v4 = vld [vmem:[%s4835_s10 + $0x108] sm:$0xf] }
 0xe00   :  { %v1863_v5 = vpop.f32.mrf.mxu0 }
 0xe01   :  { %1874 = vrot.lane.b32.xlu1 %v1863_v5, %s3576_s24  ;;  %v3075_v5 = vld [vmem:[%s4835_s10 + $0x1b0] sm:$0xf0] }
 0xe08   :  { %v1866_v6 = vpop.f32.mrf.mxu0 }
 0xe09   :  { %1878 = vrot.lane.b32.xlu0 %v1866_v6, %s3580_s30  ;;  %v3081_v6 = vld [vmem:[%s4835_s10 + $0x1a8] sm:$0xf] }
 0xe0a   :  { %v3082_v9 = vor.u32 %v3302_v8, %v3081_v6 }
 0xe0c   :  { %2222 = vmatpush.bf16.msrb.mxu0 %v3082_v9  ;;  %v3003_v9 = vld [vmem:[%s4835_s10 + $0x118] sm:$0xf0] }
 0xe53   :  { %v1871_v15 = vpop.permute.xlu2 %1870 }
 0xe54   :  { %v1881_v18 = vsel %vm152_vm3, %v1857_v20, %v1871_v15  ;;  %v3299_v20 = vld [vmem:[%s4835_s10 + $0x1a4] sm:$0xf] }
 0xe55   :  { %v3078_v3 = vor.u32 %v3299_v20, %v3075_v5  ;;  %v3295_v15 = vld [vmem:[%s4835_s10 + $0x184] sm:$0xf]  ;;  %v2995_v20 = vld [vmem:[%s4835_s10 + $0x110] sm:$0xf0]  ;;  %v3282_v5 = vld [vmem:[%s4835_s10 + $0x114] sm:$0xf0] }
 0xe56   :  { %v2998_v6 = vor.u32 %v3279_v1, %v2995_v20  ;;  %v3002_v8 = vor.u32 %v3282_v5, %v3001_v4 }
 0xe73   :  { %v1875_v16 = vpop.permute.xlu1 %1874 }
 0xe74   :  { %v1882_v19 = vsel %vm768_vm7, %v1881_v18, %v1875_v16  ;;  %v3058_v16 = vor.u32 %v3297_v14, %v3057_v13  ;;  %v3059_v18 = vld [vmem:[%s4835_s10 + $0x190] sm:$0xf0] }
 0xe76   :  { %2197 = vmatpush.bf16.msrb.mxu1 %v3058_v16 }
 0xe7b   :  { %v1879_v21 = vpop.permute.xlu0 %1878 }
 0xe7c   :  { %v1883_v22 = vsel %vm770_vm8, %v1882_v19, %v1879_v21  ;;  %v3065_v19 = vld [vmem:[%s4835_s10 + $0x188] sm:$0xf]  ;;  %v3298_v21 = vld [vmem:[%s4835_s10 + $0x194] sm:$0xf0] }
 0xe7d   :  { %v1884_v24 = vpack.c.bf16 %v1883_v22, %v1883_v22  ;;  %v3062_v22 = vor.u32 %v3295_v15, %v3059_v18 }
 0xe7f   :  { %1958 = vmatmul.bf16.vlgmr.msra.gmra.mxu2 %v1884_v24  ;;  %v3066_v24 = vor.u32 %v3298_v21, %v3065_v19 }
 0xe81   :  { %2223 = vmatpush.bf16.msrb.mxu0 %v3066_v24 }
 0xf02   :  { %v1959_v25 = vpop.f32.mrf.mxu2 }
 0xf03   :  { %v1963_v26 = vmul.f32 %v1959_v25, %v1959_v25 }
 0xf05   :  { %1964 = vadd.xlane.f32.xlu0 %v1963_v26  ;;  %v3067_v26 = vld [vmem:[%s4835_s10 + $0x198] sm:$0xf0] }
 0xf0a   :  { %v1961_v27 = vpop.f32.mrf.mxu2 }
 0xf78   :  { %v1965_v37 = vpop.xlane.xlu0 %1964 }
 0xf79   :  { %v1966_v28 = vadd.f32 1e-30, %v1965_v37  ;;  %v3042_v37 = vor.u32 %v3293_v35, %v3041_v32  ;;  %v3317_v35 = vld [vmem:[#allocation5 + $0xb0] sm:$0xff] }
 0xf7b   :  { %3422 = vrsqrt.f32 %v1966_v28  ;;  %vm1973_vm4 = vweird.f32 %v1966_v28  ;;  %2198 = vmatpush.bf16.msrb.mxu1 %v3042_v37  ;;  %v3316_v37 = vld [vmem:[#allocation5 + $0xa8] sm:$0xff] }
 0xf81   :  { %v3423_v46 = vpop.eup %3422 }
 0xf82   :  { %v1968_v47 = vmul.f32 %v3423_v46, %v1966_v28  ;;  %vm1974_vm3 = vweird.f32 %v3423_v46  ;;  %v3050_v28 = vor.u32 %v3294_v39, %v3049_v48  ;;  %v3315_v48 = vld [vmem:[#allocation5 + $0xa0] sm:$0xff]  ;;  %v3324_v39 = vld [vmem:[#allocation5 + $0xe8] sm:$0xff] }
 0xf83   :  { %vm1975_vm7 = vmor %vm1973_vm4, %vm1974_vm3 }
 0xf84   :  { %v1969_v30 = vmul.f32 %v3423_v46, %v1968_v47  ;;  %2224 = vmatpush.bf16.msrb.mxu0 %v3050_v28  ;;  %v3026_v47 = vor.u32 %v3289_v45, %v3025_v44  ;;  %v3323_v28 = vld [vmem:[#allocation5 + $0xe0] sm:$0xff]  ;;  %v3321_v44 = vld [vmem:[#allocation5 + $0xd0] sm:$0xff] }
 0xf85   :  { %v3311_v45 = vld [vmem:[#allocation5 + $0x80] sm:$0xff] }
 0xf86   :  { %v1970_v49 = vmul.f32 0.5, %v1969_v30  ;;  %v3027_v30 = vld [vmem:[%s4835_s10 + $0x150] sm:$0xf0]  ;;  %2199 = vmatpush.bf16.msrb.mxu1 %v3026_v47  ;;  %v3319_v47 = vld [vmem:[#allocation5 + $0xc0] sm:$0xff] }
 0xf88   :  { %v1971_v34 = vsub.f32 1.5, %v1970_v49  ;;  %v3033_v49 = vld [vmem:[%s4835_s10 + $0x148] sm:$0xf] }
 0xf8a   :  { %v1972_v50 = vmul.f32 %v3423_v46, %v1971_v34  ;;  %v3290_v34 = vld [vmem:[%s4835_s10 + $0x154] sm:$0xf0] }
 0xf8c   :  { %v1976_v51 = vsel %vm1975_vm7, %v3423_v46, %v1972_v50  ;;  %v3287_v46 = vld [vmem:[%s4835_s10 + $0x144] sm:$0xf] }
 0xf8d   :  { %v1977_v52 = vmul.f32 11.313708, %v1976_v51  ;;  %v3030_v50 = vor.u32 %v3287_v46, %v3027_v30  ;;  %v3034_v51 = vor.u32 %v3290_v34, %v3033_v49  ;;  %v3320_v46 = vld [vmem:[#allocation5 + $0xc8] sm:$0xff] }
 0xf8f   :  { %v1978_v53 = vmul.f32 %v1977_v52, %v1959_v25  ;;  %v3296_v25 = vld [vmem:[%s4835_s10 + $0x18c] sm:$0xf]  ;;  %2225 = vmatpush.bf16.msrb.mxu0 %v3034_v51 }
 0xf90   :  { %v3070_v27 = vor.u32 %v3296_v25, %v3067_v26  ;;  %v3288_v52 = vld [vmem:[%s4835_s10 + $0x14c] sm:$0xf]  ;;  %v1998_v25 = vperm.slane %v4368_v17, 2 }
 0xf91   :  { %v1980_v54 = vmul.f32 %v1979_v23, %v1978_v53  ;;  %v3035_v23 = vld [vmem:[%s4835_s10 + $0x158] sm:$0xf0] }
 0xf92   :  { %2236 = vmatpush.bf16.msrb.mxu2 %v3070_v27  ;;  %v3038_v53 = vor.u32 %v3288_v52, %v3035_v23 }
 0xf93   :  { %v4585_v55 = vadd.f32 %v1980_v54, %v4277_v33  ;;  %v3091_v33 = vld [vmem:[%s4835_s10 + $0x1d0] sm:$0xf0]  ;;  %v3009_v54 = vld [vmem:[%s4835_s10 + $0x120] sm:$0xf] }
 0xf94   :  { %v3094_v61 = vor.u32 %v3303_v57, %v3091_v33  ;;  %v3011_v57 = vld [vmem:[%s4835_s10 + $0x130] sm:$0xf0]  ;;  %v3286_v33 = vld [vmem:[%s4835_s10 + $0x134] sm:$0xf0] }
 0xf95   :  { %v1982_v40 = vmul.f32 %v4585_v55, %v4585_v55  ;;  %v3014_v59 = vor.u32 %v3283_v41, %v3011_v57  ;;  %v3018_v60 = vor.u32 %v3286_v33, %v3017_v58 }
 0xf96   :  { %2208 = vmatpush.bf16.msrb.mxu3 %v3094_v61  ;;  %2237 = vmatpush.bf16.msrb.mxu2 %v3054_v43  ;;  %v3284_v61 = vld [vmem:[%s4835_s10 + $0x12c] sm:$0xf] }
 0xf97   :  { %1983 = vadd.xlane.f32.xlu2 %v1982_v40  ;;  %v3285_v40 = vld [vmem:[%s4835_s10 + $0x12c] sm:$0xf0]  ;;  %v3022_v63 = vor.u32 %v3284_v61, %v3019_v62  ;;  %2226 = vmatpush.bf16.msrb.mxu0 %v3018_v60  ;;  %v3312_v43 = vld [vmem:[#allocation5 + $0x88] sm:$0xff] }
 0xf98   :  { %v3010_v56 = vor.u32 %v3285_v40, %v3009_v54 }
 0xf9a   :  { %2209 = vmatpush.bf16.msrb.mxu3 %v3078_v3  ;;  %2238 = vmatpush.bf16.msrb.mxu2 %v3038_v53  ;;  %v3280_v3 = vld [vmem:[%s4835_s10 + $0x10c] sm:$0xf] }
 0xf9b   :  { %2200 = vmatpush.bf16.msrb.mxu1 %v3010_v56  ;;  %v3006_v10 = vor.u32 %v3280_v3, %v3003_v9  ;;  %2227 = vmatpush.bf16.msrb.mxu0 %v3002_v8 }
 0xf9e   :  { %2210 = vmatpush.bf16.msrb.mxu3 %v3062_v22  ;;  %2239 = vmatpush.bf16.msrb.mxu2 %v3022_v63 }
 0xf9f   :  { %2201 = vmatpush.bf16.msrb.mxu1 %v2994_v2 }
 0xfa2   :  { %2211 = vmatpush.bf16.msrb.mxu3 %v3046_v31  ;;  %2240 = vmatpush.bf16.msrb.mxu2 %v3006_v10  ;;  %v3314_v31 = vld [vmem:[#allocation5 + $0x98] sm:$0xff] }
 0xfa3   :  { %2397 = vmatpush.bf16.msra.mxu1 %v3318_v7 }
 0xfa6   :  { %2212 = vmatpush.bf16.msrb.mxu3 %v3030_v50 }
 0xfa7   :  { %2398 = vmatpush.bf16.msra.mxu1 %v3317_v35 }
 0xfaa   :  { %2213 = vmatpush.bf16.msrb.mxu3 %v3014_v59 }
 0xfab   :  { %2399 = vmatpush.bf16.msra.mxu1 %v3316_v37 }
 0xfae   :  { %2214 = vmatpush.bf16.msrb.mxu3 %v2998_v6 }
 0xfaf   :  { %2400 = vmatpush.bf16.msra.mxu1 %v3315_v48 }
 0xfb2   :  { %2410 = vmatpush.bf16.msra.mxu3 %v3326_v36 }
 0xfb3   :  { %2401 = vmatpush.bf16.msra.mxu1 %v3314_v31 }
 0xfb6   :  { %2411 = vmatpush.bf16.msra.mxu3 %v3325_v11 }
 0xfb7   :  { %2402 = vmatpush.bf16.msra.mxu1 %v3313_v38 }
 0xfba   :  { %2412 = vmatpush.bf16.msra.mxu3 %v3324_v39 }
 0xfbb   :  { %2403 = vmatpush.bf16.msra.mxu1 %v3312_v43 }
 0xfbe   :  { %2413 = vmatpush.bf16.msra.mxu3 %v3323_v28 }
 0xfbf   :  { %2404 = vmatpush.bf16.msra.mxu1 %v3311_v45 }
 0xfc2   :  { %2414 = vmatpush.bf16.msra.mxu3 %v3322_v42 }
 0xfc6   :  { %2415 = vmatpush.bf16.msra.mxu3 %v3321_v44 }
 0xfca   :  { %2416 = vmatpush.bf16.msra.mxu3 %v3320_v46 }
 0xfce   :  { %2417 = vmatpush.bf16.msra.mxu3 %v3319_v47 }
0x100a   :  { %v1984_v12 = vpop.xlane.xlu2 %1983 }
0x100b   :  { %v1985_v13 = vadd.f32 1e-30, %v1984_v12 }
0x100d   :  { %3424 = vrsqrt.f32 %v1985_v13  ;;  %vm1992_vm0 = vweird.f32 %v1985_v13 }
0x1013   :  { %v3425_v14 = vpop.eup %3424 }
0x1014   :  { %v1987_v15 = vmul.f32 %v3425_v14, %v1985_v13  ;;  %vm1993_vm8 = vweird.f32 %v3425_v14 }
0x1015   :  { %vm1994_vm1 = vmor %vm1992_vm0, %vm1993_vm8 }
0x1016   :  { %v1988_v16 = vmul.f32 %v3425_v14, %v1987_v15 }
0x1018   :  { %v1989_v18 = vmul.f32 0.5, %v1988_v16 }
0x101a   :  { %v1990_v19 = vsub.f32 1.5, %v1989_v18 }
0x101c   :  { %v1991_v21 = vmul.f32 %v3425_v14, %v1990_v19 }
0x101e   :  { %v1995_v22 = vsel %vm1994_vm1, %v3425_v14, %v1991_v21 }
0x101f   :  { %v1996_v24 = vmul.f32 11.313708, %v1995_v22 }
0x1021   :  { %v1997_v26 = vmul.f32 %v1996_v24, %v4585_v55 }
0x1023   :  { %v1999_v27 = vmul.f32 %v1998_v25, %v1997_v26 }
0x1025   :  { %v2000_v32 = vpack.c.bf16 %v1999_v27, %v1999_v27 }
0x1027   :  { %2202 = vmatmul.bf16.vlgmr.msrb.gmra.mxu1 %v2000_v32  ;;  %2215 = vmatmul.bf16.vlgmr.msrb.gmra.mxu3 %v2000_v32 }
0x1028   :  { %2228 = vmatmul.bf16.vlgmr.msrb.gmra.mxu0 %v2000_v32  ;;  %2241 = vmatmul.bf16.vlgmr.msrb.gmra.mxu2 %v2000_v32  ;;  %v2439_v32 = vperm.slane %v4368_v17, 3 }
0x10a4   :  { %v2203_v30 = vpop.f32.mrf.mxu1 }
0x10a5   :  { %v2246_v49 = vmul.f32 %v2203_v30, %v2203_v30  ;;  %v2229_v34 = vpop.f32.mrf.mxu0 }
0x10a7   :  { %v2248_v50 = vmul.f32 %v2246_v49, %v2203_v30 }
0x10a9   :  { %v2250_v51 = vmul.f32 0.044715, %v2248_v50 }
0x10aa   :  { %v2216_v52 = vpop.f32.mrf.mxu3 }
0x10ab   :  { %v2252_v23 = vadd.f32 %v2250_v51, %v2203_v30  ;;  %v2247_v53 = vmul.f32 %v2216_v52, %v2216_v52  ;;  %v2242_v54 = vpop.f32.mrf.mxu2 }
0x10ac   :  { %v2205_v40 = vpop.f32.mrf.mxu1 }
0x10ad   :  { %v2254_v41 = vmul.f32 0.7978846, %v2252_v23  ;;  %v2249_v56 = vmul.f32 %v2247_v53, %v2216_v52  ;;  %v2231_v57 = vpop.f32.mrf.mxu0 }
0x10af   :  { %3426 = vtanh.f32 %v2254_v41  ;;  %v2251_v58 = vmul.f32 0.044715, %v2249_v56 }
0x10b1   :  { %v2253_v33 = vadd.f32 %v2251_v58, %v2216_v52 }
0x10b2   :  { %v2218_v59 = vpop.f32.mrf.mxu3 }
0x10b3   :  { %v2255_v60 = vmul.f32 0.7978846, %v2253_v33  ;;  %v2244_v61 = vpop.f32.mrf.mxu2 }
0x10b5   :  { %v3427_v62 = vpop.eup %3426  ;;  %3428 = vtanh.f32 %v2255_v60 }
0x10b6   :  { %v2258_v63 = vadd.f32 1.0, %v3427_v62 }
0x10b8   :  { %v2260_v29 = vmul.f32 0.5, %v2258_v63 }
0x10ba   :  { %v2262_v0 = vmul.f32 %v2260_v29, %v2203_v30 }
0x10bb   :  { %v3429_v1 = vpop.eup %3428 }
0x10bc   :  { %v2264_v2 = vmul.f32 %v2262_v0, %v2229_v34  ;;  %v2259_v20 = vadd.f32 1.0, %v3429_v1 }
0x10be   :  { %v2266_v4 = vpack.c.bf16 %v2264_v2, %v2264_v2  ;;  %v2261_v5 = vmul.f32 0.5, %v2259_v20 }
0x10c0   :  { %v2263_v6 = vmul.f32 %v2261_v5, %v2216_v52  ;;  %2405 = vmatmul.bf16.vlgmr.msra.gmra.mxu1 %v2266_v4 }
0x10c2   :  { %v2265_v8 = vmul.f32 %v2263_v6, %v2242_v54 }
0x10c4   :  { %v2267_v3 = vpack.c.bf16 %v2265_v8, %v2265_v8 }
0x10c6   :  { %2418 = vmatmul.bf16.vlgmr.msra.gmra.mxu3 %v2267_v3 }
0x113d   :  { %v2406_v9 = vpop.f32.mrf.mxu1 }
0x1145   :  { %v2408_v10 = vpop.f32.mrf.mxu1 }
0x1149   :  { %v2419_v7 = vpop.f32.mrf.mxu3 }
0x114a   :  { %v2420_v12 = vadd.f32 %v2419_v7, %v2406_v9 }
0x114c   :  { %v2423_v13 = vmul.f32 %v2420_v12, %v2420_v12 }
0x114e   :  { %2424 = vadd.xlane.f32.xlu1 %v2423_v13 }
0x1151   :  { %v2421_v14 = vpop.f32.mrf.mxu3 }
0x11c1   :  { %v2425_v15 = vpop.xlane.xlu1 %2424 }
0x11c2   :  { %v2426_v16 = vadd.f32 1e-30, %v2425_v15 }
0x11c4   :  { %3430 = vrsqrt.f32 %v2426_v16  ;;  %vm2433_vm5 = vweird.f32 %v2426_v16 }
0x11ca   :  { %v3431_v18 = vpop.eup %3430 }
0x11cb   :  { %v2428_v19 = vmul.f32 %v3431_v18, %v2426_v16  ;;  %vm2434_vm2 = vweird.f32 %v3431_v18 }
0x11cc   :  { %vm2435_vm6 = vmor %vm2433_vm5, %vm2434_vm2 }
0x11cd   :  { %v2429_v21 = vmul.f32 %v3431_v18, %v2428_v19 }
0x11cf   :  { %v2430_v22 = vmul.f32 0.5, %v2429_v21 }
0x11d1   :  { %v2431_v24 = vsub.f32 1.5, %v2430_v22 }
0x11d3   :  { %v2432_v25 = vmul.f32 %v3431_v18, %v2431_v24 }
0x11d5   :  { %v2436_v26 = vsel %vm2435_vm6, %v3431_v18, %v2432_v25 }
0x11d6   :  { %v2437_v27 = vmul.f32 11.313708, %v2436_v26 }
0x11d8   :  { %v2438_v35 = vmul.f32 %v2437_v27, %v2420_v12 }
0x11da   :  { %v2440_v36 = vmul.f32 %v2439_v32, %v2438_v35 }
0x11dc   :  { %v2441_v37 = vadd.f32 %v2440_v36, %v4585_v55 }
0x11de   :  { %2442 = vxpose.xlu0.b32.start.end [1/1] (short) %v2441_v37, 128 }
0x1282   :  { %v2458_v11 = vpop.trf.xlu0 }
0x1283   :  { %2475 = vst.msk [vmem:[%s4844_s19] sm:$0xff] %vm2474_vm9, %v2458_v11 }
0x128a   :  { %v2459_v48 = vpop.trf.xlu0 }
0x128b   :  { %2476 = vst.msk [vmem:[%s4844_s19 + $0x8] sm:$0xff] %vm2474_vm9, %v2459_v48 }
0x1292   :  { %v2460_v39 = vpop.trf.xlu0 }
0x1293   :  { %2477 = vst.msk [vmem:[%s4844_s19 + $0x10] sm:$0xff] %vm2474_vm9, %v2460_v39 }
0x129a   :  { %v2461_v17 = vpop.trf.xlu0 }
0x129b   :  { %2478 = vst.msk [vmem:[%s4844_s19 + $0x18] sm:$0xff] %vm2474_vm9, %v2461_v17 }
0x12a2   :  { %v2462_v55 = vpop.trf.xlu0 }
0x12a3   :  { %2479 = vst.msk [vmem:[%s4844_s19 + $0x20] sm:$0xff] %vm2474_vm9, %v2462_v55 }
0x12aa   :  { %v2463_v31 = vpop.trf.xlu0 }
0x12ab   :  { %2480 = vst.msk [vmem:[%s4844_s19 + $0x28] sm:$0xff] %vm2474_vm9, %v2463_v31 }
0x12b2   :  { %v2464_v28 = vpop.trf.xlu0 }
0x12b3   :  { %2481 = vst.msk [vmem:[%s4844_s19 + $0x30] sm:$0xff] %vm2474_vm9, %v2464_v28 }
0x12ba   :  { %v2465_v38 = vpop.trf.xlu0 }
0x12bb   :  { %2482 = vst.msk [vmem:[%s4844_s19 + $0x38] sm:$0xff] %vm2474_vm9, %v2465_v38 }
0x12c2   :  { %v2466_v42 = vpop.trf.xlu0 }
0x12c3   :  { %2483 = vst.msk [vmem:[%s4844_s19 + $0x40] sm:$0xff] %vm2474_vm9, %v2466_v42 }
0x12ca   :  { %v2467_v43 = vpop.trf.xlu0 }
0x12cb   :  { %2484 = vst.msk [vmem:[%s4844_s19 + $0x48] sm:$0xff] %vm2474_vm9, %v2467_v43 }
0x12d2   :  { %v2468_v44 = vpop.trf.xlu0 }
0x12d3   :  { %2485 = vst.msk [vmem:[%s4844_s19 + $0x50] sm:$0xff] %vm2474_vm9, %v2468_v44 }
0x12da   :  { %v2469_v45 = vpop.trf.xlu0 }
0x12db   :  { %2486 = vst.msk [vmem:[%s4844_s19 + $0x58] sm:$0xff] %vm2474_vm9, %v2469_v45 }
0x12e2   :  { %v2470_v46 = vpop.trf.xlu0 }
0x12e3   :  { %2487 = vst.msk [vmem:[%s4844_s19 + $0x60] sm:$0xff] %vm2474_vm9, %v2470_v46 }
0x12ea   :  { %v2471_v47 = vpop.trf.xlu0 }
0x12eb   :  { %2488 = vst.msk [vmem:[%s4844_s19 + $0x68] sm:$0xff] %vm2474_vm9, %v2471_v47 }
0x12f2   :  { %v2472_v30 = vpop.trf.xlu0 }
0x12f3   :  { %2489 = vst.msk [vmem:[%s4844_s19 + $0x70] sm:$0xff] %vm2474_vm9, %v2472_v30 }
0x12fa   :  { %v2473_v49 = vpop.trf.xlu0 }
0x12fb   :  { %2490 = vst.msk [vmem:[%s4844_s19 + $0x78] sm:$0xff] %vm2474_vm9, %v2473_v49 }
0x12fc   :  { %2511 = vsyncpa [#allocation3], 1 }
0x12fd   :  { %2512 = vsyncpa [#allocation7], 1 }
0x12fe   :  { %2513 = vsyncpa [#allocation10], 1 }
0x12ff   :  { %2514 = vsyncpa [#allocation4], 1 }

</bundles_post_ra>
